<compile_context>
chip_gen: v7x
topology: tpu7x:2x2x1
jax: 0.10.0
libtpu: 0.0.40
codegen_flags: <defaults>
</compile_context>

<pallas_src>
import functools

import jax
import jax.numpy as jnp
from jax.experimental import pallas as pl
from jax.experimental.pallas import tpu as pltpu


MATMUL_DTYPE = jnp.bfloat16   # MXU-native operand dtype; accumulation stays f32.


def _round_up(x, m):
    return (x + m - 1) // m * m


# ----------------------- tiled linear: y = x @ w + b ------------------------

def _linear_kernel(x_ref, w_ref, b_ref, o_ref, *, relu):
    x = x_ref[...].astype(MATMUL_DTYPE)
    acc = jnp.dot(x, w_ref[...], preferred_element_type=jnp.float32) + b_ref[...]
    if relu:
        acc = jnp.maximum(acc, 0.0)
    o_ref[...] = acc.astype(o_ref.dtype)


def pallas_linear(x, w, b=None, relu=False, tile_m=256, tile_n=512):
    """x: (M, K) f32, w: (K, N) (pre-cast bf16 preferred), b: (N,)/(1,N) -> (M, N) f32."""
    M, K = x.shape
    K2, N = w.shape
    assert K == K2
    w = w.astype(MATMUL_DTYPE)                     # no-op if already bf16
    if b is None:
        b = jnp.zeros((N,), jnp.float32)
    if b.ndim == 1:
        b = b.reshape(1, N)

    tm = min(tile_m, _round_up(M, 8))
    Mp = _round_up(M, tm)
    xp = x if Mp == M else jnp.pad(x, ((0, Mp - M), (0, 0)))

    # Tile N only when it is large and tileable lane-densely.
    tn = tile_n if (N >= 2 * tile_n and N % tile_n == 0) else N

    out = pl.pallas_call(
        functools.partial(_linear_kernel, relu=relu),
        out_shape=jax.ShapeDtypeStruct((Mp, N), jnp.float32),
        grid=(Mp // tm, N // tn),
        in_specs=[
            pl.BlockSpec((tm, K), lambda i, j: (i, 0)),
            pl.BlockSpec((K, tn), lambda i, j: (0, j)),
            pl.BlockSpec((1, tn), lambda i, j: (0, j)),
        ],
        out_specs=pl.BlockSpec((tm, tn), lambda i, j: (i, j)),
        compiler_params=pltpu.CompilerParams(
            dimension_semantics=("parallel", "parallel")),
        cost_estimate=pl.CostEstimate(
            flops=2 * Mp * K * N, transcendentals=0,
            bytes_accessed=4 * Mp * K + 2 * K * N + 4 * Mp * N),
    )(xp, w, b)
    return out[:M] if Mp != M else out


# ------------- fused encoder: conv-stem -> ReLU -> mean-pool -> linear -------------

def _encoder_kernel(col_ref, wc_ref, bc_ref, we_ref, be_ref, o_ref, acc_ref,
                    *, inv_spatial):
    s = pl.program_id(1)

    @pl.when(s == 0)
    def _():
        acc_ref[...] = jnp.zeros_like(acc_ref)

    x = col_ref[...].astype(MATMUL_DTYPE)                       # (ts, CKKp)
    f = jnp.dot(x, wc_ref[...], preferred_element_type=jnp.float32) + bc_ref[...]
    f = jnp.maximum(f, 0.0)                                     # ReLU
    # Spatial sum as a ones-vector matmul (MXU) instead of an XLU sublane reduce.
    ones = jnp.ones((1, f.shape[0]), jnp.float32)
    acc_ref[...] += jnp.dot(ones, f, preferred_element_type=jnp.float32)   # (1, C)

    @pl.when(s == pl.num_programs(1) - 1)
    def _():
        pooled = acc_ref[...] * inv_spatial                     # global average pool
        y = jnp.dot(pooled.astype(MATMUL_DTYPE), we_ref[...],
                    preferred_element_type=jnp.float32) + be_ref[...]
        o_ref[...] = y.astype(o_ref.dtype)


def pallas_encoder(col_bsc, w_conv, b_conv, w_enc, b_enc):
    """col_bsc: (B, S, CKKp) im2col patches -> (B, image_embedding_size)."""
    B, S, CKK = col_bsc.shape
    C = w_conv.shape[1]
    IE = w_enc.shape[1]
    ts = S
    for cand in (256, 128, 64, 32, 16, 8):
        if S % cand == 0:
            ts = cand
            break
    out = pl.pallas_call(
        functools.partial(_encoder_kernel, inv_spatial=1.0 / S),
        out_shape=jax.ShapeDtypeStruct((B, 1, IE), jnp.float32),
        grid=(B, S // ts),
        in_specs=[
            pl.BlockSpec((pl.Squeezed(), ts, CKK), lambda b, s: (b, s, 0)),
            pl.BlockSpec((CKK, C), lambda b, s: (0, 0)),
            pl.BlockSpec((1, C), lambda b, s: (0, 0)),
            pl.BlockSpec((C, IE), lambda b, s: (0, 0)),
            pl.BlockSpec((1, IE), lambda b, s: (0, 0)),
        ],
        out_specs=pl.BlockSpec((pl.Squeezed(), 1, IE), lambda b, s: (b, 0, 0)),
        scratch_shapes=[pltpu.VMEM((1, C), jnp.float32)],
        compiler_params=pltpu.CompilerParams(
            dimension_semantics=("parallel", "arbitrary")),   # batch parallel, spatial reduce
    )(col_bsc, w_conv, b_conv, w_enc, b_enc)
    return out.reshape(B, IE)


# ---------------- LSTM recurrence (input projection already hoisted) ----------------

def _lstm_kernel(*refs, hidden, chunk, has_y):
    if has_y:
        y_ref, wy_ref, gx_ref, whh_ref, h_out_ref, h_scr, c_scr = refs
    else:
        gx_ref, whh_ref, h_out_ref, h_scr, c_scr = refs
        y_ref = wy_ref = None

    H = hidden
    cidx = pl.program_id(0)

    @pl.when(cidx == 0)
    def _():
        h_scr[...] = jnp.zeros_like(h_scr)
        c_scr[...] = jnp.zeros_like(c_scr)

    whh = whh_ref[...]                                   # (H, 4H) bf16, VMEM resident
    if has_y:
        # Time-invariant image-embedding contribution, fused here (no extra kernel launch).
        gy = jnp.dot(y_ref[...].astype(MATMUL_DTYPE), wy_ref[...],
                     preferred_element_type=jnp.float32)          # (B, 4H)

    def step(t, carry):
        gates = gx_ref[t] + jnp.dot(h_scr[...].astype(MATMUL_DTYPE), whh,
                                    preferred_element_type=jnp.float32)
        if has_y:
            gates = gates + gy
        # PyTorch gate order: input, forget, cell(g), output.
        # TODO(synk): gate slices are 128-lane-aligned only when H % 32 == 0.
        i = jax.nn.sigmoid(gates[:, 0 * H:1 * H])
        f = jax.nn.sigmoid(gates[:, 1 * H:2 * H])
        g = jnp.tanh(gates[:, 2 * H:3 * H])
        o = jax.nn.sigmoid(gates[:, 3 * H:4 * H])
        c_new = f * c_scr[...] + i * g
        h_new = o * jnp.tanh(c_new)
        c_scr[...] = c_new
        h_scr[...] = h_new
        h_out_ref[t] = h_new
        return carry

    jax.lax.fori_loop(0, chunk, step, 0, unroll=(chunk <= 16))


def pallas_lstm_layer(gx_tbg, w_hh, y=None, w_y=None):
    """gx_tbg: (T, B, 4H) precomputed x@W_ih (+bias); w_hh: (H, 4H) bf16;
    y/(w_y): optional image embedding + its W_ih slab (layer 0 only).
    Zero initial state.  Returns hiddens (T, B, H) f32."""
    T1, B, G4 = gx_tbg.shape
    H = G4 // 4

    tc = T1 if T1 <= 32 else 16                    # time-chunk size (streams gx / h_out)
    Tp = _round_up(T1, tc)
    if Tp != T1:
        gx_tbg = jnp.pad(gx_tbg, ((0, Tp - T1), (0, 0), (0, 0)))

    has_y = y is not None
    in_specs = []
    args = []
    if has_y:
        IE = y.shape[1]
        in_specs += [pl.BlockSpec((B, IE), lambda c: (0, 0)),
                     pl.BlockSpec((IE, G4), lambda c: (0, 0))]
        args += [y, w_y]
    in_specs += [pl.BlockSpec((tc, B, G4), lambda c: (c, 0, 0)),
                 pl.BlockSpec((H, G4), lambda c: (0, 0))]
    args += [gx_tbg, w_hh]

    out = pl.pallas_call(
        functools.partial(_lstm_kernel, hidden=H, chunk=tc, has_y=has_y),
        out_shape=jax.ShapeDtypeStruct((Tp, B, H), jnp.float32),
        grid=(Tp // tc,),
        in_specs=in_specs,
        out_specs=pl.BlockSpec((tc, B, H), lambda c: (c, 0, 0)),
        scratch_shapes=[
            pltpu.VMEM((B, H), jnp.float32),   # h state (carried across chunks)
            pltpu.VMEM((B, H), jnp.float32),   # c state
        ],
        compiler_params=pltpu.CompilerParams(
            dimension_semantics=("arbitrary",)),
    )(*args)
    return out[:T1] if Tp != T1 else out


# ------------------------------ glue helpers --------------------------------

def im2col_bsc(x_nchw, kh, kw, stride, pad):
    B, C, H, W = x_nchw.shape
    xp = jnp.pad(x_nchw, ((0, 0), (0, 0), (pad, pad), (pad, pad)))
    OH = (H + 2 * pad - kh) // stride + 1
    OW = (W + 2 * pad - kw) // stride + 1
    cols = []
    for i in range(kh):
        for j in range(kw):
            patch = xp[:, :, i:i + stride * OH:stride, j:j + stride * OW:stride]
            cols.append(patch)                       # (B, C, OH, OW)
    col = jnp.stack(cols, axis=2)                    # (B, C, KH*KW, OH, OW)
    col = col.transpose(0, 3, 4, 1, 2).reshape(B, OH * OW, C * kh * kw)
    return col, OH, OW


def _uniform(key, shape, bound):
    return jax.random.uniform(key, shape, jnp.float32, -bound, bound)


# ------------------------------ model ---------------------------------------

class Architecture2Pallas:
    """JAX/Pallas port of Architecture2.forward(img, cap)."""

    STEM_CHANNELS = 64      # stand-in for ResNet50 feature width
    STEM_K = 3
    STEM_STRIDE = 2
    STEM_PAD = 1

    def __init__(self, hidden_size, image_embedding_size, embedding_size,
                 no_layers, vocab_size, applySoftmax=False, key=None):
        self.hidden_size = hidden_size
        self.image_embedding_size = image_embedding_size
        self.embedding_size = embedding_size
        self.no_layers = no_layers
        self.vocab_size = vocab_size
        self.applySoftmax = applySoftmax

        key = jax.random.PRNGKey(42) if key is None else key
        ks = list(jax.random.split(key, 8 + 4 * no_layers))
        nk = iter(ks).__next__

        C_in = 3
        fdim = self.STEM_CHANNELS
        ckk = C_in * self.STEM_K * self.STEM_K
        self.ckk = ckk
        self.ckkp = _round_up(ckk, 32)               # pad im2col K-dim (27 -> 32)

        # Encoder conv stem (replaces ResNet50 backbone) -- stored bf16, K rows padded.
        w_conv = _uniform(nk(), (ckk, fdim), (1.0 / ckk) ** 0.5)
        w_conv = jnp.pad(w_conv, ((0, self.ckkp - ckk), (0, 0)))
        self.w_conv = w_conv.astype(MATMUL_DTYPE)
        self.b_conv = _uniform(nk(), (fdim,), (1.0 / fdim) ** 0.5).reshape(1, fdim)
        # Encoder linear: features -> image_embedding_size
        self.w_enc = _uniform(nk(), (fdim, image_embedding_size),
                              (1.0 / fdim) ** 0.5).astype(MATMUL_DTYPE)
        self.b_enc = _uniform(nk(), (image_embedding_size,),
                              (1.0 / fdim) ** 0.5).reshape(1, image_embedding_size)
        # Decoder embedding table
        self.embed = jax.random.normal(nk(), (vocab_size, embedding_size),
                                       jnp.float32)
        # Decoder LSTM layers (PyTorch layout, stored transposed, bf16).
        self.lstm_params = []
        H = hidden_size
        IE = image_embedding_size
        for layer in range(no_layers):
            din = IE + embedding_size if layer == 0 else H
            bound = (1.0 / H) ** 0.5
            w_ih = _uniform(nk(), (din, 4 * H), bound)
            w_hh = _uniform(nk(), (H, 4 * H), bound)
            b_ih = _uniform(nk(), (4 * H,), bound)
            b_hh = _uniform(nk(), (4 * H,), bound)
            b = b_ih + b_hh
            if layer == 0:
                # Split W_ih: rows [:IE] hit the time-invariant image embedding
                # (fused into the recurrence kernel), rows [IE:] hit token embeddings.
                wy = w_ih[:IE, :].astype(MATMUL_DTYPE)
                wx = w_ih[IE:, :].astype(MATMUL_DTYPE)
            else:
                wy = None
                wx = w_ih.astype(MATMUL_DTYPE)
            self.lstm_params.append((wx, wy, w_hh.astype(MATMUL_DTYPE), b))
        # Decoder output projection, vocab padded to a lane-dense multiple of 128.
        Vp = _round_up(vocab_size, 128)
        self.vocab_padded = Vp
        bound = (1.0 / H) ** 0.5
        w_dec = _uniform(nk(), (H, vocab_size), bound)
        b_dec = _uniform(nk(), (vocab_size,), bound)
        if Vp != vocab_size:
            w_dec = jnp.pad(w_dec, ((0, 0), (0, Vp - vocab_size)))
            b_dec = jnp.pad(b_dec, (0, Vp - vocab_size))
        self.w_dec = w_dec.astype(MATMUL_DTYPE)
        self.b_dec = b_dec

    # ---- Encoder ----
    def encode(self, img_nchw):
        col, _, _ = im2col_bsc(img_nchw, self.STEM_K, self.STEM_K,
                               self.STEM_STRIDE, self.STEM_PAD)
        if self.ckkp != self.ckk:
            col = jnp.pad(col, ((0, 0), (0, 0), (0, self.ckkp - self.ckk)))
        # conv stem + ReLU + global mean pool + encoder linear: ONE fused kernel.
        return pallas_encoder(col, self.w_conv, self.b_conv,
                              self.w_enc, self.b_enc)             # (B, IE)

    # ---- Decoder ----
    def decode(self, y, cap):
        B, T = cap.shape
        T1 = T + 1
        H = self.hidden_size
        # prepend a <start>=0 token column, like torch.cat((zeros, cap), dim=1)
        cap = jnp.concatenate(
            [jnp.zeros((B, 1), dtype=cap.dtype), cap], axis=1)     # (B, T1)
        emb = jnp.take(self.embed, cap, axis=0)                    # (B, T1, E)
        emb_tm = jnp.transpose(emb, (1, 0, 2))                     # (T1, B, E)

        h = None
        for layer, (wx, wy, whh, b) in enumerate(self.lstm_params):
            if layer == 0:
                # Token-embedding projection hoisted over all timesteps; the
                # image-embedding contribution (y @ wy) is fused inside the kernel.
                gx = pallas_linear(emb_tm.reshape(T1 * B, -1), wx, b)    # (T1*B, 4H)
                gx = gx.reshape(T1, B, 4 * H)
                h = pallas_lstm_layer(gx, whh, y=y, w_y=wy)              # (T1, B, H)
            else:
                gx = pallas_linear(h.reshape(T1 * B, H), wx, b)
                gx = gx.reshape(T1, B, 4 * H)
                h = pallas_lstm_layer(gx, whh)

        h_bt = jnp.transpose(h, (1, 0, 2)).reshape(B * T1, H)       # (B*T1, H)
        out = pallas_linear(h_bt, self.w_dec, self.b_dec)           # lane-dense (.., Vp)
        out = out.reshape(B, T1, self.vocab_padded)
        if self.vocab_padded != self.vocab_size:
            out = out[..., :self.vocab_size]
        return out

    def __call__(self, img, cap):
        y = self.encode(img)
        outputs = self.decode(y, cap)
        if self.applySoftmax:
            # nn.Softmax(dim=1) -> softmax over the *time* axis of (B, T+1, V)
            # (faithful to the PyTorch reference, even though it looks like a bug).
            outputs = jax.nn.softmax(outputs, axis=1)
        return outputs


# --------------------------------- main --------------------------------------

if __name__ == "__main__":
    B, Cin, Himg, Wimg = 2, 3, 32, 32
    hidden_size = 32
    image_embedding_size = 16
    embedding_size = 16
    no_layers = 2
    vocab_size = 32
    T = 7

    key = jax.random.PRNGKey(0)
    k_img, k_cap, k_params = jax.random.split(key, 3)
    img = jax.random.normal(k_img, (B, Cin, Himg, Wimg), dtype=jnp.float32)
    cap = jax.random.randint(k_cap, (B, T), 0, vocab_size, dtype=jnp.int32)

    model = Architecture2Pallas(hidden_size, image_embedding_size,
                                embedding_size, no_layers, vocab_size,
                                applySoftmax=False, key=k_params)

    fwd = jax.jit(lambda i, c: model(i, c))
    out = fwd(img, cap)
    out = jax.block_until_ready(out)
    assert out.shape == (B, T + 1, vocab_size), out.shape
    assert jnp.all(jnp.isfinite(out))
    print("KERNEL_OK")
</pallas_src>

<mosaic_0001>
module attributes {stable_mosaic.version = 11 : i64} {
  func.func @_encoder_kernel(%arg0: i32, %arg1: i32, %arg2: memref<1x256x32xf32, #tpu.memory_space<vmem>>, %arg3: memref<32x64xbf16, #tpu.memory_space<vmem>>, %arg4: memref<1x64xf32, #tpu.memory_space<vmem>>, %arg5: memref<64x16xbf16, #tpu.memory_space<vmem>>, %arg6: memref<1x16xf32, #tpu.memory_space<vmem>>, %arg7: memref<1x1x16xf32, #tpu.memory_space<vmem>>, %arg8: memref<1x64xf32, #tpu.memory_space<vmem>>) attributes {dimension_semantics = [#tpu.dimension_semantics<parallel>, #tpu.dimension_semantics<arbitrary>], iteration_bounds = array<i64: 2, 1>, scalar_prefetch = 0 : i64, scratch_operands = 1 : i64, tpu.core_type = #tpu.core_type<tc>, window_params = [{transform_indices = @transform_0, window_bounds = array<i64: 1, 256, 32>}, {pipeline_mode = #tpu.pipeline_mode<synchronous>, transform_indices = @transform_1, window_bounds = array<i64: 32, 64>}, {pipeline_mode = #tpu.pipeline_mode<synchronous>, transform_indices = @transform_2, window_bounds = array<i64: 1, 64>}, {pipeline_mode = #tpu.pipeline_mode<synchronous>, transform_indices = @transform_3, window_bounds = array<i64: 64, 16>}, {pipeline_mode = #tpu.pipeline_mode<synchronous>, transform_indices = @transform_4, window_bounds = array<i64: 1, 16>}, {transform_indices = @transform_5, window_bounds = array<i64: 1, 1, 16>}]} {
    %c0_i32 = arith.constant 0 : i32
    %0 = arith.cmpi eq, %arg1, %c0_i32 : i32
    %1 = arith.extui %0 : i1 to i32
    %c0_i32_0 = arith.constant 0 : i32
    %2 = arith.cmpi ne, %1, %c0_i32_0 : i32
    scf.if %2 {
      %cst_16 = arith.constant 0.000000e+00 : f32
      %21 = vector.broadcast %cst_16 : f32 to vector<1x64xf32>
      %c0_17 = arith.constant 0 : index
      %c0_18 = arith.constant 0 : index
      %22 = vector.load %arg8[%c0_17, %c0_18] : memref<1x64xf32, #tpu.memory_space<vmem>>, vector<1x64xf32>
      tpu.vector_store %arg8[%c0_17, %c0_18], %21 {strides = array<i32>} : memref<1x64xf32, #tpu.memory_space<vmem>>, vector<1x64xf32>,
    } else {
    }
    %c0 = arith.constant 0 : index
    %c0_1 = arith.constant 0 : index
    %c0_2 = arith.constant 0 : index
    %3 = vector.load %arg2[%c0, %c0_1, %c0_2] : memref<1x256x32xf32, #tpu.memory_space<vmem>>, vector<1x256x32xf32>
    %4 = vector.shape_cast %3 : vector<1x256x32xf32> to vector<256x32xf32>
    %5 = arith.truncf %4 : vector<256x32xf32> to vector<256x32xbf16>
    %c0_3 = arith.constant 0 : index
    %c0_4 = arith.constant 0 : index
    %6 = vector.load %arg3[%c0_3, %c0_4] : memref<32x64xbf16, #tpu.memory_space<vmem>>, vector<32x64xbf16>
    %cst = arith.constant dense<0.000000e+00> : vector<256x64xf32>
    %7 = tpu.matmul %5, %6, %cst {dimension_numbers = #tpu.dot_dimension_numbers<[1], [0], [0], [1], [0, 0, 1, 1], [], []>} : vector<256x32xbf16>, vector<32x64xbf16>, vector<256x64xf32> -> vector<256x64xf32>
    %c0_5 = arith.constant 0 : index
    %c0_6 = arith.constant 0 : index
    %8 = vector.load %arg4[%c0_5, %c0_6] : memref<1x64xf32, #tpu.memory_space<vmem>>, vector<1x64xf32>
    %9 = vector.broadcast %8 : vector<1x64xf32> to vector<256x64xf32>
    %10 = arith.addf %7, %9 : vector<256x64xf32>
    %cst_7 = arith.constant 0.000000e+00 : f32
    %11 = vector.broadcast %cst_7 : f32 to vector<256x64xf32>
    %12 = arith.maximumf %10, %11 : vector<256x64xf32>
    %cst_8 = arith.constant 1.000000e+00 : f32
    %13 = vector.broadcast %cst_8 : f32 to vector<1x256xf32>
    %c0_9 = arith.constant 0 : index
    %c0_10 = arith.constant 0 : index
    %14 = vector.load %arg8[%c0_9, %c0_10] : memref<1x64xf32, #tpu.memory_space<vmem>>, vector<1x64xf32>
    %cst_11 = arith.constant dense<0.000000e+00> : vector<1x64xf32>
    %15 = tpu.matmul %13, %12, %cst_11 {dimension_numbers = #tpu.dot_dimension_numbers<[1], [0], [0], [1], [0, 0, 1, 1], [], []>} : vector<1x256xf32>, vector<256x64xf32>, vector<1x64xf32> -> vector<1x64xf32>
    %16 = arith.addf %14, %15 : vector<1x64xf32>
    %c0_12 = arith.constant 0 : index
    %c0_13 = arith.constant 0 : index
    %17 = vector.load %arg8[%c0_12, %c0_13] : memref<1x64xf32, #tpu.memory_space<vmem>>, vector<1x64xf32>
    tpu.vector_store %arg8[%c0_12, %c0_13], %16 {strides = array<i32>} : memref<1x64xf32, #tpu.memory_space<vmem>>, vector<1x64xf32>,
    %c0_i32_14 = arith.constant 0 : i32
    %18 = arith.cmpi eq, %arg1, %c0_i32_14 : i32
    %19 = arith.extui %18 : i1 to i32
    %c0_i32_15 = arith.constant 0 : i32
    %20 = arith.cmpi ne, %19, %c0_i32_15 : i32
    scf.if %20 {
      %c0_16 = arith.constant 0 : index
      %c0_17 = arith.constant 0 : index
      %21 = vector.load %arg8[%c0_16, %c0_17] : memref<1x64xf32, #tpu.memory_space<vmem>>, vector<1x64xf32>
      %cst_18 = arith.constant 3.906250e-03 : f32
      %22 = vector.broadcast %cst_18 : f32 to vector<1x64xf32>
      %23 = arith.mulf %21, %22 : vector<1x64xf32>
      %24 = arith.truncf %23 : vector<1x64xf32> to vector<1x64xbf16>
      %c0_19 = arith.constant 0 : index
      %c0_20 = arith.constant 0 : index
      %25 = vector.load %arg5[%c0_19, %c0_20] : memref<64x16xbf16, #tpu.memory_space<vmem>>, vector<64x16xbf16>
      %cst_21 = arith.constant dense<0.000000e+00> : vector<1x16xf32>
      %26 = tpu.matmul %24, %25, %cst_21 {dimension_numbers = #tpu.dot_dimension_numbers<[1], [0], [0], [1], [0, 0, 1, 1], [], []>} : vector<1x64xbf16>, vector<64x16xbf16>, vector<1x16xf32> -> vector<1x16xf32>
      %c0_22 = arith.constant 0 : index
      %c0_23 = arith.constant 0 : index
      %27 = vector.load %arg6[%c0_22, %c0_23] : memref<1x16xf32, #tpu.memory_space<vmem>>, vector<1x16xf32>
      %28 = arith.addf %26, %27 : vector<1x16xf32>
      %c0_24 = arith.constant 0 : index
      %c0_25 = arith.constant 0 : index
      %c0_26 = arith.constant 0 : index
      %29 = vector.load %arg7[%c0_24, %c0_25, %c0_26] : memref<1x1x16xf32, #tpu.memory_space<vmem>>, vector<1x1x16xf32>
      %30 = vector.shape_cast %29 : vector<1x1x16xf32> to vector<1x16xf32>
      %31 = vector.shape_cast %28 : vector<1x16xf32> to vector<1x1x16xf32>
      tpu.vector_store %arg7[%c0_24, %c0_25, %c0_26], %31 {strides = array<i32>} : memref<1x1x16xf32, #tpu.memory_space<vmem>>, vector<1x1x16xf32>,
    } else {
    }
    return
  }
  func.func @transform_0(%arg0: i32, %arg1: i32) -> (i32, i32, i32) {
    %c0_i32 = arith.constant 0 : i32
    %c0_i32_0 = arith.constant 0 : i32
    return %arg0, %arg1, %c0_i32 : i32, i32, i32
  }
  func.func @transform_1(%arg0: i32, %arg1: i32) -> (i32, i32) {
    %c0_i32 = arith.constant 0 : i32
    %c0_i32_0 = arith.constant 0 : i32
    %c0_i32_1 = arith.constant 0 : i32
    return %c0_i32, %c0_i32_0 : i32, i32
  }
  func.func @transform_2(%arg0: i32, %arg1: i32) -> (i32, i32) {
    %c0_i32 = arith.constant 0 : i32
    %c0_i32_0 = arith.constant 0 : i32
    %c0_i32_1 = arith.constant 0 : i32
    return %c0_i32, %c0_i32_0 : i32, i32
  }
  func.func @transform_3(%arg0: i32, %arg1: i32) -> (i32, i32) {
    %c0_i32 = arith.constant 0 : i32
    %c0_i32_0 = arith.constant 0 : i32
    %c0_i32_1 = arith.constant 0 : i32
    return %c0_i32, %c0_i32_0 : i32, i32
  }
  func.func @transform_4(%arg0: i32, %arg1: i32) -> (i32, i32) {
    %c0_i32 = arith.constant 0 : i32
    %c0_i32_0 = arith.constant 0 : i32
    %c0_i32_1 = arith.constant 0 : i32
    return %c0_i32, %c0_i32_0 : i32, i32
  }
  func.func @transform_5(%arg0: i32, %arg1: i32) -> (i32, i32, i32) {
    %c0_i32 = arith.constant 0 : i32
    %c0_i32_0 = arith.constant 0 : i32
    %c0_i32_1 = arith.constant 0 : i32
    return %arg0, %c0_i32, %c0_i32_0 : i32, i32, i32
  }
}

module attributes {stable_mosaic.version = 11 : i64} {
  func.func @_linear_kernel(%arg0: i32, %arg1: i32, %arg2: memref<16x16xf32, #tpu.memory_space<vmem>>, %arg3: memref<16x128xbf16, #tpu.memory_space<vmem>>, %arg4: memref<1x128xf32, #tpu.memory_space<vmem>>, %arg5: memref<16x128xf32, #tpu.memory_space<vmem>>) attributes {dimension_semantics = [#tpu.dimension_semantics<parallel>, #tpu.dimension_semantics<parallel>], iteration_bounds = array<i64: 1, 1>, scalar_prefetch = 0 : i64, scratch_operands = 0 : i64, tpu.core_type = #tpu.core_type<tc>, window_params = [{transform_indices = @transform_0, window_bounds = array<i64: 16, 16>}, {transform_indices = @transform_1, window_bounds = array<i64: 16, 128>}, {transform_indices = @transform_2, window_bounds = array<i64: 1, 128>}, {transform_indices = @transform_3, window_bounds = array<i64: 16, 128>}]} {
    %c0 = arith.constant 0 : index
    %c0_0 = arith.constant 0 : index
    %0 = vector.load %arg2[%c0, %c0_0] : memref<16x16xf32, #tpu.memory_space<vmem>>, vector<16x16xf32>
    %1 = arith.truncf %0 : vector<16x16xf32> to vector<16x16xbf16>
    %c0_1 = arith.constant 0 : index
    %c0_2 = arith.constant 0 : index
    %2 = vector.load %arg3[%c0_1, %c0_2] : memref<16x128xbf16, #tpu.memory_space<vmem>>, vector<16x128xbf16>
    %cst = arith.constant dense<0.000000e+00> : vector<16x128xf32>
    %3 = tpu.matmul %1, %2, %cst {dimension_numbers = #tpu.dot_dimension_numbers<[1], [0], [0], [1], [0, 0, 1, 1], [], []>} : vector<16x16xbf16>, vector<16x128xbf16>, vector<16x128xf32> -> vector<16x128xf32>
    %c0_3 = arith.constant 0 : index
    %c0_4 = arith.constant 0 : index
    %4 = vector.load %arg4[%c0_3, %c0_4] : memref<1x128xf32, #tpu.memory_space<vmem>>, vector<1x128xf32>
    %5 = vector.broadcast %4 : vector<1x128xf32> to vector<16x128xf32>
    %6 = arith.addf %3, %5 : vector<16x128xf32>
    %c0_5 = arith.constant 0 : index
    %c0_6 = arith.constant 0 : index
    %7 = vector.load %arg5[%c0_5, %c0_6] : memref<16x128xf32, #tpu.memory_space<vmem>>, vector<16x128xf32>
    tpu.vector_store %arg5[%c0_5, %c0_6], %6 {strides = array<i32>} : memref<16x128xf32, #tpu.memory_space<vmem>>, vector<16x128xf32>,
    return
  }
  func.func @transform_0(%arg0: i32, %arg1: i32) -> (i32, i32) {
    %c0_i32 = arith.constant 0 : i32
    %c0_i32_0 = arith.constant 0 : i32
    return %arg0, %c0_i32 : i32, i32
  }
  func.func @transform_1(%arg0: i32, %arg1: i32) -> (i32, i32) {
    %c0_i32 = arith.constant 0 : i32
    %c0_i32_0 = arith.constant 0 : i32
    return %c0_i32, %arg1 : i32, i32
  }
  func.func @transform_2(%arg0: i32, %arg1: i32) -> (i32, i32) {
    %c0_i32 = arith.constant 0 : i32
    %c0_i32_0 = arith.constant 0 : i32
    return %c0_i32, %arg1 : i32, i32
  }
  func.func @transform_3(%arg0: i32, %arg1: i32) -> (i32, i32) {
    %c0_i32 = arith.constant 0 : i32
    return %arg0, %arg1 : i32, i32
  }
}

module attributes {stable_mosaic.version = 11 : i64} {
  func.func @_lstm_kernel(%arg0: i32, %arg1: memref<2x16xf32, #tpu.memory_space<vmem>>, %arg2: memref<16x128xbf16, #tpu.memory_space<vmem>>, %arg3: memref<8x2x128xf32, #tpu.memory_space<vmem>>, %arg4: memref<32x128xbf16, #tpu.memory_space<vmem>>, %arg5: memref<8x2x32xf32, #tpu.memory_space<vmem>>, %arg6: memref<2x32xf32, #tpu.memory_space<vmem>>, %arg7: memref<2x32xf32, #tpu.memory_space<vmem>>) attributes {dimension_semantics = [#tpu.dimension_semantics<arbitrary>], iteration_bounds = array<i64: 1>, scalar_prefetch = 0 : i64, scratch_operands = 2 : i64, tpu.core_type = #tpu.core_type<tc>, window_params = [{pipeline_mode = #tpu.pipeline_mode<synchronous>, transform_indices = @transform_0, window_bounds = array<i64: 2, 16>}, {pipeline_mode = #tpu.pipeline_mode<synchronous>, transform_indices = @transform_1, window_bounds = array<i64: 16, 128>}, {transform_indices = @transform_2, window_bounds = array<i64: 8, 2, 128>}, {pipeline_mode = #tpu.pipeline_mode<synchronous>, transform_indices = @transform_3, window_bounds = array<i64: 32, 128>}, {transform_indices = @transform_4, window_bounds = array<i64: 8, 2, 32>}]} {
    %c0_i32 = arith.constant 0 : i32
    %0 = arith.cmpi eq, %arg0, %c0_i32 : i32
    %1 = arith.extui %0 : i1 to i32
    %c0_i32_0 = arith.constant 0 : i32
    %2 = arith.cmpi ne, %1, %c0_i32_0 : i32
    scf.if %2 {
      %cst_135 = arith.constant 0.000000e+00 : f32
      %328 = vector.broadcast %cst_135 : f32 to vector<2x32xf32>
      %c0_136 = arith.constant 0 : index
      %c0_137 = arith.constant 0 : index
      %329 = vector.load %arg6[%c0_136, %c0_137] : memref<2x32xf32, #tpu.memory_space<vmem>>, vector<2x32xf32>
      tpu.vector_store %arg6[%c0_136, %c0_137], %328 {strides = array<i32>} : memref<2x32xf32, #tpu.memory_space<vmem>>, vector<2x32xf32>,
      %cst_138 = arith.constant 0.000000e+00 : f32
      %330 = vector.broadcast %cst_138 : f32 to vector<2x32xf32>
      %c0_139 = arith.constant 0 : index
      %c0_140 = arith.constant 0 : index
      %331 = vector.load %arg7[%c0_139, %c0_140] : memref<2x32xf32, #tpu.memory_space<vmem>>, vector<2x32xf32>
      tpu.vector_store %arg7[%c0_139, %c0_140], %330 {strides = array<i32>} : memref<2x32xf32, #tpu.memory_space<vmem>>, vector<2x32xf32>,
    } else {
    }
    %c0 = arith.constant 0 : index
    %c0_1 = arith.constant 0 : index
    %3 = vector.load %arg4[%c0, %c0_1] : memref<32x128xbf16, #tpu.memory_space<vmem>>, vector<32x128xbf16>
    %c0_2 = arith.constant 0 : index
    %c0_3 = arith.constant 0 : index
    %4 = vector.load %arg1[%c0_2, %c0_3] : memref<2x16xf32, #tpu.memory_space<vmem>>, vector<2x16xf32>
    %5 = arith.truncf %4 : vector<2x16xf32> to vector<2x16xbf16>
    %c0_4 = arith.constant 0 : index
    %c0_5 = arith.constant 0 : index
    %6 = vector.load %arg2[%c0_4, %c0_5] : memref<16x128xbf16, #tpu.memory_space<vmem>>, vector<16x128xbf16>
    %cst = arith.constant dense<0.000000e+00> : vector<2x128xf32>
    %7 = tpu.matmul %5, %6, %cst {dimension_numbers = #tpu.dot_dimension_numbers<[1], [0], [0], [1], [0, 0, 1, 1], [], []>} : vector<2x16xbf16>, vector<16x128xbf16>, vector<2x128xf32> -> vector<2x128xf32>
    %c0_i32_6 = arith.constant 0 : i32
    %8 = arith.index_cast %c0_i32_6 : i32 to index
    %c0_7 = arith.constant 0 : index
    %c0_8 = arith.constant 0 : index
    %9 = vector.load %arg3[%8, %c0_7, %c0_8] : memref<8x2x128xf32, #tpu.memory_space<vmem>>, vector<1x2x128xf32>
    %10 = vector.shape_cast %9 : vector<1x2x128xf32> to vector<2x128xf32>
    %c0_9 = arith.constant 0 : index
    %c0_10 = arith.constant 0 : index
    %11 = vector.load %arg6[%c0_9, %c0_10] : memref<2x32xf32, #tpu.memory_space<vmem>>, vector<2x32xf32>
    %12 = arith.truncf %11 : vector<2x32xf32> to vector<2x32xbf16>
    %cst_11 = arith.constant dense<0.000000e+00> : vector<2x128xf32>
    %13 = tpu.matmul %12, %3, %cst_11 {dimension_numbers = #tpu.dot_dimension_numbers<[1], [0], [0], [1], [0, 0, 1, 1], [], []>} : vector<2x32xbf16>, vector<32x128xbf16>, vector<2x128xf32> -> vector<2x128xf32>
    %14 = arith.addf %10, %13 : vector<2x128xf32>
    %15 = arith.addf %14, %7 : vector<2x128xf32>
    %16 = vector.extract_strided_slice %15 {offsets = [0, 0], sizes = [2, 32], strides = [1, 1]} : vector<2x128xf32> to vector<2x32xf32>
    %17 = arith.negf %16 : vector<2x32xf32>
    %18 = math.exp %17 : vector<2x32xf32>
    %cst_12 = arith.constant 1.000000e+00 : f32
    %19 = vector.broadcast %cst_12 : f32 to vector<2x32xf32>
    %20 = arith.addf %19, %18 : vector<2x32xf32>
    %21 = arith.divf %19, %20 : vector<2x32xf32>
    %22 = vector.extract_strided_slice %15 {offsets = [0, 32], sizes = [2, 32], strides = [1, 1]} : vector<2x128xf32> to vector<2x32xf32>
    %23 = arith.negf %22 : vector<2x32xf32>
    %24 = math.exp %23 : vector<2x32xf32>
    %cst_13 = arith.constant 1.000000e+00 : f32
    %25 = vector.broadcast %cst_13 : f32 to vector<2x32xf32>
    %26 = arith.addf %25, %24 : vector<2x32xf32>
    %27 = arith.divf %25, %26 : vector<2x32xf32>
    %28 = vector.extract_strided_slice %15 {offsets = [0, 64], sizes = [2, 32], strides = [1, 1]} : vector<2x128xf32> to vector<2x32xf32>
    %29 = math.tanh %28 : vector<2x32xf32>
    %30 = vector.extract_strided_slice %15 {offsets = [0, 96], sizes = [2, 32], strides = [1, 1]} : vector<2x128xf32> to vector<2x32xf32>
    %31 = arith.negf %30 : vector<2x32xf32>
    %32 = math.exp %31 : vector<2x32xf32>
    %cst_14 = arith.constant 1.000000e+00 : f32
    %33 = vector.broadcast %cst_14 : f32 to vector<2x32xf32>
    %34 = arith.addf %33, %32 : vector<2x32xf32>
    %35 = arith.divf %33, %34 : vector<2x32xf32>
    %c0_15 = arith.constant 0 : index
    %c0_16 = arith.constant 0 : index
    %36 = vector.load %arg7[%c0_15, %c0_16] : memref<2x32xf32, #tpu.memory_space<vmem>>, vector<2x32xf32>
    %37 = arith.mulf %27, %36 : vector<2x32xf32>
    %38 = arith.mulf %21, %29 : vector<2x32xf32>
    %39 = arith.addf %37, %38 : vector<2x32xf32>
    %40 = math.tanh %39 : vector<2x32xf32>
    %41 = arith.mulf %35, %40 : vector<2x32xf32>
    %c0_17 = arith.constant 0 : index
    %c0_18 = arith.constant 0 : index
    %42 = vector.load %arg7[%c0_17, %c0_18] : memref<2x32xf32, #tpu.memory_space<vmem>>, vector<2x32xf32>
    tpu.vector_store %arg7[%c0_17, %c0_18], %39 {strides = array<i32>} : memref<2x32xf32, #tpu.memory_space<vmem>>, vector<2x32xf32>,
    %c0_19 = arith.constant 0 : index
    %c0_20 = arith.constant 0 : index
    %43 = vector.load %arg6[%c0_19, %c0_20] : memref<2x32xf32, #tpu.memory_space<vmem>>, vector<2x32xf32>
    tpu.vector_store %arg6[%c0_19, %c0_20], %41 {strides = array<i32>} : memref<2x32xf32, #tpu.memory_space<vmem>>, vector<2x32xf32>,
    %44 = arith.index_cast %c0_i32_6 : i32 to index
    %c0_21 = arith.constant 0 : index
    %c0_22 = arith.constant 0 : index
    %45 = vector.load %arg5[%44, %c0_21, %c0_22] : memref<8x2x32xf32, #tpu.memory_space<vmem>>, vector<1x2x32xf32>
    %46 = vector.shape_cast %45 : vector<1x2x32xf32> to vector<2x32xf32>
    %47 = vector.shape_cast %41 : vector<2x32xf32> to vector<1x2x32xf32>
    tpu.vector_store %arg5[%44, %c0_21, %c0_22], %47 {strides = array<i32>} : memref<8x2x32xf32, #tpu.memory_space<vmem>>, vector<1x2x32xf32>,
    %c1_i32 = arith.constant 1 : i32
    %48 = arith.index_cast %c1_i32 : i32 to index
    %c0_23 = arith.constant 0 : index
    %c0_24 = arith.constant 0 : index
    %49 = vector.load %arg3[%48, %c0_23, %c0_24] : memref<8x2x128xf32, #tpu.memory_space<vmem>>, vector<1x2x128xf32>
    %50 = vector.shape_cast %49 : vector<1x2x128xf32> to vector<2x128xf32>
    %c0_25 = arith.constant 0 : index
    %c0_26 = arith.constant 0 : index
    %51 = vector.load %arg6[%c0_25, %c0_26] : memref<2x32xf32, #tpu.memory_space<vmem>>, vector<2x32xf32>
    %52 = arith.truncf %51 : vector<2x32xf32> to vector<2x32xbf16>
    %cst_27 = arith.constant dense<0.000000e+00> : vector<2x128xf32>
    %53 = tpu.matmul %52, %3, %cst_27 {dimension_numbers = #tpu.dot_dimension_numbers<[1], [0], [0], [1], [0, 0, 1, 1], [], []>} : vector<2x32xbf16>, vector<32x128xbf16>, vector<2x128xf32> -> vector<2x128xf32>
    %54 = arith.addf %50, %53 : vector<2x128xf32>
    %55 = arith.addf %54, %7 : vector<2x128xf32>
    %56 = vector.extract_strided_slice %55 {offsets = [0, 0], sizes = [2, 32], strides = [1, 1]} : vector<2x128xf32> to vector<2x32xf32>
    %57 = arith.negf %56 : vector<2x32xf32>
    %58 = math.exp %57 : vector<2x32xf32>
    %cst_28 = arith.constant 1.000000e+00 : f32
    %59 = vector.broadcast %cst_28 : f32 to vector<2x32xf32>
    %60 = arith.addf %59, %58 : vector<2x32xf32>
    %61 = arith.divf %59, %60 : vector<2x32xf32>
    %62 = vector.extract_strided_slice %55 {offsets = [0, 32], sizes = [2, 32], strides = [1, 1]} : vector<2x128xf32> to vector<2x32xf32>
    %63 = arith.negf %62 : vector<2x32xf32>
    %64 = math.exp %63 : vector<2x32xf32>
    %cst_29 = arith.constant 1.000000e+00 : f32
    %65 = vector.broadcast %cst_29 : f32 to vector<2x32xf32>
    %66 = arith.addf %65, %64 : vector<2x32xf32>
    %67 = arith.divf %65, %66 : vector<2x32xf32>
    %68 = vector.extract_strided_slice %55 {offsets = [0, 64], sizes = [2, 32], strides = [1, 1]} : vector<2x128xf32> to vector<2x32xf32>
    %69 = math.tanh %68 : vector<2x32xf32>
    %70 = vector.extract_strided_slice %55 {offsets = [0, 96], sizes = [2, 32], strides = [1, 1]} : vector<2x128xf32> to vector<2x32xf32>
    %71 = arith.negf %70 : vector<2x32xf32>
    %72 = math.exp %71 : vector<2x32xf32>
    %cst_30 = arith.constant 1.000000e+00 : f32
    %73 = vector.broadcast %cst_30 : f32 to vector<2x32xf32>
    %74 = arith.addf %73, %72 : vector<2x32xf32>
    %75 = arith.divf %73, %74 : vector<2x32xf32>
    %c0_31 = arith.constant 0 : index
    %c0_32 = arith.constant 0 : index
    %76 = vector.load %arg7[%c0_31, %c0_32] : memref<2x32xf32, #tpu.memory_space<vmem>>, vector<2x32xf32>
    %77 = arith.mulf %67, %76 : vector<2x32xf32>
    %78 = arith.mulf %61, %69 : vector<2x32xf32>
    %79 = arith.addf %77, %78 : vector<2x32xf32>
    %80 = math.tanh %79 : vector<2x32xf32>
    %81 = arith.mulf %75, %80 : vector<2x32xf32>
    %c0_33 = arith.constant 0 : index
    %c0_34 = arith.constant 0 : index
    %82 = vector.load %arg7[%c0_33, %c0_34] : memref<2x32xf32, #tpu.memory_space<vmem>>, vector<2x32xf32>
    tpu.vector_store %arg7[%c0_33, %c0_34], %79 {strides = array<i32>} : memref<2x32xf32, #tpu.memory_space<vmem>>, vector<2x32xf32>,
    %c0_35 = arith.constant 0 : index
    %c0_36 = arith.constant 0 : index
    %83 = vector.load %arg6[%c0_35, %c0_36] : memref<2x32xf32, #tpu.memory_space<vmem>>, vector<2x32xf32>
    tpu.vector_store %arg6[%c0_35, %c0_36], %81 {strides = array<i32>} : memref<2x32xf32, #tpu.memory_space<vmem>>, vector<2x32xf32>,
    %84 = arith.index_cast %c1_i32 : i32 to index
    %c0_37 = arith.constant 0 : index
    %c0_38 = arith.constant 0 : index
    %85 = vector.load %arg5[%84, %c0_37, %c0_38] : memref<8x2x32xf32, #tpu.memory_space<vmem>>, vector<1x2x32xf32>
    %86 = vector.shape_cast %85 : vector<1x2x32xf32> to vector<2x32xf32>
    %87 = vector.shape_cast %81 : vector<2x32xf32> to vector<1x2x32xf32>
    tpu.vector_store %arg5[%84, %c0_37, %c0_38], %87 {strides = array<i32>} : memref<8x2x32xf32, #tpu.memory_space<vmem>>, vector<1x2x32xf32>,
    %c2_i32 = arith.constant 2 : i32
    %88 = arith.index_cast %c2_i32 : i32 to index
    %c0_39 = arith.constant 0 : index
    %c0_40 = arith.constant 0 : index
    %89 = vector.load %arg3[%88, %c0_39, %c0_40] : memref<8x2x128xf32, #tpu.memory_space<vmem>>, vector<1x2x128xf32>
    %90 = vector.shape_cast %89 : vector<1x2x128xf32> to vector<2x128xf32>
    %c0_41 = arith.constant 0 : index
    %c0_42 = arith.constant 0 : index
    %91 = vector.load %arg6[%c0_41, %c0_42] : memref<2x32xf32, #tpu.memory_space<vmem>>, vector<2x32xf32>
    %92 = arith.truncf %91 : vector<2x32xf32> to vector<2x32xbf16>
    %cst_43 = arith.constant dense<0.000000e+00> : vector<2x128xf32>
    %93 = tpu.matmul %92, %3, %cst_43 {dimension_numbers = #tpu.dot_dimension_numbers<[1], [0], [0], [1], [0, 0, 1, 1], [], []>} : vector<2x32xbf16>, vector<32x128xbf16>, vector<2x128xf32> -> vector<2x128xf32>
    %94 = arith.addf %90, %93 : vector<2x128xf32>
    %95 = arith.addf %94, %7 : vector<2x128xf32>
    %96 = vector.extract_strided_slice %95 {offsets = [0, 0], sizes = [2, 32], strides = [1, 1]} : vector<2x128xf32> to vector<2x32xf32>
    %97 = arith.negf %96 : vector<2x32xf32>
    %98 = math.exp %97 : vector<2x32xf32>
    %cst_44 = arith.constant 1.000000e+00 : f32
    %99 = vector.broadcast %cst_44 : f32 to vector<2x32xf32>
    %100 = arith.addf %99, %98 : vector<2x32xf32>
    %101 = arith.divf %99, %100 : vector<2x32xf32>
    %102 = vector.extract_strided_slice %95 {offsets = [0, 32], sizes = [2, 32], strides = [1, 1]} : vector<2x128xf32> to vector<2x32xf32>
    %103 = arith.negf %102 : vector<2x32xf32>
    %104 = math.exp %103 : vector<2x32xf32>
    %cst_45 = arith.constant 1.000000e+00 : f32
    %105 = vector.broadcast %cst_45 : f32 to vector<2x32xf32>
    %106 = arith.addf %105, %104 : vector<2x32xf32>
    %107 = arith.divf %105, %106 : vector<2x32xf32>
    %108 = vector.extract_strided_slice %95 {offsets = [0, 64], sizes = [2, 32], strides = [1, 1]} : vector<2x128xf32> to vector<2x32xf32>
    %109 = math.tanh %108 : vector<2x32xf32>
    %110 = vector.extract_strided_slice %95 {offsets = [0, 96], sizes = [2, 32], strides = [1, 1]} : vector<2x128xf32> to vector<2x32xf32>
    %111 = arith.negf %110 : vector<2x32xf32>
    %112 = math.exp %111 : vector<2x32xf32>
    %cst_46 = arith.constant 1.000000e+00 : f32
    %113 = vector.broadcast %cst_46 : f32 to vector<2x32xf32>
    %114 = arith.addf %113, %112 : vector<2x32xf32>
    %115 = arith.divf %113, %114 : vector<2x32xf32>
    %c0_47 = arith.constant 0 : index
    %c0_48 = arith.constant 0 : index
    %116 = vector.load %arg7[%c0_47, %c0_48] : memref<2x32xf32, #tpu.memory_space<vmem>>, vector<2x32xf32>
    %117 = arith.mulf %107, %116 : vector<2x32xf32>
    %118 = arith.mulf %101, %109 : vector<2x32xf32>
    %119 = arith.addf %117, %118 : vector<2x32xf32>
    %120 = math.tanh %119 : vector<2x32xf32>
    %121 = arith.mulf %115, %120 : vector<2x32xf32>
    %c0_49 = arith.constant 0 : index
    %c0_50 = arith.constant 0 : index
    %122 = vector.load %arg7[%c0_49, %c0_50] : memref<2x32xf32, #tpu.memory_space<vmem>>, vector<2x32xf32>
    tpu.vector_store %arg7[%c0_49, %c0_50], %119 {strides = array<i32>} : memref<2x32xf32, #tpu.memory_space<vmem>>, vector<2x32xf32>,
    %c0_51 = arith.constant 0 : index
    %c0_52 = arith.constant 0 : index
    %123 = vector.load %arg6[%c0_51, %c0_52] : memref<2x32xf32, #tpu.memory_space<vmem>>, vector<2x32xf32>
    tpu.vector_store %arg6[%c0_51, %c0_52], %121 {strides = array<i32>} : memref<2x32xf32, #tpu.memory_space<vmem>>, vector<2x32xf32>,
    %124 = arith.index_cast %c2_i32 : i32 to index
    %c0_53 = arith.constant 0 : index
    %c0_54 = arith.constant 0 : index
    %125 = vector.load %arg5[%124, %c0_53, %c0_54] : memref<8x2x32xf32, #tpu.memory_space<vmem>>, vector<1x2x32xf32>
    %126 = vector.shape_cast %125 : vector<1x2x32xf32> to vector<2x32xf32>
    %127 = vector.shape_cast %121 : vector<2x32xf32> to vector<1x2x32xf32>
    tpu.vector_store %arg5[%124, %c0_53, %c0_54], %127 {strides = array<i32>} : memref<8x2x32xf32, #tpu.memory_space<vmem>>, vector<1x2x32xf32>,
    %c3_i32 = arith.constant 3 : i32
    %128 = arith.index_cast %c3_i32 : i32 to index
    %c0_55 = arith.constant 0 : index
    %c0_56 = arith.constant 0 : index
    %129 = vector.load %arg3[%128, %c0_55, %c0_56] : memref<8x2x128xf32, #tpu.memory_space<vmem>>, vector<1x2x128xf32>
    %130 = vector.shape_cast %129 : vector<1x2x128xf32> to vector<2x128xf32>
    %c0_57 = arith.constant 0 : index
    %c0_58 = arith.constant 0 : index
    %131 = vector.load %arg6[%c0_57, %c0_58] : memref<2x32xf32, #tpu.memory_space<vmem>>, vector<2x32xf32>
    %132 = arith.truncf %131 : vector<2x32xf32> to vector<2x32xbf16>
    %cst_59 = arith.constant dense<0.000000e+00> : vector<2x128xf32>
    %133 = tpu.matmul %132, %3, %cst_59 {dimension_numbers = #tpu.dot_dimension_numbers<[1], [0], [0], [1], [0, 0, 1, 1], [], []>} : vector<2x32xbf16>, vector<32x128xbf16>, vector<2x128xf32> -> vector<2x128xf32>
    %134 = arith.addf %130, %133 : vector<2x128xf32>
    %135 = arith.addf %134, %7 : vector<2x128xf32>
    %136 = vector.extract_strided_slice %135 {offsets = [0, 0], sizes = [2, 32], strides = [1, 1]} : vector<2x128xf32> to vector<2x32xf32>
    %137 = arith.negf %136 : vector<2x32xf32>
    %138 = math.exp %137 : vector<2x32xf32>
    %cst_60 = arith.constant 1.000000e+00 : f32
    %139 = vector.broadcast %cst_60 : f32 to vector<2x32xf32>
    %140 = arith.addf %139, %138 : vector<2x32xf32>
    %141 = arith.divf %139, %140 : vector<2x32xf32>
    %142 = vector.extract_strided_slice %135 {offsets = [0, 32], sizes = [2, 32], strides = [1, 1]} : vector<2x128xf32> to vector<2x32xf32>
    %143 = arith.negf %142 : vector<2x32xf32>
    %144 = math.exp %143 : vector<2x32xf32>
    %cst_61 = arith.constant 1.000000e+00 : f32
    %145 = vector.broadcast %cst_61 : f32 to vector<2x32xf32>
    %146 = arith.addf %145, %144 : vector<2x32xf32>
    %147 = arith.divf %145, %146 : vector<2x32xf32>
    %148 = vector.extract_strided_slice %135 {offsets = [0, 64], sizes = [2, 32], strides = [1, 1]} : vector<2x128xf32> to vector<2x32xf32>
    %149 = math.tanh %148 : vector<2x32xf32>
    %150 = vector.extract_strided_slice %135 {offsets = [0, 96], sizes = [2, 32], strides = [1, 1]} : vector<2x128xf32> to vector<2x32xf32>
    %151 = arith.negf %150 : vector<2x32xf32>
    %152 = math.exp %151 : vector<2x32xf32>
    %cst_62 = arith.constant 1.000000e+00 : f32
    %153 = vector.broadcast %cst_62 : f32 to vector<2x32xf32>
    %154 = arith.addf %153, %152 : vector<2x32xf32>
    %155 = arith.divf %153, %154 : vector<2x32xf32>
    %c0_63 = arith.constant 0 : index
    %c0_64 = arith.constant 0 : index
    %156 = vector.load %arg7[%c0_63, %c0_64] : memref<2x32xf32, #tpu.memory_space<vmem>>, vector<2x32xf32>
    %157 = arith.mulf %147, %156 : vector<2x32xf32>
    %158 = arith.mulf %141, %149 : vector<2x32xf32>
    %159 = arith.addf %157, %158 : vector<2x32xf32>
    %160 = math.tanh %159 : vector<2x32xf32>
    %161 = arith.mulf %155, %160 : vector<2x32xf32>
    %c0_65 = arith.constant 0 : index
    %c0_66 = arith.constant 0 : index
    %162 = vector.load %arg7[%c0_65, %c0_66] : memref<2x32xf32, #tpu.memory_space<vmem>>, vector<2x32xf32>
    tpu.vector_store %arg7[%c0_65, %c0_66], %159 {strides = array<i32>} : memref<2x32xf32, #tpu.memory_space<vmem>>, vector<2x32xf32>,
    %c0_67 = arith.constant 0 : index
    %c0_68 = arith.constant 0 : index
    %163 = vector.load %arg6[%c0_67, %c0_68] : memref<2x32xf32, #tpu.memory_space<vmem>>, vector<2x32xf32>
    tpu.vector_store %arg6[%c0_67, %c0_68], %161 {strides = array<i32>} : memref<2x32xf32, #tpu.memory_space<vmem>>, vector<2x32xf32>,
    %164 = arith.index_cast %c3_i32 : i32 to index
    %c0_69 = arith.constant 0 : index
    %c0_70 = arith.constant 0 : index
    %165 = vector.load %arg5[%164, %c0_69, %c0_70] : memref<8x2x32xf32, #tpu.memory_space<vmem>>, vector<1x2x32xf32>
    %166 = vector.shape_cast %165 : vector<1x2x32xf32> to vector<2x32xf32>
    %167 = vector.shape_cast %161 : vector<2x32xf32> to vector<1x2x32xf32>
    tpu.vector_store %arg5[%164, %c0_69, %c0_70], %167 {strides = array<i32>} : memref<8x2x32xf32, #tpu.memory_space<vmem>>, vector<1x2x32xf32>,
    %c4_i32 = arith.constant 4 : i32
    %168 = arith.index_cast %c4_i32 : i32 to index
    %c0_71 = arith.constant 0 : index
    %c0_72 = arith.constant 0 : index
    %169 = vector.load %arg3[%168, %c0_71, %c0_72] : memref<8x2x128xf32, #tpu.memory_space<vmem>>, vector<1x2x128xf32>
    %170 = vector.shape_cast %169 : vector<1x2x128xf32> to vector<2x128xf32>
    %c0_73 = arith.constant 0 : index
    %c0_74 = arith.constant 0 : index
    %171 = vector.load %arg6[%c0_73, %c0_74] : memref<2x32xf32, #tpu.memory_space<vmem>>, vector<2x32xf32>
    %172 = arith.truncf %171 : vector<2x32xf32> to vector<2x32xbf16>
    %cst_75 = arith.constant dense<0.000000e+00> : vector<2x128xf32>
    %173 = tpu.matmul %172, %3, %cst_75 {dimension_numbers = #tpu.dot_dimension_numbers<[1], [0], [0], [1], [0, 0, 1, 1], [], []>} : vector<2x32xbf16>, vector<32x128xbf16>, vector<2x128xf32> -> vector<2x128xf32>
    %174 = arith.addf %170, %173 : vector<2x128xf32>
    %175 = arith.addf %174, %7 : vector<2x128xf32>
    %176 = vector.extract_strided_slice %175 {offsets = [0, 0], sizes = [2, 32], strides = [1, 1]} : vector<2x128xf32> to vector<2x32xf32>
    %177 = arith.negf %176 : vector<2x32xf32>
    %178 = math.exp %177 : vector<2x32xf32>
    %cst_76 = arith.constant 1.000000e+00 : f32
    %179 = vector.broadcast %cst_76 : f32 to vector<2x32xf32>
    %180 = arith.addf %179, %178 : vector<2x32xf32>
    %181 = arith.divf %179, %180 : vector<2x32xf32>
    %182 = vector.extract_strided_slice %175 {offsets = [0, 32], sizes = [2, 32], strides = [1, 1]} : vector<2x128xf32> to vector<2x32xf32>
    %183 = arith.negf %182 : vector<2x32xf32>
    %184 = math.exp %183 : vector<2x32xf32>
    %cst_77 = arith.constant 1.000000e+00 : f32
    %185 = vector.broadcast %cst_77 : f32 to vector<2x32xf32>
    %186 = arith.addf %185, %184 : vector<2x32xf32>
    %187 = arith.divf %185, %186 : vector<2x32xf32>
    %188 = vector.extract_strided_slice %175 {offsets = [0, 64], sizes = [2, 32], strides = [1, 1]} : vector<2x128xf32> to vector<2x32xf32>
    %189 = math.tanh %188 : vector<2x32xf32>
    %190 = vector.extract_strided_slice %175 {offsets = [0, 96], sizes = [2, 32], strides = [1, 1]} : vector<2x128xf32> to vector<2x32xf32>
    %191 = arith.negf %190 : vector<2x32xf32>
    %192 = math.exp %191 : vector<2x32xf32>
    %cst_78 = arith.constant 1.000000e+00 : f32
    %193 = vector.broadcast %cst_78 : f32 to vector<2x32xf32>
    %194 = arith.addf %193, %192 : vector<2x32xf32>
    %195 = arith.divf %193, %194 : vector<2x32xf32>
    %c0_79 = arith.constant 0 : index
    %c0_80 = arith.constant 0 : index
    %196 = vector.load %arg7[%c0_79, %c0_80] : memref<2x32xf32, #tpu.memory_space<vmem>>, vector<2x32xf32>
    %197 = arith.mulf %187, %196 : vector<2x32xf32>
    %198 = arith.mulf %181, %189 : vector<2x32xf32>
    %199 = arith.addf %197, %198 : vector<2x32xf32>
    %200 = math.tanh %199 : vector<2x32xf32>
    %201 = arith.mulf %195, %200 : vector<2x32xf32>
    %c0_81 = arith.constant 0 : index
    %c0_82 = arith.constant 0 : index
    %202 = vector.load %arg7[%c0_81, %c0_82] : memref<2x32xf32, #tpu.memory_space<vmem>>, vector<2x32xf32>
    tpu.vector_store %arg7[%c0_81, %c0_82], %199 {strides = array<i32>} : memref<2x32xf32, #tpu.memory_space<vmem>>, vector<2x32xf32>,
    %c0_83 = arith.constant 0 : index
    %c0_84 = arith.constant 0 : index
    %203 = vector.load %arg6[%c0_83, %c0_84] : memref<2x32xf32, #tpu.memory_space<vmem>>, vector<2x32xf32>
    tpu.vector_store %arg6[%c0_83, %c0_84], %201 {strides = array<i32>} : memref<2x32xf32, #tpu.memory_space<vmem>>, vector<2x32xf32>,
    %204 = arith.index_cast %c4_i32 : i32 to index
    %c0_85 = arith.constant 0 : index
    %c0_86 = arith.constant 0 : index
    %205 = vector.load %arg5[%204, %c0_85, %c0_86] : memref<8x2x32xf32, #tpu.memory_space<vmem>>, vector<1x2x32xf32>
    %206 = vector.shape_cast %205 : vector<1x2x32xf32> to vector<2x32xf32>
    %207 = vector.shape_cast %201 : vector<2x32xf32> to vector<1x2x32xf32>
    tpu.vector_store %arg5[%204, %c0_85, %c0_86], %207 {strides = array<i32>} : memref<8x2x32xf32, #tpu.memory_space<vmem>>, vector<1x2x32xf32>,
    %c5_i32 = arith.constant 5 : i32
    %208 = arith.index_cast %c5_i32 : i32 to index
    %c0_87 = arith.constant 0 : index
    %c0_88 = arith.constant 0 : index
    %209 = vector.load %arg3[%208, %c0_87, %c0_88] : memref<8x2x128xf32, #tpu.memory_space<vmem>>, vector<1x2x128xf32>
    %210 = vector.shape_cast %209 : vector<1x2x128xf32> to vector<2x128xf32>
    %c0_89 = arith.constant 0 : index
    %c0_90 = arith.constant 0 : index
    %211 = vector.load %arg6[%c0_89, %c0_90] : memref<2x32xf32, #tpu.memory_space<vmem>>, vector<2x32xf32>
    %212 = arith.truncf %211 : vector<2x32xf32> to vector<2x32xbf16>
    %cst_91 = arith.constant dense<0.000000e+00> : vector<2x128xf32>
    %213 = tpu.matmul %212, %3, %cst_91 {dimension_numbers = #tpu.dot_dimension_numbers<[1], [0], [0], [1], [0, 0, 1, 1], [], []>} : vector<2x32xbf16>, vector<32x128xbf16>, vector<2x128xf32> -> vector<2x128xf32>
    %214 = arith.addf %210, %213 : vector<2x128xf32>
    %215 = arith.addf %214, %7 : vector<2x128xf32>
    %216 = vector.extract_strided_slice %215 {offsets = [0, 0], sizes = [2, 32], strides = [1, 1]} : vector<2x128xf32> to vector<2x32xf32>
    %217 = arith.negf %216 : vector<2x32xf32>
    %218 = math.exp %217 : vector<2x32xf32>
    %cst_92 = arith.constant 1.000000e+00 : f32
    %219 = vector.broadcast %cst_92 : f32 to vector<2x32xf32>
    %220 = arith.addf %219, %218 : vector<2x32xf32>
    %221 = arith.divf %219, %220 : vector<2x32xf32>
    %222 = vector.extract_strided_slice %215 {offsets = [0, 32], sizes = [2, 32], strides = [1, 1]} : vector<2x128xf32> to vector<2x32xf32>
    %223 = arith.negf %222 : vector<2x32xf32>
    %224 = math.exp %223 : vector<2x32xf32>
    %cst_93 = arith.constant 1.000000e+00 : f32
    %225 = vector.broadcast %cst_93 : f32 to vector<2x32xf32>
    %226 = arith.addf %225, %224 : vector<2x32xf32>
    %227 = arith.divf %225, %226 : vector<2x32xf32>
    %228 = vector.extract_strided_slice %215 {offsets = [0, 64], sizes = [2, 32], strides = [1, 1]} : vector<2x128xf32> to vector<2x32xf32>
    %229 = math.tanh %228 : vector<2x32xf32>
    %230 = vector.extract_strided_slice %215 {offsets = [0, 96], sizes = [2, 32], strides = [1, 1]} : vector<2x128xf32> to vector<2x32xf32>
    %231 = arith.negf %230 : vector<2x32xf32>
    %232 = math.exp %231 : vector<2x32xf32>
    %cst_94 = arith.constant 1.000000e+00 : f32
    %233 = vector.broadcast %cst_94 : f32 to vector<2x32xf32>
    %234 = arith.addf %233, %232 : vector<2x32xf32>
    %235 = arith.divf %233, %234 : vector<2x32xf32>
    %c0_95 = arith.constant 0 : index
    %c0_96 = arith.constant 0 : index
    %236 = vector.load %arg7[%c0_95, %c0_96] : memref<2x32xf32, #tpu.memory_space<vmem>>, vector<2x32xf32>
    %237 = arith.mulf %227, %236 : vector<2x32xf32>
    %238 = arith.mulf %221, %229 : vector<2x32xf32>
    %239 = arith.addf %237, %238 : vector<2x32xf32>
    %240 = math.tanh %239 : vector<2x32xf32>
    %241 = arith.mulf %235, %240 : vector<2x32xf32>
    %c0_97 = arith.constant 0 : index
    %c0_98 = arith.constant 0 : index
    %242 = vector.load %arg7[%c0_97, %c0_98] : memref<2x32xf32, #tpu.memory_space<vmem>>, vector<2x32xf32>
    tpu.vector_store %arg7[%c0_97, %c0_98], %239 {strides = array<i32>} : memref<2x32xf32, #tpu.memory_space<vmem>>, vector<2x32xf32>,
    %c0_99 = arith.constant 0 : index
    %c0_100 = arith.constant 0 : index
    %243 = vector.load %arg6[%c0_99, %c0_100] : memref<2x32xf32, #tpu.memory_space<vmem>>, vector<2x32xf32>
    tpu.vector_store %arg6[%c0_99, %c0_100], %241 {strides = array<i32>} : memref<2x32xf32, #tpu.memory_space<vmem>>, vector<2x32xf32>,
    %244 = arith.index_cast %c5_i32 : i32 to index
    %c0_101 = arith.constant 0 : index
    %c0_102 = arith.constant 0 : index
    %245 = vector.load %arg5[%244, %c0_101, %c0_102] : memref<8x2x32xf32, #tpu.memory_space<vmem>>, vector<1x2x32xf32>
    %246 = vector.shape_cast %245 : vector<1x2x32xf32> to vector<2x32xf32>
    %247 = vector.shape_cast %241 : vector<2x32xf32> to vector<1x2x32xf32>
    tpu.vector_store %arg5[%244, %c0_101, %c0_102], %247 {strides = array<i32>} : memref<8x2x32xf32, #tpu.memory_space<vmem>>, vector<1x2x32xf32>,
    %c6_i32 = arith.constant 6 : i32
    %248 = arith.index_cast %c6_i32 : i32 to index
    %c0_103 = arith.constant 0 : index
    %c0_104 = arith.constant 0 : index
    %249 = vector.load %arg3[%248, %c0_103, %c0_104] : memref<8x2x128xf32, #tpu.memory_space<vmem>>, vector<1x2x128xf32>
    %250 = vector.shape_cast %249 : vector<1x2x128xf32> to vector<2x128xf32>
    %c0_105 = arith.constant 0 : index
    %c0_106 = arith.constant 0 : index
    %251 = vector.load %arg6[%c0_105, %c0_106] : memref<2x32xf32, #tpu.memory_space<vmem>>, vector<2x32xf32>
    %252 = arith.truncf %251 : vector<2x32xf32> to vector<2x32xbf16>
    %cst_107 = arith.constant dense<0.000000e+00> : vector<2x128xf32>
    %253 = tpu.matmul %252, %3, %cst_107 {dimension_numbers = #tpu.dot_dimension_numbers<[1], [0], [0], [1], [0, 0, 1, 1], [], []>} : vector<2x32xbf16>, vector<32x128xbf16>, vector<2x128xf32> -> vector<2x128xf32>
    %254 = arith.addf %250, %253 : vector<2x128xf32>
    %255 = arith.addf %254, %7 : vector<2x128xf32>
    %256 = vector.extract_strided_slice %255 {offsets = [0, 0], sizes = [2, 32], strides = [1, 1]} : vector<2x128xf32> to vector<2x32xf32>
    %257 = arith.negf %256 : vector<2x32xf32>
    %258 = math.exp %257 : vector<2x32xf32>
    %cst_108 = arith.constant 1.000000e+00 : f32
    %259 = vector.broadcast %cst_108 : f32 to vector<2x32xf32>
    %260 = arith.addf %259, %258 : vector<2x32xf32>
    %261 = arith.divf %259, %260 : vector<2x32xf32>
    %262 = vector.extract_strided_slice %255 {offsets = [0, 32], sizes = [2, 32], strides = [1, 1]} : vector<2x128xf32> to vector<2x32xf32>
    %263 = arith.negf %262 : vector<2x32xf32>
    %264 = math.exp %263 : vector<2x32xf32>
    %cst_109 = arith.constant 1.000000e+00 : f32
    %265 = vector.broadcast %cst_109 : f32 to vector<2x32xf32>
    %266 = arith.addf %265, %264 : vector<2x32xf32>
    %267 = arith.divf %265, %266 : vector<2x32xf32>
    %268 = vector.extract_strided_slice %255 {offsets = [0, 64], sizes = [2, 32], strides = [1, 1]} : vector<2x128xf32> to vector<2x32xf32>
    %269 = math.tanh %268 : vector<2x32xf32>
    %270 = vector.extract_strided_slice %255 {offsets = [0, 96], sizes = [2, 32], strides = [1, 1]} : vector<2x128xf32> to vector<2x32xf32>
    %271 = arith.negf %270 : vector<2x32xf32>
    %272 = math.exp %271 : vector<2x32xf32>
    %cst_110 = arith.constant 1.000000e+00 : f32
    %273 = vector.broadcast %cst_110 : f32 to vector<2x32xf32>
    %274 = arith.addf %273, %272 : vector<2x32xf32>
    %275 = arith.divf %273, %274 : vector<2x32xf32>
    %c0_111 = arith.constant 0 : index
    %c0_112 = arith.constant 0 : index
    %276 = vector.load %arg7[%c0_111, %c0_112] : memref<2x32xf32, #tpu.memory_space<vmem>>, vector<2x32xf32>
    %277 = arith.mulf %267, %276 : vector<2x32xf32>
    %278 = arith.mulf %261, %269 : vector<2x32xf32>
    %279 = arith.addf %277, %278 : vector<2x32xf32>
    %280 = math.tanh %279 : vector<2x32xf32>
    %281 = arith.mulf %275, %280 : vector<2x32xf32>
    %c0_113 = arith.constant 0 : index
    %c0_114 = arith.constant 0 : index
    %282 = vector.load %arg7[%c0_113, %c0_114] : memref<2x32xf32, #tpu.memory_space<vmem>>, vector<2x32xf32>
    tpu.vector_store %arg7[%c0_113, %c0_114], %279 {strides = array<i32>} : memref<2x32xf32, #tpu.memory_space<vmem>>, vector<2x32xf32>,
    %c0_115 = arith.constant 0 : index
    %c0_116 = arith.constant 0 : index
    %283 = vector.load %arg6[%c0_115, %c0_116] : memref<2x32xf32, #tpu.memory_space<vmem>>, vector<2x32xf32>
    tpu.vector_store %arg6[%c0_115, %c0_116], %281 {strides = array<i32>} : memref<2x32xf32, #tpu.memory_space<vmem>>, vector<2x32xf32>,
    %284 = arith.index_cast %c6_i32 : i32 to index
    %c0_117 = arith.constant 0 : index
    %c0_118 = arith.constant 0 : index
    %285 = vector.load %arg5[%284, %c0_117, %c0_118] : memref<8x2x32xf32, #tpu.memory_space<vmem>>, vector<1x2x32xf32>
    %286 = vector.shape_cast %285 : vector<1x2x32xf32> to vector<2x32xf32>
    %287 = vector.shape_cast %281 : vector<2x32xf32> to vector<1x2x32xf32>
    tpu.vector_store %arg5[%284, %c0_117, %c0_118], %287 {strides = array<i32>} : memref<8x2x32xf32, #tpu.memory_space<vmem>>, vector<1x2x32xf32>,
    %c7_i32 = arith.constant 7 : i32
    %288 = arith.index_cast %c7_i32 : i32 to index
    %c0_119 = arith.constant 0 : index
    %c0_120 = arith.constant 0 : index
    %289 = vector.load %arg3[%288, %c0_119, %c0_120] : memref<8x2x128xf32, #tpu.memory_space<vmem>>, vector<1x2x128xf32>
    %290 = vector.shape_cast %289 : vector<1x2x128xf32> to vector<2x128xf32>
    %c0_121 = arith.constant 0 : index
    %c0_122 = arith.constant 0 : index
    %291 = vector.load %arg6[%c0_121, %c0_122] : memref<2x32xf32, #tpu.memory_space<vmem>>, vector<2x32xf32>
    %292 = arith.truncf %291 : vector<2x32xf32> to vector<2x32xbf16>
    %cst_123 = arith.constant dense<0.000000e+00> : vector<2x128xf32>
    %293 = tpu.matmul %292, %3, %cst_123 {dimension_numbers = #tpu.dot_dimension_numbers<[1], [0], [0], [1], [0, 0, 1, 1], [], []>} : vector<2x32xbf16>, vector<32x128xbf16>, vector<2x128xf32> -> vector<2x128xf32>
    %294 = arith.addf %290, %293 : vector<2x128xf32>
    %295 = arith.addf %294, %7 : vector<2x128xf32>
    %296 = vector.extract_strided_slice %295 {offsets = [0, 0], sizes = [2, 32], strides = [1, 1]} : vector<2x128xf32> to vector<2x32xf32>
    %297 = arith.negf %296 : vector<2x32xf32>
    %298 = math.exp %297 : vector<2x32xf32>
    %cst_124 = arith.constant 1.000000e+00 : f32
    %299 = vector.broadcast %cst_124 : f32 to vector<2x32xf32>
    %300 = arith.addf %299, %298 : vector<2x32xf32>
    %301 = arith.divf %299, %300 : vector<2x32xf32>
    %302 = vector.extract_strided_slice %295 {offsets = [0, 32], sizes = [2, 32], strides = [1, 1]} : vector<2x128xf32> to vector<2x32xf32>
    %303 = arith.negf %302 : vector<2x32xf32>
    %304 = math.exp %303 : vector<2x32xf32>
    %cst_125 = arith.constant 1.000000e+00 : f32
    %305 = vector.broadcast %cst_125 : f32 to vector<2x32xf32>
    %306 = arith.addf %305, %304 : vector<2x32xf32>
    %307 = arith.divf %305, %306 : vector<2x32xf32>
    %308 = vector.extract_strided_slice %295 {offsets = [0, 64], sizes = [2, 32], strides = [1, 1]} : vector<2x128xf32> to vector<2x32xf32>
    %309 = math.tanh %308 : vector<2x32xf32>
    %310 = vector.extract_strided_slice %295 {offsets = [0, 96], sizes = [2, 32], strides = [1, 1]} : vector<2x128xf32> to vector<2x32xf32>
    %311 = arith.negf %310 : vector<2x32xf32>
    %312 = math.exp %311 : vector<2x32xf32>
    %cst_126 = arith.constant 1.000000e+00 : f32
    %313 = vector.broadcast %cst_126 : f32 to vector<2x32xf32>
    %314 = arith.addf %313, %312 : vector<2x32xf32>
    %315 = arith.divf %313, %314 : vector<2x32xf32>
    %c0_127 = arith.constant 0 : index
    %c0_128 = arith.constant 0 : index
    %316 = vector.load %arg7[%c0_127, %c0_128] : memref<2x32xf32, #tpu.memory_space<vmem>>, vector<2x32xf32>
    %317 = arith.mulf %307, %316 : vector<2x32xf32>
    %318 = arith.mulf %301, %309 : vector<2x32xf32>
    %319 = arith.addf %317, %318 : vector<2x32xf32>
    %320 = math.tanh %319 : vector<2x32xf32>
    %321 = arith.mulf %315, %320 : vector<2x32xf32>
    %c0_129 = arith.constant 0 : index
    %c0_130 = arith.constant 0 : index
    %322 = vector.load %arg7[%c0_129, %c0_130] : memref<2x32xf32, #tpu.memory_space<vmem>>, vector<2x32xf32>
    tpu.vector_store %arg7[%c0_129, %c0_130], %319 {strides = array<i32>} : memref<2x32xf32, #tpu.memory_space<vmem>>, vector<2x32xf32>,
    %c0_131 = arith.constant 0 : index
    %c0_132 = arith.constant 0 : index
    %323 = vector.load %arg6[%c0_131, %c0_132] : memref<2x32xf32, #tpu.memory_space<vmem>>, vector<2x32xf32>
    tpu.vector_store %arg6[%c0_131, %c0_132], %321 {strides = array<i32>} : memref<2x32xf32, #tpu.memory_space<vmem>>, vector<2x32xf32>,
    %324 = arith.index_cast %c7_i32 : i32 to index
    %c0_133 = arith.constant 0 : index
    %c0_134 = arith.constant 0 : index
    %325 = vector.load %arg5[%324, %c0_133, %c0_134] : memref<8x2x32xf32, #tpu.memory_space<vmem>>, vector<1x2x32xf32>
    %326 = vector.shape_cast %325 : vector<1x2x32xf32> to vector<2x32xf32>
    %327 = vector.shape_cast %321 : vector<2x32xf32> to vector<1x2x32xf32>
    tpu.vector_store %arg5[%324, %c0_133, %c0_134], %327 {strides = array<i32>} : memref<8x2x32xf32, #tpu.memory_space<vmem>>, vector<1x2x32xf32>,
    %c8_i32 = arith.constant 8 : i32
    return
  }
  func.func @transform_0(%arg0: i32) -> (i32, i32) {
    %c0_i32 = arith.constant 0 : i32
    %c0_i32_0 = arith.constant 0 : i32
    %c0_i32_1 = arith.constant 0 : i32
    return %c0_i32, %c0_i32_0 : i32, i32
  }
  func.func @transform_1(%arg0: i32) -> (i32, i32) {
    %c0_i32 = arith.constant 0 : i32
    %c0_i32_0 = arith.constant 0 : i32
    %c0_i32_1 = arith.constant 0 : i32
    return %c0_i32, %c0_i32_0 : i32, i32
  }
  func.func @transform_2(%arg0: i32) -> (i32, i32, i32) {
    %c0_i32 = arith.constant 0 : i32
    %c0_i32_0 = arith.constant 0 : i32
    %c0_i32_1 = arith.constant 0 : i32
    return %arg0, %c0_i32, %c0_i32_0 : i32, i32, i32
  }
  func.func @transform_3(%arg0: i32) -> (i32, i32) {
    %c0_i32 = arith.constant 0 : i32
    %c0_i32_0 = arith.constant 0 : i32
    %c0_i32_1 = arith.constant 0 : i32
    return %c0_i32, %c0_i32_0 : i32, i32
  }
  func.func @transform_4(%arg0: i32) -> (i32, i32, i32) {
    %c0_i32 = arith.constant 0 : i32
    %c0_i32_0 = arith.constant 0 : i32
    %c0_i32_1 = arith.constant 0 : i32
    return %arg0, %c0_i32, %c0_i32_0 : i32, i32, i32
  }
}

module attributes {stable_mosaic.version = 11 : i64} {
  func.func @_linear_kernel(%arg0: i32, %arg1: i32, %arg2: memref<16x32xf32, #tpu.memory_space<vmem>>, %arg3: memref<32x128xbf16, #tpu.memory_space<vmem>>, %arg4: memref<1x128xf32, #tpu.memory_space<vmem>>, %arg5: memref<16x128xf32, #tpu.memory_space<vmem>>) attributes {dimension_semantics = [#tpu.dimension_semantics<parallel>, #tpu.dimension_semantics<parallel>], iteration_bounds = array<i64: 1, 1>, scalar_prefetch = 0 : i64, scratch_operands = 0 : i64, tpu.core_type = #tpu.core_type<tc>, window_params = [{transform_indices = @transform_0, window_bounds = array<i64: 16, 32>}, {transform_indices = @transform_1, window_bounds = array<i64: 32, 128>}, {transform_indices = @transform_2, window_bounds = array<i64: 1, 128>}, {transform_indices = @transform_3, window_bounds = array<i64: 16, 128>}]} {
    %c0 = arith.constant 0 : index
    %c0_0 = arith.constant 0 : index
    %0 = vector.load %arg2[%c0, %c0_0] : memref<16x32xf32, #tpu.memory_space<vmem>>, vector<16x32xf32>
    %1 = arith.truncf %0 : vector<16x32xf32> to vector<16x32xbf16>
    %c0_1 = arith.constant 0 : index
    %c0_2 = arith.constant 0 : index
    %2 = vector.load %arg3[%c0_1, %c0_2] : memref<32x128xbf16, #tpu.memory_space<vmem>>, vector<32x128xbf16>
    %cst = arith.constant dense<0.000000e+00> : vector<16x128xf32>
    %3 = tpu.matmul %1, %2, %cst {dimension_numbers = #tpu.dot_dimension_numbers<[1], [0], [0], [1], [0, 0, 1, 1], [], []>} : vector<16x32xbf16>, vector<32x128xbf16>, vector<16x128xf32> -> vector<16x128xf32>
    %c0_3 = arith.constant 0 : index
    %c0_4 = arith.constant 0 : index
    %4 = vector.load %arg4[%c0_3, %c0_4] : memref<1x128xf32, #tpu.memory_space<vmem>>, vector<1x128xf32>
    %5 = vector.broadcast %4 : vector<1x128xf32> to vector<16x128xf32>
    %6 = arith.addf %3, %5 : vector<16x128xf32>
    %c0_5 = arith.constant 0 : index
    %c0_6 = arith.constant 0 : index
    %7 = vector.load %arg5[%c0_5, %c0_6] : memref<16x128xf32, #tpu.memory_space<vmem>>, vector<16x128xf32>
    tpu.vector_store %arg5[%c0_5, %c0_6], %6 {strides = array<i32>} : memref<16x128xf32, #tpu.memory_space<vmem>>, vector<16x128xf32>,
    return
  }
  func.func @transform_0(%arg0: i32, %arg1: i32) -> (i32, i32) {
    %c0_i32 = arith.constant 0 : i32
    %c0_i32_0 = arith.constant 0 : i32
    return %arg0, %c0_i32 : i32, i32
  }
  func.func @transform_1(%arg0: i32, %arg1: i32) -> (i32, i32) {
    %c0_i32 = arith.constant 0 : i32
    %c0_i32_0 = arith.constant 0 : i32
    return %c0_i32, %arg1 : i32, i32
  }
  func.func @transform_2(%arg0: i32, %arg1: i32) -> (i32, i32) {
    %c0_i32 = arith.constant 0 : i32
    %c0_i32_0 = arith.constant 0 : i32
    return %c0_i32, %arg1 : i32, i32
  }
  func.func @transform_3(%arg0: i32, %arg1: i32) -> (i32, i32) {
    %c0_i32 = arith.constant 0 : i32
    return %arg0, %arg1 : i32, i32
  }
}

module attributes {stable_mosaic.version = 11 : i64} {
  func.func @_lstm_kernel(%arg0: i32, %arg1: memref<8x2x128xf32, #tpu.memory_space<vmem>>, %arg2: memref<32x128xbf16, #tpu.memory_space<vmem>>, %arg3: memref<8x2x32xf32, #tpu.memory_space<vmem>>, %arg4: memref<2x32xf32, #tpu.memory_space<vmem>>, %arg5: memref<2x32xf32, #tpu.memory_space<vmem>>) attributes {dimension_semantics = [#tpu.dimension_semantics<arbitrary>], iteration_bounds = array<i64: 1>, scalar_prefetch = 0 : i64, scratch_operands = 2 : i64, tpu.core_type = #tpu.core_type<tc>, window_params = [{transform_indices = @transform_0, window_bounds = array<i64: 8, 2, 128>}, {pipeline_mode = #tpu.pipeline_mode<synchronous>, transform_indices = @transform_1, window_bounds = array<i64: 32, 128>}, {transform_indices = @transform_2, window_bounds = array<i64: 8, 2, 32>}]} {
    %c0_i32 = arith.constant 0 : i32
    %0 = arith.cmpi eq, %arg0, %c0_i32 : i32
    %1 = arith.extui %0 : i1 to i32
    %c0_i32_0 = arith.constant 0 : i32
    %2 = arith.cmpi ne, %1, %c0_i32_0 : i32
    scf.if %2 {
      %cst_130 = arith.constant 0.000000e+00 : f32
      %316 = vector.broadcast %cst_130 : f32 to vector<2x32xf32>
      %c0_131 = arith.constant 0 : index
      %c0_132 = arith.constant 0 : index
      %317 = vector.load %arg4[%c0_131, %c0_132] : memref<2x32xf32, #tpu.memory_space<vmem>>, vector<2x32xf32>
      tpu.vector_store %arg4[%c0_131, %c0_132], %316 {strides = array<i32>} : memref<2x32xf32, #tpu.memory_space<vmem>>, vector<2x32xf32>,
      %cst_133 = arith.constant 0.000000e+00 : f32
      %318 = vector.broadcast %cst_133 : f32 to vector<2x32xf32>
      %c0_134 = arith.constant 0 : index
      %c0_135 = arith.constant 0 : index
      %319 = vector.load %arg5[%c0_134, %c0_135] : memref<2x32xf32, #tpu.memory_space<vmem>>, vector<2x32xf32>
      tpu.vector_store %arg5[%c0_134, %c0_135], %318 {strides = array<i32>} : memref<2x32xf32, #tpu.memory_space<vmem>>, vector<2x32xf32>,
    } else {
    }
    %c0 = arith.constant 0 : index
    %c0_1 = arith.constant 0 : index
    %3 = vector.load %arg2[%c0, %c0_1] : memref<32x128xbf16, #tpu.memory_space<vmem>>, vector<32x128xbf16>
    %c0_i32_2 = arith.constant 0 : i32
    %4 = arith.index_cast %c0_i32_2 : i32 to index
    %c0_3 = arith.constant 0 : index
    %c0_4 = arith.constant 0 : index
    %5 = vector.load %arg1[%4, %c0_3, %c0_4] : memref<8x2x128xf32, #tpu.memory_space<vmem>>, vector<1x2x128xf32>
    %6 = vector.shape_cast %5 : vector<1x2x128xf32> to vector<2x128xf32>
    %c0_5 = arith.constant 0 : index
    %c0_6 = arith.constant 0 : index
    %7 = vector.load %arg4[%c0_5, %c0_6] : memref<2x32xf32, #tpu.memory_space<vmem>>, vector<2x32xf32>
    %8 = arith.truncf %7 : vector<2x32xf32> to vector<2x32xbf16>
    %cst = arith.constant dense<0.000000e+00> : vector<2x128xf32>
    %9 = tpu.matmul %8, %3, %cst {dimension_numbers = #tpu.dot_dimension_numbers<[1], [0], [0], [1], [0, 0, 1, 1], [], []>} : vector<2x32xbf16>, vector<32x128xbf16>, vector<2x128xf32> -> vector<2x128xf32>
    %10 = arith.addf %6, %9 : vector<2x128xf32>
    %11 = vector.extract_strided_slice %10 {offsets = [0, 0], sizes = [2, 32], strides = [1, 1]} : vector<2x128xf32> to vector<2x32xf32>
    %12 = arith.negf %11 : vector<2x32xf32>
    %13 = math.exp %12 : vector<2x32xf32>
    %cst_7 = arith.constant 1.000000e+00 : f32
    %14 = vector.broadcast %cst_7 : f32 to vector<2x32xf32>
    %15 = arith.addf %14, %13 : vector<2x32xf32>
    %16 = arith.divf %14, %15 : vector<2x32xf32>
    %17 = vector.extract_strided_slice %10 {offsets = [0, 32], sizes = [2, 32], strides = [1, 1]} : vector<2x128xf32> to vector<2x32xf32>
    %18 = arith.negf %17 : vector<2x32xf32>
    %19 = math.exp %18 : vector<2x32xf32>
    %cst_8 = arith.constant 1.000000e+00 : f32
    %20 = vector.broadcast %cst_8 : f32 to vector<2x32xf32>
    %21 = arith.addf %20, %19 : vector<2x32xf32>
    %22 = arith.divf %20, %21 : vector<2x32xf32>
    %23 = vector.extract_strided_slice %10 {offsets = [0, 64], sizes = [2, 32], strides = [1, 1]} : vector<2x128xf32> to vector<2x32xf32>
    %24 = math.tanh %23 : vector<2x32xf32>
    %25 = vector.extract_strided_slice %10 {offsets = [0, 96], sizes = [2, 32], strides = [1, 1]} : vector<2x128xf32> to vector<2x32xf32>
    %26 = arith.negf %25 : vector<2x32xf32>
    %27 = math.exp %26 : vector<2x32xf32>
    %cst_9 = arith.constant 1.000000e+00 : f32
    %28 = vector.broadcast %cst_9 : f32 to vector<2x32xf32>
    %29 = arith.addf %28, %27 : vector<2x32xf32>
    %30 = arith.divf %28, %29 : vector<2x32xf32>
    %c0_10 = arith.constant 0 : index
    %c0_11 = arith.constant 0 : index
    %31 = vector.load %arg5[%c0_10, %c0_11] : memref<2x32xf32, #tpu.memory_space<vmem>>, vector<2x32xf32>
    %32 = arith.mulf %22, %31 : vector<2x32xf32>
    %33 = arith.mulf %16, %24 : vector<2x32xf32>
    %34 = arith.addf %32, %33 : vector<2x32xf32>
    %35 = math.tanh %34 : vector<2x32xf32>
    %36 = arith.mulf %30, %35 : vector<2x32xf32>
    %c0_12 = arith.constant 0 : index
    %c0_13 = arith.constant 0 : index
    %37 = vector.load %arg5[%c0_12, %c0_13] : memref<2x32xf32, #tpu.memory_space<vmem>>, vector<2x32xf32>
    tpu.vector_store %arg5[%c0_12, %c0_13], %34 {strides = array<i32>} : memref<2x32xf32, #tpu.memory_space<vmem>>, vector<2x32xf32>,
    %c0_14 = arith.constant 0 : index
    %c0_15 = arith.constant 0 : index
    %38 = vector.load %arg4[%c0_14, %c0_15] : memref<2x32xf32, #tpu.memory_space<vmem>>, vector<2x32xf32>
    tpu.vector_store %arg4[%c0_14, %c0_15], %36 {strides = array<i32>} : memref<2x32xf32, #tpu.memory_space<vmem>>, vector<2x32xf32>,
    %39 = arith.index_cast %c0_i32_2 : i32 to index
    %c0_16 = arith.constant 0 : index
    %c0_17 = arith.constant 0 : index
    %40 = vector.load %arg3[%39, %c0_16, %c0_17] : memref<8x2x32xf32, #tpu.memory_space<vmem>>, vector<1x2x32xf32>
    %41 = vector.shape_cast %40 : vector<1x2x32xf32> to vector<2x32xf32>
    %42 = vector.shape_cast %36 : vector<2x32xf32> to vector<1x2x32xf32>
    tpu.vector_store %arg3[%39, %c0_16, %c0_17], %42 {strides = array<i32>} : memref<8x2x32xf32, #tpu.memory_space<vmem>>, vector<1x2x32xf32>,
    %c1_i32 = arith.constant 1 : i32
    %43 = arith.index_cast %c1_i32 : i32 to index
    %c0_18 = arith.constant 0 : index
    %c0_19 = arith.constant 0 : index
    %44 = vector.load %arg1[%43, %c0_18, %c0_19] : memref<8x2x128xf32, #tpu.memory_space<vmem>>, vector<1x2x128xf32>
    %45 = vector.shape_cast %44 : vector<1x2x128xf32> to vector<2x128xf32>
    %c0_20 = arith.constant 0 : index
    %c0_21 = arith.constant 0 : index
    %46 = vector.load %arg4[%c0_20, %c0_21] : memref<2x32xf32, #tpu.memory_space<vmem>>, vector<2x32xf32>
    %47 = arith.truncf %46 : vector<2x32xf32> to vector<2x32xbf16>
    %cst_22 = arith.constant dense<0.000000e+00> : vector<2x128xf32>
    %48 = tpu.matmul %47, %3, %cst_22 {dimension_numbers = #tpu.dot_dimension_numbers<[1], [0], [0], [1], [0, 0, 1, 1], [], []>} : vector<2x32xbf16>, vector<32x128xbf16>, vector<2x128xf32> -> vector<2x128xf32>
    %49 = arith.addf %45, %48 : vector<2x128xf32>
    %50 = vector.extract_strided_slice %49 {offsets = [0, 0], sizes = [2, 32], strides = [1, 1]} : vector<2x128xf32> to vector<2x32xf32>
    %51 = arith.negf %50 : vector<2x32xf32>
    %52 = math.exp %51 : vector<2x32xf32>
    %cst_23 = arith.constant 1.000000e+00 : f32
    %53 = vector.broadcast %cst_23 : f32 to vector<2x32xf32>
    %54 = arith.addf %53, %52 : vector<2x32xf32>
    %55 = arith.divf %53, %54 : vector<2x32xf32>
    %56 = vector.extract_strided_slice %49 {offsets = [0, 32], sizes = [2, 32], strides = [1, 1]} : vector<2x128xf32> to vector<2x32xf32>
    %57 = arith.negf %56 : vector<2x32xf32>
    %58 = math.exp %57 : vector<2x32xf32>
    %cst_24 = arith.constant 1.000000e+00 : f32
    %59 = vector.broadcast %cst_24 : f32 to vector<2x32xf32>
    %60 = arith.addf %59, %58 : vector<2x32xf32>
    %61 = arith.divf %59, %60 : vector<2x32xf32>
    %62 = vector.extract_strided_slice %49 {offsets = [0, 64], sizes = [2, 32], strides = [1, 1]} : vector<2x128xf32> to vector<2x32xf32>
    %63 = math.tanh %62 : vector<2x32xf32>
    %64 = vector.extract_strided_slice %49 {offsets = [0, 96], sizes = [2, 32], strides = [1, 1]} : vector<2x128xf32> to vector<2x32xf32>
    %65 = arith.negf %64 : vector<2x32xf32>
    %66 = math.exp %65 : vector<2x32xf32>
    %cst_25 = arith.constant 1.000000e+00 : f32
    %67 = vector.broadcast %cst_25 : f32 to vector<2x32xf32>
    %68 = arith.addf %67, %66 : vector<2x32xf32>
    %69 = arith.divf %67, %68 : vector<2x32xf32>
    %c0_26 = arith.constant 0 : index
    %c0_27 = arith.constant 0 : index
    %70 = vector.load %arg5[%c0_26, %c0_27] : memref<2x32xf32, #tpu.memory_space<vmem>>, vector<2x32xf32>
    %71 = arith.mulf %61, %70 : vector<2x32xf32>
    %72 = arith.mulf %55, %63 : vector<2x32xf32>
    %73 = arith.addf %71, %72 : vector<2x32xf32>
    %74 = math.tanh %73 : vector<2x32xf32>
    %75 = arith.mulf %69, %74 : vector<2x32xf32>
    %c0_28 = arith.constant 0 : index
    %c0_29 = arith.constant 0 : index
    %76 = vector.load %arg5[%c0_28, %c0_29] : memref<2x32xf32, #tpu.memory_space<vmem>>, vector<2x32xf32>
    tpu.vector_store %arg5[%c0_28, %c0_29], %73 {strides = array<i32>} : memref<2x32xf32, #tpu.memory_space<vmem>>, vector<2x32xf32>,
    %c0_30 = arith.constant 0 : index
    %c0_31 = arith.constant 0 : index
    %77 = vector.load %arg4[%c0_30, %c0_31] : memref<2x32xf32, #tpu.memory_space<vmem>>, vector<2x32xf32>
    tpu.vector_store %arg4[%c0_30, %c0_31], %75 {strides = array<i32>} : memref<2x32xf32, #tpu.memory_space<vmem>>, vector<2x32xf32>,
    %78 = arith.index_cast %c1_i32 : i32 to index
    %c0_32 = arith.constant 0 : index
    %c0_33 = arith.constant 0 : index
    %79 = vector.load %arg3[%78, %c0_32, %c0_33] : memref<8x2x32xf32, #tpu.memory_space<vmem>>, vector<1x2x32xf32>
    %80 = vector.shape_cast %79 : vector<1x2x32xf32> to vector<2x32xf32>
    %81 = vector.shape_cast %75 : vector<2x32xf32> to vector<1x2x32xf32>
    tpu.vector_store %arg3[%78, %c0_32, %c0_33], %81 {strides = array<i32>} : memref<8x2x32xf32, #tpu.memory_space<vmem>>, vector<1x2x32xf32>,
    %c2_i32 = arith.constant 2 : i32
    %82 = arith.index_cast %c2_i32 : i32 to index
    %c0_34 = arith.constant 0 : index
    %c0_35 = arith.constant 0 : index
    %83 = vector.load %arg1[%82, %c0_34, %c0_35] : memref<8x2x128xf32, #tpu.memory_space<vmem>>, vector<1x2x128xf32>
    %84 = vector.shape_cast %83 : vector<1x2x128xf32> to vector<2x128xf32>
    %c0_36 = arith.constant 0 : index
    %c0_37 = arith.constant 0 : index
    %85 = vector.load %arg4[%c0_36, %c0_37] : memref<2x32xf32, #tpu.memory_space<vmem>>, vector<2x32xf32>
    %86 = arith.truncf %85 : vector<2x32xf32> to vector<2x32xbf16>
    %cst_38 = arith.constant dense<0.000000e+00> : vector<2x128xf32>
    %87 = tpu.matmul %86, %3, %cst_38 {dimension_numbers = #tpu.dot_dimension_numbers<[1], [0], [0], [1], [0, 0, 1, 1], [], []>} : vector<2x32xbf16>, vector<32x128xbf16>, vector<2x128xf32> -> vector<2x128xf32>
    %88 = arith.addf %84, %87 : vector<2x128xf32>
    %89 = vector.extract_strided_slice %88 {offsets = [0, 0], sizes = [2, 32], strides = [1, 1]} : vector<2x128xf32> to vector<2x32xf32>
    %90 = arith.negf %89 : vector<2x32xf32>
    %91 = math.exp %90 : vector<2x32xf32>
    %cst_39 = arith.constant 1.000000e+00 : f32
    %92 = vector.broadcast %cst_39 : f32 to vector<2x32xf32>
    %93 = arith.addf %92, %91 : vector<2x32xf32>
    %94 = arith.divf %92, %93 : vector<2x32xf32>
    %95 = vector.extract_strided_slice %88 {offsets = [0, 32], sizes = [2, 32], strides = [1, 1]} : vector<2x128xf32> to vector<2x32xf32>
    %96 = arith.negf %95 : vector<2x32xf32>
    %97 = math.exp %96 : vector<2x32xf32>
    %cst_40 = arith.constant 1.000000e+00 : f32
    %98 = vector.broadcast %cst_40 : f32 to vector<2x32xf32>
    %99 = arith.addf %98, %97 : vector<2x32xf32>
    %100 = arith.divf %98, %99 : vector<2x32xf32>
    %101 = vector.extract_strided_slice %88 {offsets = [0, 64], sizes = [2, 32], strides = [1, 1]} : vector<2x128xf32> to vector<2x32xf32>
    %102 = math.tanh %101 : vector<2x32xf32>
    %103 = vector.extract_strided_slice %88 {offsets = [0, 96], sizes = [2, 32], strides = [1, 1]} : vector<2x128xf32> to vector<2x32xf32>
    %104 = arith.negf %103 : vector<2x32xf32>
    %105 = math.exp %104 : vector<2x32xf32>
    %cst_41 = arith.constant 1.000000e+00 : f32
    %106 = vector.broadcast %cst_41 : f32 to vector<2x32xf32>
    %107 = arith.addf %106, %105 : vector<2x32xf32>
    %108 = arith.divf %106, %107 : vector<2x32xf32>
    %c0_42 = arith.constant 0 : index
    %c0_43 = arith.constant 0 : index
    %109 = vector.load %arg5[%c0_42, %c0_43] : memref<2x32xf32, #tpu.memory_space<vmem>>, vector<2x32xf32>
    %110 = arith.mulf %100, %109 : vector<2x32xf32>
    %111 = arith.mulf %94, %102 : vector<2x32xf32>
    %112 = arith.addf %110, %111 : vector<2x32xf32>
    %113 = math.tanh %112 : vector<2x32xf32>
    %114 = arith.mulf %108, %113 : vector<2x32xf32>
    %c0_44 = arith.constant 0 : index
    %c0_45 = arith.constant 0 : index
    %115 = vector.load %arg5[%c0_44, %c0_45] : memref<2x32xf32, #tpu.memory_space<vmem>>, vector<2x32xf32>
    tpu.vector_store %arg5[%c0_44, %c0_45], %112 {strides = array<i32>} : memref<2x32xf32, #tpu.memory_space<vmem>>, vector<2x32xf32>,
    %c0_46 = arith.constant 0 : index
    %c0_47 = arith.constant 0 : index
    %116 = vector.load %arg4[%c0_46, %c0_47] : memref<2x32xf32, #tpu.memory_space<vmem>>, vector<2x32xf32>
    tpu.vector_store %arg4[%c0_46, %c0_47], %114 {strides = array<i32>} : memref<2x32xf32, #tpu.memory_space<vmem>>, vector<2x32xf32>,
    %117 = arith.index_cast %c2_i32 : i32 to index
    %c0_48 = arith.constant 0 : index
    %c0_49 = arith.constant 0 : index
    %118 = vector.load %arg3[%117, %c0_48, %c0_49] : memref<8x2x32xf32, #tpu.memory_space<vmem>>, vector<1x2x32xf32>
    %119 = vector.shape_cast %118 : vector<1x2x32xf32> to vector<2x32xf32>
    %120 = vector.shape_cast %114 : vector<2x32xf32> to vector<1x2x32xf32>
    tpu.vector_store %arg3[%117, %c0_48, %c0_49], %120 {strides = array<i32>} : memref<8x2x32xf32, #tpu.memory_space<vmem>>, vector<1x2x32xf32>,
    %c3_i32 = arith.constant 3 : i32
    %121 = arith.index_cast %c3_i32 : i32 to index
    %c0_50 = arith.constant 0 : index
    %c0_51 = arith.constant 0 : index
    %122 = vector.load %arg1[%121, %c0_50, %c0_51] : memref<8x2x128xf32, #tpu.memory_space<vmem>>, vector<1x2x128xf32>
    %123 = vector.shape_cast %122 : vector<1x2x128xf32> to vector<2x128xf32>
    %c0_52 = arith.constant 0 : index
    %c0_53 = arith.constant 0 : index
    %124 = vector.load %arg4[%c0_52, %c0_53] : memref<2x32xf32, #tpu.memory_space<vmem>>, vector<2x32xf32>
    %125 = arith.truncf %124 : vector<2x32xf32> to vector<2x32xbf16>
    %cst_54 = arith.constant dense<0.000000e+00> : vector<2x128xf32>
    %126 = tpu.matmul %125, %3, %cst_54 {dimension_numbers = #tpu.dot_dimension_numbers<[1], [0], [0], [1], [0, 0, 1, 1], [], []>} : vector<2x32xbf16>, vector<32x128xbf16>, vector<2x128xf32> -> vector<2x128xf32>
    %127 = arith.addf %123, %126 : vector<2x128xf32>
    %128 = vector.extract_strided_slice %127 {offsets = [0, 0], sizes = [2, 32], strides = [1, 1]} : vector<2x128xf32> to vector<2x32xf32>
    %129 = arith.negf %128 : vector<2x32xf32>
    %130 = math.exp %129 : vector<2x32xf32>
    %cst_55 = arith.constant 1.000000e+00 : f32
    %131 = vector.broadcast %cst_55 : f32 to vector<2x32xf32>
    %132 = arith.addf %131, %130 : vector<2x32xf32>
    %133 = arith.divf %131, %132 : vector<2x32xf32>
    %134 = vector.extract_strided_slice %127 {offsets = [0, 32], sizes = [2, 32], strides = [1, 1]} : vector<2x128xf32> to vector<2x32xf32>
    %135 = arith.negf %134 : vector<2x32xf32>
    %136 = math.exp %135 : vector<2x32xf32>
    %cst_56 = arith.constant 1.000000e+00 : f32
    %137 = vector.broadcast %cst_56 : f32 to vector<2x32xf32>
    %138 = arith.addf %137, %136 : vector<2x32xf32>
    %139 = arith.divf %137, %138 : vector<2x32xf32>
    %140 = vector.extract_strided_slice %127 {offsets = [0, 64], sizes = [2, 32], strides = [1, 1]} : vector<2x128xf32> to vector<2x32xf32>
    %141 = math.tanh %140 : vector<2x32xf32>
    %142 = vector.extract_strided_slice %127 {offsets = [0, 96], sizes = [2, 32], strides = [1, 1]} : vector<2x128xf32> to vector<2x32xf32>
    %143 = arith.negf %142 : vector<2x32xf32>
    %144 = math.exp %143 : vector<2x32xf32>
    %cst_57 = arith.constant 1.000000e+00 : f32
    %145 = vector.broadcast %cst_57 : f32 to vector<2x32xf32>
    %146 = arith.addf %145, %144 : vector<2x32xf32>
    %147 = arith.divf %145, %146 : vector<2x32xf32>
    %c0_58 = arith.constant 0 : index
    %c0_59 = arith.constant 0 : index
    %148 = vector.load %arg5[%c0_58, %c0_59] : memref<2x32xf32, #tpu.memory_space<vmem>>, vector<2x32xf32>
    %149 = arith.mulf %139, %148 : vector<2x32xf32>
    %150 = arith.mulf %133, %141 : vector<2x32xf32>
    %151 = arith.addf %149, %150 : vector<2x32xf32>
    %152 = math.tanh %151 : vector<2x32xf32>
    %153 = arith.mulf %147, %152 : vector<2x32xf32>
    %c0_60 = arith.constant 0 : index
    %c0_61 = arith.constant 0 : index
    %154 = vector.load %arg5[%c0_60, %c0_61] : memref<2x32xf32, #tpu.memory_space<vmem>>, vector<2x32xf32>
    tpu.vector_store %arg5[%c0_60, %c0_61], %151 {strides = array<i32>} : memref<2x32xf32, #tpu.memory_space<vmem>>, vector<2x32xf32>,
    %c0_62 = arith.constant 0 : index
    %c0_63 = arith.constant 0 : index
    %155 = vector.load %arg4[%c0_62, %c0_63] : memref<2x32xf32, #tpu.memory_space<vmem>>, vector<2x32xf32>
    tpu.vector_store %arg4[%c0_62, %c0_63], %153 {strides = array<i32>} : memref<2x32xf32, #tpu.memory_space<vmem>>, vector<2x32xf32>,
    %156 = arith.index_cast %c3_i32 : i32 to index
    %c0_64 = arith.constant 0 : index
    %c0_65 = arith.constant 0 : index
    %157 = vector.load %arg3[%156, %c0_64, %c0_65] : memref<8x2x32xf32, #tpu.memory_space<vmem>>, vector<1x2x32xf32>
    %158 = vector.shape_cast %157 : vector<1x2x32xf32> to vector<2x32xf32>
    %159 = vector.shape_cast %153 : vector<2x32xf32> to vector<1x2x32xf32>
    tpu.vector_store %arg3[%156, %c0_64, %c0_65], %159 {strides = array<i32>} : memref<8x2x32xf32, #tpu.memory_space<vmem>>, vector<1x2x32xf32>,
    %c4_i32 = arith.constant 4 : i32
    %160 = arith.index_cast %c4_i32 : i32 to index
    %c0_66 = arith.constant 0 : index
    %c0_67 = arith.constant 0 : index
    %161 = vector.load %arg1[%160, %c0_66, %c0_67] : memref<8x2x128xf32, #tpu.memory_space<vmem>>, vector<1x2x128xf32>
    %162 = vector.shape_cast %161 : vector<1x2x128xf32> to vector<2x128xf32>
    %c0_68 = arith.constant 0 : index
    %c0_69 = arith.constant 0 : index
    %163 = vector.load %arg4[%c0_68, %c0_69] : memref<2x32xf32, #tpu.memory_space<vmem>>, vector<2x32xf32>
    %164 = arith.truncf %163 : vector<2x32xf32> to vector<2x32xbf16>
    %cst_70 = arith.constant dense<0.000000e+00> : vector<2x128xf32>
    %165 = tpu.matmul %164, %3, %cst_70 {dimension_numbers = #tpu.dot_dimension_numbers<[1], [0], [0], [1], [0, 0, 1, 1], [], []>} : vector<2x32xbf16>, vector<32x128xbf16>, vector<2x128xf32> -> vector<2x128xf32>
    %166 = arith.addf %162, %165 : vector<2x128xf32>
    %167 = vector.extract_strided_slice %166 {offsets = [0, 0], sizes = [2, 32], strides = [1, 1]} : vector<2x128xf32> to vector<2x32xf32>
    %168 = arith.negf %167 : vector<2x32xf32>
    %169 = math.exp %168 : vector<2x32xf32>
    %cst_71 = arith.constant 1.000000e+00 : f32
    %170 = vector.broadcast %cst_71 : f32 to vector<2x32xf32>
    %171 = arith.addf %170, %169 : vector<2x32xf32>
    %172 = arith.divf %170, %171 : vector<2x32xf32>
    %173 = vector.extract_strided_slice %166 {offsets = [0, 32], sizes = [2, 32], strides = [1, 1]} : vector<2x128xf32> to vector<2x32xf32>
    %174 = arith.negf %173 : vector<2x32xf32>
    %175 = math.exp %174 : vector<2x32xf32>
    %cst_72 = arith.constant 1.000000e+00 : f32
    %176 = vector.broadcast %cst_72 : f32 to vector<2x32xf32>
    %177 = arith.addf %176, %175 : vector<2x32xf32>
    %178 = arith.divf %176, %177 : vector<2x32xf32>
    %179 = vector.extract_strided_slice %166 {offsets = [0, 64], sizes = [2, 32], strides = [1, 1]} : vector<2x128xf32> to vector<2x32xf32>
    %180 = math.tanh %179 : vector<2x32xf32>
    %181 = vector.extract_strided_slice %166 {offsets = [0, 96], sizes = [2, 32], strides = [1, 1]} : vector<2x128xf32> to vector<2x32xf32>
    %182 = arith.negf %181 : vector<2x32xf32>
    %183 = math.exp %182 : vector<2x32xf32>
    %cst_73 = arith.constant 1.000000e+00 : f32
    %184 = vector.broadcast %cst_73 : f32 to vector<2x32xf32>
    %185 = arith.addf %184, %183 : vector<2x32xf32>
    %186 = arith.divf %184, %185 : vector<2x32xf32>
    %c0_74 = arith.constant 0 : index
    %c0_75 = arith.constant 0 : index
    %187 = vector.load %arg5[%c0_74, %c0_75] : memref<2x32xf32, #tpu.memory_space<vmem>>, vector<2x32xf32>
    %188 = arith.mulf %178, %187 : vector<2x32xf32>
    %189 = arith.mulf %172, %180 : vector<2x32xf32>
    %190 = arith.addf %188, %189 : vector<2x32xf32>
    %191 = math.tanh %190 : vector<2x32xf32>
    %192 = arith.mulf %186, %191 : vector<2x32xf32>
    %c0_76 = arith.constant 0 : index
    %c0_77 = arith.constant 0 : index
    %193 = vector.load %arg5[%c0_76, %c0_77] : memref<2x32xf32, #tpu.memory_space<vmem>>, vector<2x32xf32>
    tpu.vector_store %arg5[%c0_76, %c0_77], %190 {strides = array<i32>} : memref<2x32xf32, #tpu.memory_space<vmem>>, vector<2x32xf32>,
    %c0_78 = arith.constant 0 : index
    %c0_79 = arith.constant 0 : index
    %194 = vector.load %arg4[%c0_78, %c0_79] : memref<2x32xf32, #tpu.memory_space<vmem>>, vector<2x32xf32>
    tpu.vector_store %arg4[%c0_78, %c0_79], %192 {strides = array<i32>} : memref<2x32xf32, #tpu.memory_space<vmem>>, vector<2x32xf32>,
    %195 = arith.index_cast %c4_i32 : i32 to index
    %c0_80 = arith.constant 0 : index
    %c0_81 = arith.constant 0 : index
    %196 = vector.load %arg3[%195, %c0_80, %c0_81] : memref<8x2x32xf32, #tpu.memory_space<vmem>>, vector<1x2x32xf32>
    %197 = vector.shape_cast %196 : vector<1x2x32xf32> to vector<2x32xf32>
    %198 = vector.shape_cast %192 : vector<2x32xf32> to vector<1x2x32xf32>
    tpu.vector_store %arg3[%195, %c0_80, %c0_81], %198 {strides = array<i32>} : memref<8x2x32xf32, #tpu.memory_space<vmem>>, vector<1x2x32xf32>,
    %c5_i32 = arith.constant 5 : i32
    %199 = arith.index_cast %c5_i32 : i32 to index
    %c0_82 = arith.constant 0 : index
    %c0_83 = arith.constant 0 : index
    %200 = vector.load %arg1[%199, %c0_82, %c0_83] : memref<8x2x128xf32, #tpu.memory_space<vmem>>, vector<1x2x128xf32>
    %201 = vector.shape_cast %200 : vector<1x2x128xf32> to vector<2x128xf32>
    %c0_84 = arith.constant 0 : index
    %c0_85 = arith.constant 0 : index
    %202 = vector.load %arg4[%c0_84, %c0_85] : memref<2x32xf32, #tpu.memory_space<vmem>>, vector<2x32xf32>
    %203 = arith.truncf %202 : vector<2x32xf32> to vector<2x32xbf16>
    %cst_86 = arith.constant dense<0.000000e+00> : vector<2x128xf32>
    %204 = tpu.matmul %203, %3, %cst_86 {dimension_numbers = #tpu.dot_dimension_numbers<[1], [0], [0], [1], [0, 0, 1, 1], [], []>} : vector<2x32xbf16>, vector<32x128xbf16>, vector<2x128xf32> -> vector<2x128xf32>
    %205 = arith.addf %201, %204 : vector<2x128xf32>
    %206 = vector.extract_strided_slice %205 {offsets = [0, 0], sizes = [2, 32], strides = [1, 1]} : vector<2x128xf32> to vector<2x32xf32>
    %207 = arith.negf %206 : vector<2x32xf32>
    %208 = math.exp %207 : vector<2x32xf32>
    %cst_87 = arith.constant 1.000000e+00 : f32
    %209 = vector.broadcast %cst_87 : f32 to vector<2x32xf32>
    %210 = arith.addf %209, %208 : vector<2x32xf32>
    %211 = arith.divf %209, %210 : vector<2x32xf32>
    %212 = vector.extract_strided_slice %205 {offsets = [0, 32], sizes = [2, 32], strides = [1, 1]} : vector<2x128xf32> to vector<2x32xf32>
    %213 = arith.negf %212 : vector<2x32xf32>
    %214 = math.exp %213 : vector<2x32xf32>
    %cst_88 = arith.constant 1.000000e+00 : f32
    %215 = vector.broadcast %cst_88 : f32 to vector<2x32xf32>
    %216 = arith.addf %215, %214 : vector<2x32xf32>
    %217 = arith.divf %215, %216 : vector<2x32xf32>
    %218 = vector.extract_strided_slice %205 {offsets = [0, 64], sizes = [2, 32], strides = [1, 1]} : vector<2x128xf32> to vector<2x32xf32>
    %219 = math.tanh %218 : vector<2x32xf32>
    %220 = vector.extract_strided_slice %205 {offsets = [0, 96], sizes = [2, 32], strides = [1, 1]} : vector<2x128xf32> to vector<2x32xf32>
    %221 = arith.negf %220 : vector<2x32xf32>
    %222 = math.exp %221 : vector<2x32xf32>
    %cst_89 = arith.constant 1.000000e+00 : f32
    %223 = vector.broadcast %cst_89 : f32 to vector<2x32xf32>
    %224 = arith.addf %223, %222 : vector<2x32xf32>
    %225 = arith.divf %223, %224 : vector<2x32xf32>
    %c0_90 = arith.constant 0 : index
    %c0_91 = arith.constant 0 : index
    %226 = vector.load %arg5[%c0_90, %c0_91] : memref<2x32xf32, #tpu.memory_space<vmem>>, vector<2x32xf32>
    %227 = arith.mulf %217, %226 : vector<2x32xf32>
    %228 = arith.mulf %211, %219 : vector<2x32xf32>
    %229 = arith.addf %227, %228 : vector<2x32xf32>
    %230 = math.tanh %229 : vector<2x32xf32>
    %231 = arith.mulf %225, %230 : vector<2x32xf32>
    %c0_92 = arith.constant 0 : index
    %c0_93 = arith.constant 0 : index
    %232 = vector.load %arg5[%c0_92, %c0_93] : memref<2x32xf32, #tpu.memory_space<vmem>>, vector<2x32xf32>
    tpu.vector_store %arg5[%c0_92, %c0_93], %229 {strides = array<i32>} : memref<2x32xf32, #tpu.memory_space<vmem>>, vector<2x32xf32>,
    %c0_94 = arith.constant 0 : index
    %c0_95 = arith.constant 0 : index
    %233 = vector.load %arg4[%c0_94, %c0_95] : memref<2x32xf32, #tpu.memory_space<vmem>>, vector<2x32xf32>
    tpu.vector_store %arg4[%c0_94, %c0_95], %231 {strides = array<i32>} : memref<2x32xf32, #tpu.memory_space<vmem>>, vector<2x32xf32>,
    %234 = arith.index_cast %c5_i32 : i32 to index
    %c0_96 = arith.constant 0 : index
    %c0_97 = arith.constant 0 : index
    %235 = vector.load %arg3[%234, %c0_96, %c0_97] : memref<8x2x32xf32, #tpu.memory_space<vmem>>, vector<1x2x32xf32>
    %236 = vector.shape_cast %235 : vector<1x2x32xf32> to vector<2x32xf32>
    %237 = vector.shape_cast %231 : vector<2x32xf32> to vector<1x2x32xf32>
    tpu.vector_store %arg3[%234, %c0_96, %c0_97], %237 {strides = array<i32>} : memref<8x2x32xf32, #tpu.memory_space<vmem>>, vector<1x2x32xf32>,
    %c6_i32 = arith.constant 6 : i32
    %238 = arith.index_cast %c6_i32 : i32 to index
    %c0_98 = arith.constant 0 : index
    %c0_99 = arith.constant 0 : index
    %239 = vector.load %arg1[%238, %c0_98, %c0_99] : memref<8x2x128xf32, #tpu.memory_space<vmem>>, vector<1x2x128xf32>
    %240 = vector.shape_cast %239 : vector<1x2x128xf32> to vector<2x128xf32>
    %c0_100 = arith.constant 0 : index
    %c0_101 = arith.constant 0 : index
    %241 = vector.load %arg4[%c0_100, %c0_101] : memref<2x32xf32, #tpu.memory_space<vmem>>, vector<2x32xf32>
    %242 = arith.truncf %241 : vector<2x32xf32> to vector<2x32xbf16>
    %cst_102 = arith.constant dense<0.000000e+00> : vector<2x128xf32>
    %243 = tpu.matmul %242, %3, %cst_102 {dimension_numbers = #tpu.dot_dimension_numbers<[1], [0], [0], [1], [0, 0, 1, 1], [], []>} : vector<2x32xbf16>, vector<32x128xbf16>, vector<2x128xf32> -> vector<2x128xf32>
    %244 = arith.addf %240, %243 : vector<2x128xf32>
    %245 = vector.extract_strided_slice %244 {offsets = [0, 0], sizes = [2, 32], strides = [1, 1]} : vector<2x128xf32> to vector<2x32xf32>
    %246 = arith.negf %245 : vector<2x32xf32>
    %247 = math.exp %246 : vector<2x32xf32>
    %cst_103 = arith.constant 1.000000e+00 : f32
    %248 = vector.broadcast %cst_103 : f32 to vector<2x32xf32>
    %249 = arith.addf %248, %247 : vector<2x32xf32>
    %250 = arith.divf %248, %249 : vector<2x32xf32>
    %251 = vector.extract_strided_slice %244 {offsets = [0, 32], sizes = [2, 32], strides = [1, 1]} : vector<2x128xf32> to vector<2x32xf32>
    %252 = arith.negf %251 : vector<2x32xf32>
    %253 = math.exp %252 : vector<2x32xf32>
    %cst_104 = arith.constant 1.000000e+00 : f32
    %254 = vector.broadcast %cst_104 : f32 to vector<2x32xf32>
    %255 = arith.addf %254, %253 : vector<2x32xf32>
    %256 = arith.divf %254, %255 : vector<2x32xf32>
    %257 = vector.extract_strided_slice %244 {offsets = [0, 64], sizes = [2, 32], strides = [1, 1]} : vector<2x128xf32> to vector<2x32xf32>
    %258 = math.tanh %257 : vector<2x32xf32>
    %259 = vector.extract_strided_slice %244 {offsets = [0, 96], sizes = [2, 32], strides = [1, 1]} : vector<2x128xf32> to vector<2x32xf32>
    %260 = arith.negf %259 : vector<2x32xf32>
    %261 = math.exp %260 : vector<2x32xf32>
    %cst_105 = arith.constant 1.000000e+00 : f32
    %262 = vector.broadcast %cst_105 : f32 to vector<2x32xf32>
    %263 = arith.addf %262, %261 : vector<2x32xf32>
    %264 = arith.divf %262, %263 : vector<2x32xf32>
    %c0_106 = arith.constant 0 : index
    %c0_107 = arith.constant 0 : index
    %265 = vector.load %arg5[%c0_106, %c0_107] : memref<2x32xf32, #tpu.memory_space<vmem>>, vector<2x32xf32>
    %266 = arith.mulf %256, %265 : vector<2x32xf32>
    %267 = arith.mulf %250, %258 : vector<2x32xf32>
    %268 = arith.addf %266, %267 : vector<2x32xf32>
    %269 = math.tanh %268 : vector<2x32xf32>
    %270 = arith.mulf %264, %269 : vector<2x32xf32>
    %c0_108 = arith.constant 0 : index
    %c0_109 = arith.constant 0 : index
    %271 = vector.load %arg5[%c0_108, %c0_109] : memref<2x32xf32, #tpu.memory_space<vmem>>, vector<2x32xf32>
    tpu.vector_store %arg5[%c0_108, %c0_109], %268 {strides = array<i32>} : memref<2x32xf32, #tpu.memory_space<vmem>>, vector<2x32xf32>,
    %c0_110 = arith.constant 0 : index
    %c0_111 = arith.constant 0 : index
    %272 = vector.load %arg4[%c0_110, %c0_111] : memref<2x32xf32, #tpu.memory_space<vmem>>, vector<2x32xf32>
    tpu.vector_store %arg4[%c0_110, %c0_111], %270 {strides = array<i32>} : memref<2x32xf32, #tpu.memory_space<vmem>>, vector<2x32xf32>,
    %273 = arith.index_cast %c6_i32 : i32 to index
    %c0_112 = arith.constant 0 : index
    %c0_113 = arith.constant 0 : index
    %274 = vector.load %arg3[%273, %c0_112, %c0_113] : memref<8x2x32xf32, #tpu.memory_space<vmem>>, vector<1x2x32xf32>
    %275 = vector.shape_cast %274 : vector<1x2x32xf32> to vector<2x32xf32>
    %276 = vector.shape_cast %270 : vector<2x32xf32> to vector<1x2x32xf32>
    tpu.vector_store %arg3[%273, %c0_112, %c0_113], %276 {strides = array<i32>} : memref<8x2x32xf32, #tpu.memory_space<vmem>>, vector<1x2x32xf32>,
    %c7_i32 = arith.constant 7 : i32
    %277 = arith.index_cast %c7_i32 : i32 to index
    %c0_114 = arith.constant 0 : index
    %c0_115 = arith.constant 0 : index
    %278 = vector.load %arg1[%277, %c0_114, %c0_115] : memref<8x2x128xf32, #tpu.memory_space<vmem>>, vector<1x2x128xf32>
    %279 = vector.shape_cast %278 : vector<1x2x128xf32> to vector<2x128xf32>
    %c0_116 = arith.constant 0 : index
    %c0_117 = arith.constant 0 : index
    %280 = vector.load %arg4[%c0_116, %c0_117] : memref<2x32xf32, #tpu.memory_space<vmem>>, vector<2x32xf32>
    %281 = arith.truncf %280 : vector<2x32xf32> to vector<2x32xbf16>
    %cst_118 = arith.constant dense<0.000000e+00> : vector<2x128xf32>
    %282 = tpu.matmul %281, %3, %cst_118 {dimension_numbers = #tpu.dot_dimension_numbers<[1], [0], [0], [1], [0, 0, 1, 1], [], []>} : vector<2x32xbf16>, vector<32x128xbf16>, vector<2x128xf32> -> vector<2x128xf32>
    %283 = arith.addf %279, %282 : vector<2x128xf32>
    %284 = vector.extract_strided_slice %283 {offsets = [0, 0], sizes = [2, 32], strides = [1, 1]} : vector<2x128xf32> to vector<2x32xf32>
    %285 = arith.negf %284 : vector<2x32xf32>
    %286 = math.exp %285 : vector<2x32xf32>
    %cst_119 = arith.constant 1.000000e+00 : f32
    %287 = vector.broadcast %cst_119 : f32 to vector<2x32xf32>
    %288 = arith.addf %287, %286 : vector<2x32xf32>
    %289 = arith.divf %287, %288 : vector<2x32xf32>
    %290 = vector.extract_strided_slice %283 {offsets = [0, 32], sizes = [2, 32], strides = [1, 1]} : vector<2x128xf32> to vector<2x32xf32>
    %291 = arith.negf %290 : vector<2x32xf32>
    %292 = math.exp %291 : vector<2x32xf32>
    %cst_120 = arith.constant 1.000000e+00 : f32
    %293 = vector.broadcast %cst_120 : f32 to vector<2x32xf32>
    %294 = arith.addf %293, %292 : vector<2x32xf32>
    %295 = arith.divf %293, %294 : vector<2x32xf32>
    %296 = vector.extract_strided_slice %283 {offsets = [0, 64], sizes = [2, 32], strides = [1, 1]} : vector<2x128xf32> to vector<2x32xf32>
    %297 = math.tanh %296 : vector<2x32xf32>
    %298 = vector.extract_strided_slice %283 {offsets = [0, 96], sizes = [2, 32], strides = [1, 1]} : vector<2x128xf32> to vector<2x32xf32>
    %299 = arith.negf %298 : vector<2x32xf32>
    %300 = math.exp %299 : vector<2x32xf32>
    %cst_121 = arith.constant 1.000000e+00 : f32
    %301 = vector.broadcast %cst_121 : f32 to vector<2x32xf32>
    %302 = arith.addf %301, %300 : vector<2x32xf32>
    %303 = arith.divf %301, %302 : vector<2x32xf32>
    %c0_122 = arith.constant 0 : index
    %c0_123 = arith.constant 0 : index
    %304 = vector.load %arg5[%c0_122, %c0_123] : memref<2x32xf32, #tpu.memory_space<vmem>>, vector<2x32xf32>
    %305 = arith.mulf %295, %304 : vector<2x32xf32>
    %306 = arith.mulf %289, %297 : vector<2x32xf32>
    %307 = arith.addf %305, %306 : vector<2x32xf32>
    %308 = math.tanh %307 : vector<2x32xf32>
    %309 = arith.mulf %303, %308 : vector<2x32xf32>
    %c0_124 = arith.constant 0 : index
    %c0_125 = arith.constant 0 : index
    %310 = vector.load %arg5[%c0_124, %c0_125] : memref<2x32xf32, #tpu.memory_space<vmem>>, vector<2x32xf32>
    tpu.vector_store %arg5[%c0_124, %c0_125], %307 {strides = array<i32>} : memref<2x32xf32, #tpu.memory_space<vmem>>, vector<2x32xf32>,
    %c0_126 = arith.constant 0 : index
    %c0_127 = arith.constant 0 : index
    %311 = vector.load %arg4[%c0_126, %c0_127] : memref<2x32xf32, #tpu.memory_space<vmem>>, vector<2x32xf32>
    tpu.vector_store %arg4[%c0_126, %c0_127], %309 {strides = array<i32>} : memref<2x32xf32, #tpu.memory_space<vmem>>, vector<2x32xf32>,
    %312 = arith.index_cast %c7_i32 : i32 to index
    %c0_128 = arith.constant 0 : index
    %c0_129 = arith.constant 0 : index
    %313 = vector.load %arg3[%312, %c0_128, %c0_129] : memref<8x2x32xf32, #tpu.memory_space<vmem>>, vector<1x2x32xf32>
    %314 = vector.shape_cast %313 : vector<1x2x32xf32> to vector<2x32xf32>
    %315 = vector.shape_cast %309 : vector<2x32xf32> to vector<1x2x32xf32>
    tpu.vector_store %arg3[%312, %c0_128, %c0_129], %315 {strides = array<i32>} : memref<8x2x32xf32, #tpu.memory_space<vmem>>, vector<1x2x32xf32>,
    %c8_i32 = arith.constant 8 : i32
    return
  }
  func.func @transform_0(%arg0: i32) -> (i32, i32, i32) {
    %c0_i32 = arith.constant 0 : i32
    %c0_i32_0 = arith.constant 0 : i32
    %c0_i32_1 = arith.constant 0 : i32
    return %arg0, %c0_i32, %c0_i32_0 : i32, i32, i32
  }
  func.func @transform_1(%arg0: i32) -> (i32, i32) {
    %c0_i32 = arith.constant 0 : i32
    %c0_i32_0 = arith.constant 0 : i32
    %c0_i32_1 = arith.constant 0 : i32
    return %c0_i32, %c0_i32_0 : i32, i32
  }
  func.func @transform_2(%arg0: i32) -> (i32, i32, i32) {
    %c0_i32 = arith.constant 0 : i32
    %c0_i32_0 = arith.constant 0 : i32
    %c0_i32_1 = arith.constant 0 : i32
    return %arg0, %c0_i32, %c0_i32_0 : i32, i32, i32
  }
}

module attributes {stable_mosaic.version = 11 : i64} {
  func.func @_linear_kernel(%arg0: i32, %arg1: i32, %arg2: memref<16x32xf32, #tpu.memory_space<vmem>>, %arg3: memref<32x128xbf16, #tpu.memory_space<vmem>>, %arg4: memref<1x128xf32, #tpu.memory_space<vmem>>, %arg5: memref<16x128xf32, #tpu.memory_space<vmem>>) attributes {dimension_semantics = [#tpu.dimension_semantics<parallel>, #tpu.dimension_semantics<parallel>], iteration_bounds = array<i64: 1, 1>, scalar_prefetch = 0 : i64, scratch_operands = 0 : i64, tpu.core_type = #tpu.core_type<tc>, window_params = [{transform_indices = @transform_0, window_bounds = array<i64: 16, 32>}, {transform_indices = @transform_1, window_bounds = array<i64: 32, 128>}, {transform_indices = @transform_2, window_bounds = array<i64: 1, 128>}, {transform_indices = @transform_3, window_bounds = array<i64: 16, 128>}]} {
    %c0 = arith.constant 0 : index
    %c0_0 = arith.constant 0 : index
    %0 = vector.load %arg2[%c0, %c0_0] : memref<16x32xf32, #tpu.memory_space<vmem>>, vector<16x32xf32>
    %1 = arith.truncf %0 : vector<16x32xf32> to vector<16x32xbf16>
    %c0_1 = arith.constant 0 : index
    %c0_2 = arith.constant 0 : index
    %2 = vector.load %arg3[%c0_1, %c0_2] : memref<32x128xbf16, #tpu.memory_space<vmem>>, vector<32x128xbf16>
    %cst = arith.constant dense<0.000000e+00> : vector<16x128xf32>
    %3 = tpu.matmul %1, %2, %cst {dimension_numbers = #tpu.dot_dimension_numbers<[1], [0], [0], [1], [0, 0, 1, 1], [], []>} : vector<16x32xbf16>, vector<32x128xbf16>, vector<16x128xf32> -> vector<16x128xf32>
    %c0_3 = arith.constant 0 : index
    %c0_4 = arith.constant 0 : index
    %4 = vector.load %arg4[%c0_3, %c0_4] : memref<1x128xf32, #tpu.memory_space<vmem>>, vector<1x128xf32>
    %5 = vector.broadcast %4 : vector<1x128xf32> to vector<16x128xf32>
    %6 = arith.addf %3, %5 : vector<16x128xf32>
    %c0_5 = arith.constant 0 : index
    %c0_6 = arith.constant 0 : index
    %7 = vector.load %arg5[%c0_5, %c0_6] : memref<16x128xf32, #tpu.memory_space<vmem>>, vector<16x128xf32>
    tpu.vector_store %arg5[%c0_5, %c0_6], %6 {strides = array<i32>} : memref<16x128xf32, #tpu.memory_space<vmem>>, vector<16x128xf32>,
    return
  }
  func.func @transform_0(%arg0: i32, %arg1: i32) -> (i32, i32) {
    %c0_i32 = arith.constant 0 : i32
    %c0_i32_0 = arith.constant 0 : i32
    return %arg0, %c0_i32 : i32, i32
  }
  func.func @transform_1(%arg0: i32, %arg1: i32) -> (i32, i32) {
    %c0_i32 = arith.constant 0 : i32
    %c0_i32_0 = arith.constant 0 : i32
    return %c0_i32, %arg1 : i32, i32
  }
  func.func @transform_2(%arg0: i32, %arg1: i32) -> (i32, i32) {
    %c0_i32 = arith.constant 0 : i32
    %c0_i32_0 = arith.constant 0 : i32
    return %c0_i32, %arg1 : i32, i32
  }
  func.func @transform_3(%arg0: i32, %arg1: i32) -> (i32, i32) {
    %c0_i32 = arith.constant 0 : i32
    return %arg0, %arg1 : i32, i32
  }
}

</mosaic_0001>

<bundles_post_ra>
// kernel: _lambda_.7
= control target key start
LH: loop header
LB: loop body
LE: loop exit
PB: predicated region body
PF: predicated region fallthrough
CT: control target
= control target key end

     0   :  { %v98_v0 = vmov 0.0   ;;  %vm99_vm0 = vmmov 0   ;;  %vm33_vm1 = vcmask 130048   ;;  %s138_s1 = inlined_call_operand.vmem [shape: bf16[16,128], index: 1, kind: input, shape index: {}]   ;;  %s139_s0 = inlined_call_operand.vmem [shape: f32[16,16], index: 0, kind: input, shape index: {}]   ;;  %s140_s2 = inlined_call_operand.vmem [shape: f32[1,128], index: 2, kind: input, shape index: {}]   ;;  %s141_s3 = inlined_call_operand.vmem [shape: f32[16,128], index: 3, kind: output, shape index: {}]  }
   0x1   :  { %89 = vmatprep.subr.bf16.mxu0 %v98_v0  ;;  %v97_v1 = vld [vmem:[%s138_s1] sm:$0xff]   ;;  %91 = vmatprep.mubr.msk.bf16.mxu0 %vm99_vm0, %v98_v0  ;;  %v16_v3 = vld [vmem:[%s139_s0 + $0x8] sm:$0xff] }
   0x2   :  { %v15_v2 = vld [vmem:[%s139_s0] sm:$0xff]  ;;  %90 = vmatpush3.bf16.msra.mxu0 %v97_v1 }
   0x3   :  { %v17_v4 = vpack.c.bf16 %v16_v3, %v15_v2  ;;  %v84_v5 = vld [vmem:[%s140_s2] ss:$0 sm:$0xff] }
   0x5   :  { %92 = vmatmul.mubr.msk.bf16.vlgmr.msra.gmra.mrb[0].mxu0 %vm33_vm1, %v17_v4 }
  0xd8   :  { %v71_v6 = vpop.f32.mrb[0].mxu0 }
  0xd9   :  { %v72_v7 = vadd.f32 %v84_v5, %v71_v6  ;;  %v93_v8 = vpop.f32.mrb[1].mxu0 }
  0xda   :  { %v74_v9 = vpop.f32.mrb[2].mxu0 }
  0xdb   :  { %78 = vst [vmem:[%s141_s3] sm:$0xff] %v72_v7  ;;  %v75_v10 = vadd.f32 %v84_v5, %v74_v9  ;;  %v94_v11 = vpop.f32.mrb[3].mxu0 }
  0xdd   :  { %79 = vst [vmem:[%s141_s3 + $0x8] sm:$0xff] %v75_v10 }

// kernel: _lambda_.6
= control target key start
LH: loop header
LB: loop body
LE: loop exit
PB: predicated region body
PF: predicated region fallthrough
CT: control target
= control target key end

     0   :  { %s1051_s18 = smov 0   ;;  %s1053_s19 = smov 0   ;;  %s1224_s0 = inlined_call_operand.vmem [shape: f32[2,256,32], index: 0, kind: input, shape index: {}]   ;;  %s1225_s1 = inlined_call_operand.vmem [shape: bf16[32,64], index: 1, kind: input, shape index: {}]   ;;  %s1226_s2 = inlined_call_operand.vmem [shape: f32[1,64], index: 2, kind: input, shape index: {}]   ;;  %s1227_s3 = inlined_call_operand.vmem [shape: bf16[64,16], index: 3, kind: input, shape index: {}]   ;;  %s1228_s4 = inlined_call_operand.vmem [shape: f32[1,16], index: 4, kind: input, shape index: {}]   ;;  %s1229_s5 = inlined_call_operand.vmem [shape: f32[2,1,16], index: 5, kind: output, shape index: {}]  }
   0x1   :  { %s1055_s20 = smov 0  }
   0x2 LB: > { %s27_s21 = sadd.s32 1, %s1012_s19  ;;  %p793_p0 = scmp.ge.s32.totalorder %s1016_s20, 1  ;;  %s1016_s20 = sphi %s1055_s20, %s15_s20   ;;  %s1012_s19 = sphi %s1053_s19, %s1231_s19   ;;  %s1008_s18 = sphi %s1051_s18, %s1230_s18  }
   0x3   : > { %p29_p1 = scmp.ge.s32.totalorder %s27_s21, 2  ;;  %p206_p2 = scmp.lt.s32.totalorder %s1016_s20, 3 }
   0x5   : > { %s1233_s21 = smov (%p29_p1, %s27_s21), 0  ;;  %p207_p3 = pnand %p793_p0, %p206_p2 }
   0x6   : > { %v988_v0 = vld [vmem:[%s1225_s1] sm:$0xff] (!%p207_p3)   ;;  %p237_p4 = scmp.lt.s32.totalorder (!%p207_p3), %s1008_s18, 1  ;;  %v989_v1 = vld [vmem:[%s1225_s1 + $0x8] sm:$0xff] (!%p207_p3)   ;;  %vm327_vm0 = vcmask (!%p207_p3), 261120   ;;  %v1018_v50 = vmov (!%p207_p3), 1.0   ;;  %vm254_vm1 = vcmask (!%p207_p3), 516096  }
   0x7   : > { %210 = sbr.rel (%p207_p3) target bundleno = 750 (0x2ee), region = 40  ;;  %881 = vmatprep.subr.bf16.mxu0 (!%p207_p3), %v988_v0  ;;  %634 = vmatprep.mubr.f32.mxu1 (!%p207_p3), %v1018_v50  ;;  %v1135_v51 = vld [vmem:[%s1226_s2] ss:$0 sm:$0xff] (!%p207_p3)  ;;  %vm1020_vm2 = vmmov (!%p207_p3), 0   ;;  %vm682_vm3 = vcmask (!%p207_p3), 523264   ;;  %vm726_vm4 = vcmask (!%p207_p3), 122880  }
   0x8   : > { %882 = vmatpush3.bf16.msra.mxu0 (!%p207_p3), %v988_v0 }
   0x9   : > { %883 = vmatprep.subr.bf16.mxu0 (!%p207_p3), %v989_v1 }
   0xc   : > { %884 = vmatpush3.bf16.msra.mxu0 (!%p207_p3), %v989_v1 }
   0xe   : > { %s1235_s18 = smov (!%p237_p4, %s1008_s18), 1 }
   0xf   : > { %s822_s26 = sshll.u32 %s1235_s18, 8  ;;  %s248_s23 = scalar_lea.vmem %s1229_s5, %s1235_s18 }
  0x10   : > { %s1081_s29 = scalar_lea.vmem %s1224_s0, %s822_s26 }
  0x11   : > { %v256_v2 = vld [vmem:[%s1081_s29] sm:$0xff]  ;;  %v257_v3 = vld [vmem:[%s1081_s29 + $0x8] sm:$0xff]  ;;  %v258_v4 = vld [vmem:[%s1081_s29 + $0x10] sm:$0xff] }
  0x12   : > { %v288_v5 = vpack.c.bf16 %v257_v3, %v256_v2  ;;  %v259_v6 = vld [vmem:[%s1081_s29 + $0x18] sm:$0xff]  ;;  %v260_v7 = vld [vmem:[%s1081_s29 + $0x20] sm:$0xff]  ;;  %v261_v8 = vld [vmem:[%s1081_s29 + $0x28] sm:$0xff] }
  0x13   : > { %v289_v9 = vpack.c.bf16 %v259_v6, %v258_v4  ;;  %v290_v10 = vpack.c.bf16 %v261_v8, %v260_v7  ;;  %v262_v11 = vld [vmem:[%s1081_s29 + $0x30] sm:$0xff]  ;;  %v263_v12 = vld [vmem:[%s1081_s29 + $0x38] sm:$0xff]  ;;  %v264_v13 = vld [vmem:[%s1081_s29 + $0x40] sm:$0xff] }
  0x14   : > { %885 = vmatprep.mubr.msk.bf16.mxu0 %vm327_vm0, %v288_v5  ;;  %v265_v14 = vld [vmem:[%s1081_s29 + $0x48] sm:$0xff]  ;;  %v291_v15 = vpack.c.bf16 %v263_v12, %v262_v11  ;;  %v266_v17 = vld [vmem:[%s1081_s29 + $0x50] sm:$0xff]  ;;  %v267_v18 = vld [vmem:[%s1081_s29 + $0x58] sm:$0xff] }
  0x15   : > { %886 = vmatmul.mubr.msk.bf16.vlgmr.msra.gmra.mrb[0].mxu0 %vm327_vm0, %v289_v9  ;;  %v292_v16 = vpack.c.bf16 %v265_v14, %v264_v13  ;;  %v268_v19 = vld [vmem:[%s1081_s29 + $0x60] sm:$0xff]  ;;  %v269_v20 = vld [vmem:[%s1081_s29 + $0x68] sm:$0xff]  ;;  %v293_v21 = vpack.c.bf16 %v267_v18, %v266_v17  ;;  %v270_v23 = vld [vmem:[%s1081_s29 + $0x70] sm:$0xff] }
  0x16   : > { %889 = vmatprep.mubr.msk.bf16.mxu0 %vm327_vm0, %v290_v10  ;;  %v294_v22 = vpack.c.bf16 %v269_v20, %v268_v19  ;;  %v271_v24 = vld [vmem:[%s1081_s29 + $0x78] sm:$0xff]  ;;  %v272_v25 = vld [vmem:[%s1081_s29 + $0x80] sm:$0xff]  ;;  %v273_v26 = vld [vmem:[%s1081_s29 + $0x88] sm:$0xff] }
  0x17   : > { %v295_v27 = vpack.c.bf16 %v271_v24, %v270_v23  ;;  %v296_v28 = vpack.c.bf16 %v273_v26, %v272_v25  ;;  %v274_v29 = vld [vmem:[%s1081_s29 + $0x90] sm:$0xff]  ;;  %v275_v30 = vld [vmem:[%s1081_s29 + $0x98] sm:$0xff]  ;;  %v276_v31 = vld [vmem:[%s1081_s29 + $0xa0] sm:$0xff] }
  0x18   : > { %v277_v32 = vld [vmem:[%s1081_s29 + $0xa8] sm:$0xff]  ;;  %v297_v33 = vpack.c.bf16 %v275_v30, %v274_v29  ;;  %v278_v35 = vld [vmem:[%s1081_s29 + $0xb0] sm:$0xff]  ;;  %v279_v36 = vld [vmem:[%s1081_s29 + $0xb8] sm:$0xff] }
  0x19   : > { %v298_v34 = vpack.c.bf16 %v277_v32, %v276_v31  ;;  %v280_v37 = vld [vmem:[%s1081_s29 + $0xc0] sm:$0xff]  ;;  %v281_v38 = vld [vmem:[%s1081_s29 + $0xc8] sm:$0xff]  ;;  %v299_v39 = vpack.c.bf16 %v279_v36, %v278_v35  ;;  %v282_v41 = vld [vmem:[%s1081_s29 + $0xd0] sm:$0xff] }
  0x1a   : > { %v300_v40 = vpack.c.bf16 %v281_v38, %v280_v37  ;;  %v283_v42 = vld [vmem:[%s1081_s29 + $0xd8] sm:$0xff]  ;;  %v284_v43 = vld [vmem:[%s1081_s29 + $0xe0] sm:$0xff]  ;;  %v285_v44 = vld [vmem:[%s1081_s29 + $0xe8] sm:$0xff] }
  0x1b   : > { %v301_v45 = vpack.c.bf16 %v283_v42, %v282_v41  ;;  %v302_v46 = vpack.c.bf16 %v285_v44, %v284_v43  ;;  %v286_v47 = vld [vmem:[%s1081_s29 + $0xf0] sm:$0xff]  ;;  %v287_v48 = vld [vmem:[%s1081_s29 + $0xf8] sm:$0xff] }
  0x1c   : > { %v303_v49 = vpack.c.bf16 %v287_v48, %v286_v47 }
  0x1d   : > { %890 = vmatmul.mubr.msk.bf16.gmra.mrb[4].mxu0 %vm327_vm0, %v291_v15 }
  0x1e   : > { %893 = vmatprep.mubr.msk.bf16.mxu0 %vm327_vm0, %v292_v16 }
  0x25   : > { %894 = vmatmul.mubr.msk.bf16.gmra.mrb[8].mxu0 %vm327_vm0, %v293_v21 }
  0x26   : > { %897 = vmatprep.mubr.msk.bf16.mxu0 %vm327_vm0, %v294_v22 }
  0x2d   : > { %898 = vmatmul.mubr.msk.bf16.gmra.mrb[12].mxu0 %vm327_vm0, %v295_v27 }
  0x2e   : > { %901 = vmatprep.mubr.msk.bf16.mxu0 %vm327_vm0, %v296_v28 }
  0x35   : > { %902 = vmatmul.mubr.msk.bf16.gmra.mrb[16].mxu0 %vm327_vm0, %v297_v33 }
  0x36   : > { %905 = vmatprep.mubr.msk.bf16.mxu0 %vm327_vm0, %v298_v34 }
  0x3d   : > { %906 = vmatmul.mubr.msk.bf16.gmra.mrb[20].mxu0 %vm327_vm0, %v299_v39 }
  0x3e   : > { %909 = vmatprep.mubr.msk.bf16.mxu0 %vm327_vm0, %v300_v40 }
  0x45   : > { %910 = vmatmul.mubr.msk.bf16.gmra.mrb[24].mxu0 %vm327_vm0, %v301_v45 }
  0x46   : > { %913 = vmatprep.mubr.msk.bf16.mxu0 %vm327_vm0, %v302_v46 }
  0x4d   : > { %914 = vmatmul.mubr.msk.bf16.gmra.mrb[28].mxu0 %vm327_vm0, %v303_v49 }
  0xe8   : > { %v887_v52 = vpop.f32.mrb[0].mxu0 }
  0xe9   : > { %v419_v53 = vadd.f32 %v887_v52, %v1135_v51  ;;  %v410_v54 = vpop.f32.mrb[1].mxu0 }
  0xea   : > { %v411_v55 = vadd.f32 %v1135_v51, %v410_v54  ;;  %v888_v56 = vpop.f32.mrb[2].mxu0 }
  0xeb   : > { %v422_v57 = vadd.f32 %v888_v56, %v1135_v51  ;;  %v413_v58 = vpop.f32.mrb[3].mxu0  ;;  %v539_v60 = vmax.f32 %v419_v53, 0.0 }
  0xec   : > { %v414_v59 = vadd.f32 %v1135_v51, %v413_v58  ;;  %v537_v62 = vmax.f32 %v411_v55, 0.0 }
  0xed   : > { %v540_v61 = vmax.f32 %v422_v57, 0.0 }
  0xee   : > { %v538_v63 = vmax.f32 %v414_v59, 0.0 }
  0xef   : > { %v1141_v0 = vpack.c.bf16 %v540_v61, %v539_v60 }
  0xf0   : > { %v891_v1 = vpop.f32.mrb[4].mxu0  ;;  %v1143_v2 = vpack.c.bf16 %v538_v63, %v537_v62 }
  0xf1   : > { %v435_v3 = vadd.f32 %v891_v1, %v1135_v51  ;;  %v426_v4 = vpop.f32.mrb[5].mxu0 }
  0xf2   : > { %v427_v5 = vadd.f32 %v1135_v51, %v426_v4  ;;  %v892_v6 = vpop.f32.mrb[6].mxu0 }
  0xf3   : > { %v438_v7 = vadd.f32 %v892_v6, %v1135_v51  ;;  %v429_v8 = vpop.f32.mrb[7].mxu0  ;;  %v543_v10 = vmax.f32 %v435_v3, 0.0 }
  0xf4   : > { %v430_v9 = vadd.f32 %v1135_v51, %v429_v8  ;;  %v541_v12 = vmax.f32 %v427_v5, 0.0 }
  0xf5   : > { %v544_v11 = vmax.f32 %v438_v7, 0.0 }
  0xf6   : > { %v542_v13 = vmax.f32 %v430_v9, 0.0 }
  0xf7   : > { %v1149_v14 = vpack.c.bf16 %v544_v11, %v543_v10 }
  0xf8   : > { %v1151_v15 = vpack.c.bf16 %v542_v13, %v541_v12  ;;  %v895_v16 = vpop.f32.mrb[8].mxu0 }
  0xf9   : > { %v451_v17 = vadd.f32 %v895_v16, %v1135_v51  ;;  %v442_v18 = vpop.f32.mrb[9].mxu0 }
  0xfa   : > { %v443_v19 = vadd.f32 %v1135_v51, %v442_v18  ;;  %v896_v20 = vpop.f32.mrb[10].mxu0 }
  0xfb   : > { %v454_v21 = vadd.f32 %v896_v20, %v1135_v51  ;;  %v445_v22 = vpop.f32.mrb[11].mxu0  ;;  %v547_v24 = vmax.f32 %v451_v17, 0.0 }
  0xfc   : > { %v446_v23 = vadd.f32 %v1135_v51, %v445_v22  ;;  %v545_v26 = vmax.f32 %v443_v19, 0.0 }
  0xfd   : > { %v548_v25 = vmax.f32 %v454_v21, 0.0 }
  0xfe   : > { %v546_v27 = vmax.f32 %v446_v23, 0.0 }
  0xff   : > { %v1157_v28 = vpack.c.bf16 %v548_v25, %v547_v24 }
 0x100   : > { %v1159_v29 = vpack.c.bf16 %v546_v27, %v545_v26  ;;  %v899_v30 = vpop.f32.mrb[12].mxu0 }
 0x101   : > { %v467_v31 = vadd.f32 %v899_v30, %v1135_v51  ;;  %v458_v32 = vpop.f32.mrb[13].mxu0 }
 0x102   : > { %v459_v33 = vadd.f32 %v1135_v51, %v458_v32  ;;  %v900_v34 = vpop.f32.mrb[14].mxu0 }
 0x103   : > { %v470_v35 = vadd.f32 %v900_v34, %v1135_v51  ;;  %v461_v36 = vpop.f32.mrb[15].mxu0  ;;  %v551_v38 = vmax.f32 %v467_v31, 0.0 }
 0x104   : > { %v462_v37 = vadd.f32 %v1135_v51, %v461_v36  ;;  %v549_v40 = vmax.f32 %v459_v33, 0.0 }
 0x105   : > { %v552_v39 = vmax.f32 %v470_v35, 0.0 }
 0x106   : > { %v550_v41 = vmax.f32 %v462_v37, 0.0 }
 0x107   : > { %v1165_v42 = vpack.c.bf16 %v552_v39, %v551_v38 }
 0x108   : > { %v1167_v43 = vpack.c.bf16 %v550_v41, %v549_v40  ;;  %v903_v44 = vpop.f32.mrb[16].mxu0  ;;  %v993_v40 = vld [vmem:[%s1227_s3 + $0x18] sm:$0xff]  }
 0x109   : > { %v483_v45 = vadd.f32 %v903_v44, %v1135_v51  ;;  %v474_v46 = vpop.f32.mrb[17].mxu0 }
 0x10a   : > { %v475_v47 = vadd.f32 %v1135_v51, %v474_v46  ;;  %v904_v48 = vpop.f32.mrb[18].mxu0 }
 0x10b   : > { %v486_v49 = vadd.f32 %v904_v48, %v1135_v51  ;;  %v477_v52 = vpop.f32.mrb[19].mxu0  ;;  %v555_v54 = vmax.f32 %v483_v45, 0.0 }
 0x10c   : > { %v478_v53 = vadd.f32 %v1135_v51, %v477_v52  ;;  %v553_v56 = vmax.f32 %v475_v47, 0.0 }
 0x10d   : > { %v556_v55 = vmax.f32 %v486_v49, 0.0  ;;  %v657_v49 = vld [vmem:[%s1228_s4] sm:$0x1] }
 0x10e   : > { %v554_v57 = vmax.f32 %v478_v53, 0.0 }
 0x10f   : > { %v933_v58 = vpack.c.bf16 %v556_v55, %v555_v54 }
 0x110   : > { %v907_v59 = vpop.f32.mrb[20].mxu0  ;;  %v929_v60 = vpack.c.bf16 %v554_v57, %v553_v56 }
 0x111   : > { %v499_v61 = vadd.f32 %v907_v59, %v1135_v51  ;;  %v490_v62 = vpop.f32.mrb[21].mxu0 }
 0x112   : > { %v491_v63 = vadd.f32 %v1135_v51, %v490_v62  ;;  %v908_v1 = vpop.f32.mrb[22].mxu0  ;;  %930 = vmatprep.subr.bf16.mxu1 %v929_v60 }
 0x113   : > { %v502_v3 = vadd.f32 %v908_v1, %v1135_v51  ;;  %v493_v4 = vpop.f32.mrb[23].mxu0  ;;  %932 = vmatpush3.bf16.msra.mxu1 %v1143_v2  ;;  %v559_v6 = vmax.f32 %v499_v61, 0.0 }
 0x114   : > { %v494_v5 = vadd.f32 %v1135_v51, %v493_v4  ;;  %934 = vmatprep.subr.bf16.mxu1 %v933_v58  ;;  %v557_v8 = vmax.f32 %v491_v63, 0.0 }
 0x115   : > { %v560_v7 = vmax.f32 %v502_v3, 0.0 }
 0x116   : > { %v558_v9 = vmax.f32 %v494_v5, 0.0 }
 0x117   : > { %v941_v10 = vpack.c.bf16 %v560_v7, %v559_v6  ;;  %936 = vmatpush3.bf16.msra.mxu1 %v1141_v0 }
 0x118   : > { %v937_v11 = vpack.c.bf16 %v558_v9, %v557_v8  ;;  %v911_v12 = vpop.f32.mrb[24].mxu0 }
 0x119   : > { %v515_v13 = vadd.f32 %v911_v12, %v1135_v51  ;;  %v506_v16 = vpop.f32.mrb[25].mxu0 }
 0x11a   : > { %v507_v17 = vadd.f32 %v1135_v51, %v506_v16  ;;  %v912_v18 = vpop.f32.mrb[26].mxu0  ;;  %938 = vmatprep.subr.bf16.mxu1 %v937_v11 }
 0x11b   : > { %v518_v2 = vadd.f32 %v912_v18, %v1135_v51  ;;  %v509_v19 = vpop.f32.mrb[27].mxu0  ;;  %940 = vmatpush3.bf16.msra.mxu1 %v1151_v15  ;;  %v563_v21 = vmax.f32 %v515_v13, 0.0 }
 0x11c   : > { %v510_v20 = vadd.f32 %v1135_v51, %v509_v19  ;;  %942 = vmatprep.subr.bf16.mxu1 %v941_v10  ;;  %v561_v0 = vmax.f32 %v507_v17, 0.0 }
 0x11d   : > { %v564_v22 = vmax.f32 %v518_v2, 0.0 }
 0x11e   : > { %v562_v23 = vmax.f32 %v510_v20, 0.0 }
 0x11f   : > { %v949_v24 = vpack.c.bf16 %v564_v22, %v563_v21  ;;  %944 = vmatpush3.bf16.msra.mxu1 %v1149_v14 }
 0x120   : > { %v945_v25 = vpack.c.bf16 %v562_v23, %v561_v0  ;;  %v915_v26 = vpop.f32.mrb[28].mxu0 }
 0x121   : > { %v531_v27 = vadd.f32 %v915_v26, %v1135_v51  ;;  %v522_v30 = vpop.f32.mrb[29].mxu0 }
 0x122   : > { %v523_v31 = vadd.f32 %v1135_v51, %v522_v30  ;;  %v916_v32 = vpop.f32.mrb[30].mxu0  ;;  %946 = vmatprep.subr.bf16.mxu1 %v945_v25 }
 0x123   : > { %v534_v15 = vadd.f32 %v916_v32, %v1135_v51  ;;  %v525_v33 = vpop.f32.mrb[31].mxu0  ;;  %948 = vmatpush3.bf16.msra.mxu1 %v1159_v29  ;;  %v567_v35 = vmax.f32 %v531_v27, 0.0  ;;  %v1019_v29 = vmov 0.0  }
 0x124   : > { %v526_v34 = vadd.f32 %v1135_v51, %v525_v33  ;;  %950 = vmatprep.subr.bf16.mxu1 %v949_v24  ;;  %v565_v14 = vmax.f32 %v523_v31, 0.0  ;;  %255 = vst.msk [vmem:[#allocation2] sm:$0x1] %vm254_vm1, %v1019_v29  ;;  %v990_v51 = vld [vmem:[%s1227_s3] sm:$0xff]  }
 0x125   : > { %v568_v36 = vmax.f32 %v534_v15, 0.0 }
 0x126   : > { %v566_v37 = vmax.f32 %v526_v34, 0.0 }
 0x127   : > { %v957_v38 = vpack.c.bf16 %v568_v36, %v567_v35  ;;  %952 = vmatpush3.bf16.msra.mxu1 %v1157_v28  ;;  %v991_v28 = vld [vmem:[%s1227_s3 + $0x8] sm:$0xff]  }
 0x128   : > { %v953_v39 = vpack.c.bf16 %v566_v37, %v565_v14 }
 0x12a   : > { %954 = vmatprep.subr.bf16.mxu1 %v953_v39 }
 0x12b   : > { %956 = vmatpush3.bf16.msra.mxu1 %v1167_v43 }
 0x12c   : > { %958 = vmatprep.subr.bf16.mxu1 %v957_v38 }
 0x12f   : > { %960 = vmatpush3.bf16.msra.mxu1 %v1165_v42  ;;  %v569_v42 = vld [vmem:[#allocation2] sm:$0x1] }
 0x130   : > { %917 = vmatprep.subr.bf16.mxu1 %v1019_v29 }
 0x132   : > { %635 = vmatmul.mubr.f32.vlgmr.msra.gmra.mrb[0].mxu1 %v1018_v50  ;;  %v992_v50 = vld [vmem:[%s1227_s3 + $0x10] sm:$0xff]  }
 0x133   : > { %918 = vmatpush3.bf16.msra.mxu1 %v990_v51  ;;  %925 = vmatprep.mubr.msk.bf16.mxu1 %vm1020_vm2, %v1019_v29 }
 0x134   : > { %919 = vmatprep.subr.bf16.mxu1 %v1019_v29 }
 0x137   : > { %920 = vmatpush3.bf16.msra.mxu1 %v991_v28 }
 0x138   : > { %921 = vmatprep.subr.bf16.mxu1 %v1019_v29 }
 0x13b   : > { %922 = vmatpush3.bf16.msra.mxu1 %v992_v50 }
 0x13c   : > { %923 = vmatprep.subr.bf16.mxu1 %v1019_v29 }
 0x13f   : > { %924 = vmatpush3.bf16.msra.mxu1 %v993_v40 }
 0x205   : > { %v873_v41 = vpop.f32.mrb[0].mxu1 }
 0x206   : > { %v874_v43 = vpop.f32.mrb[1].mxu1 }
 0x207   : > { %v875_v44 = vadd.f32 %v874_v43, %v873_v41 }
 0x209   : > { %v640_v45 = vadd.f32 %v875_v44, %v569_v42 }
 0x20b   : > { %642 = vst.msk [vmem:[#allocation2] sm:$0x1] %vm254_vm1, %v640_v45 }
 0x212   : > { %v646_v46 = vld [vmem:[#allocation2] sm:$0x1] }
 0x213   : > { %v647_v47 = vmul.f32 0.00390625, %v646_v46 }
 0x215   : > { %v648_v48 = vpack.c.bf16 %v647_v47, %v647_v47 }
 0x217   : > { %926 = vmatmul.mubr.msk.bf16.vlgmr.msra.gmra.mrb[4].mxu1 %vm682_vm3, %v648_v48 }
 0x2ea   : > { %v720_v52 = vpop.f32.mrb[4].mxu1 }
 0x2eb   : > { %v721_v53 = vadd.f32 %v720_v52, %v657_v49  ;;  %v927_v54 = vpop.f32.mrb[5].mxu1 }
 0x2ec   : > { %v723_v55 = vpop.f32.mrb[6].mxu1 }
 0x2ed   : > { %727 = vst.msk [vmem:[%s248_s23] sm:$0x1] %vm726_vm4, %v721_v53  ;;  %v928_v56 = vpop.f32.mrb[7].mxu1 }
 0x2ee PF: > { %s15_s20 = sadd.s32 1, %s1016_s20   ;;  %s1230_s18 = smov %s1012_s19 }
 0x2ef   : > { %p12_p5 = scmp.ge.s32.totalorder %s15_s20, 4   ;;  %s1231_s19 = smov %s1233_s21 }
 0x2f1   :  { %14 = sbr.rel (!%p12_p5) target bundleno = 2 (0x2), region = 78 }

// kernel: _lambda_.9
= control target key start
LH: loop header
LB: loop body
LE: loop exit
PB: predicated region body
PF: predicated region fallthrough
CT: control target
= control target key end

     0   :  { %v111_v0 = vmov 0.0   ;;  %vm112_vm0 = vmmov 0   ;;  %vm41_vm1 = vcmask 261120   ;;  %s154_s1 = inlined_call_operand.vmem [shape: bf16[32,128], index: 1, kind: input, shape index: {}]   ;;  %s155_s0 = inlined_call_operand.vmem [shape: f32[16,32], index: 0, kind: input, shape index: {}]   ;;  %s156_s2 = inlined_call_operand.vmem [shape: f32[1,128], index: 2, kind: input, shape index: {}]   ;;  %s157_s3 = inlined_call_operand.vmem [shape: f32[16,128], index: 3, kind: output, shape index: {}]  }
   0x1   :  { %99 = vmatprep.subr.bf16.mxu0 %v111_v0  ;;  %v109_v1 = vld [vmem:[%s154_s1] sm:$0xff]   ;;  %103 = vmatprep.mubr.msk.bf16.mxu0 %vm112_vm0, %v111_v0  ;;  %v110_v2 = vld [vmem:[%s154_s1 + $0x8] sm:$0xff]  }
   0x2   :  { %100 = vmatpush3.bf16.msra.mxu0 %v109_v1  ;;  %v15_v3 = vld [vmem:[%s155_s0] sm:$0xff]  ;;  %v16_v4 = vld [vmem:[%s155_s0 + $0x8] sm:$0xff] }
   0x3   :  { %101 = vmatprep.subr.bf16.mxu0 %v111_v0  ;;  %v17_v5 = vpack.c.bf16 %v16_v4, %v15_v3  ;;  %v92_v6 = vld [vmem:[%s156_s2] ss:$0 sm:$0xff] }
   0x6   :  { %102 = vmatpush3.bf16.msra.mxu0 %v110_v2 }
   0x9   :  { %104 = vmatmul.mubr.msk.bf16.vlgmr.msra.gmra.mrb[0].mxu0 %vm41_vm1, %v17_v5 }
  0xdc   :  { %v79_v7 = vpop.f32.mrb[0].mxu0 }
  0xdd   :  { %v80_v8 = vadd.f32 %v92_v6, %v79_v7  ;;  %v105_v9 = vpop.f32.mrb[1].mxu0 }
  0xde   :  { %v82_v10 = vpop.f32.mrb[2].mxu0 }
  0xdf   :  { %86 = vst [vmem:[%s157_s3] sm:$0xff] %v80_v8  ;;  %v83_v11 = vadd.f32 %v92_v6, %v82_v10  ;;  %v106_v12 = vpop.f32.mrb[3].mxu0 }
  0xe1   :  { %87 = vst [vmem:[%s157_s3 + $0x8] sm:$0xff] %v83_v11 }

// kernel: _lambda_.8
= control target key start
LH: loop header
LB: loop body
LE: loop exit
PB: predicated region body
PF: predicated region fallthrough
CT: control target
= control target key end

     0   :  { %vm22_vm0 = vcmask 254976   ;;  %v1021_v0 = vmov 0.0   ;;  %vm1022_vm1 = vmmov 0   ;;  %vm39_vm2 = vcmask 130048   ;;  %s1024_s23 = smov 32   ;;  %s1025_s24 = smov 96   ;;  %s1260_s3 = inlined_call_operand.vmem [shape: bf16[32,128], index: 3, kind: input, shape index: {}]   ;;  %s1261_s1 = inlined_call_operand.vmem [shape: bf16[16,128], index: 1, kind: input, shape index: {}]   ;;  %s1262_s0 = inlined_call_operand.vmem [shape: f32[2,16], index: 0, kind: input, shape index: {}]   ;;  %s1263_s2 = inlined_call_operand.vmem [shape: f32[8,2,128], index: 2, kind: input, shape index: {}]   ;;  %s1264_s4 = inlined_call_operand.vmem [shape: f32[8,2,32], index: 4, kind: output, shape index: {}]  }
   0x1   :  { %885 = vmatprep.subr.bf16.mxu1 %v1021_v0  ;;  %v1055_v1 = vld [vmem:[%s1260_s3] sm:$0xff]   ;;  %879 = vmatprep.subr.bf16.mxu0 %v1021_v0  ;;  %23 = vst.msk [vmem:[#allocation2] sm:$0x3] %vm22_vm0, %v1021_v0  ;;  %24 = vst.msk [vmem:[#allocation3] sm:$0x3] %vm22_vm0, %v1021_v0  ;;  %v1073_v3 = vld [vmem:[%s1260_s3 + $0x8] sm:$0xff]  }
   0x2   :  { %v955_v2 = vld [vmem:[%s1261_s1] sm:$0xff]   ;;  %881 = vmatprep.mubr.msk.bf16.mxu0 %vm1022_vm1, %v1021_v0  ;;  %889 = vmatprep.mubr.msk.bf16.mxu1 %vm1022_vm1, %v1021_v0  ;;  %vm98_vm3 = vcmask 261120   ;;  %s1023_s3 = smov 64  }
   0x3   :  { %886 = vmatpush3.bf16.msra.mxu1 %v1055_v1  ;;  %880 = vmatpush3.bf16.msra.mxu0 %v955_v2  ;;  %v29_v4 = vld [vmem:[%s1262_s0] sm:$0x3]  ;;  %v825_v39 = vld [vmem:[%s1263_s2 + $0x2] sm:$0x3] }
   0x4   :  { %887 = vmatprep.subr.bf16.mxu1 %v1021_v0  ;;  %v30_v5 = vpack.c.bf16 %v29_v4, %v29_v4  ;;  %893 = vmatprep.subr.bf16.mxu0 %v1021_v0  ;;  %v83_v10 = vld [vmem:[%s1263_s2] sm:$0x3]  ;;  %v829_v4 = vld [vmem:[%s1263_s2 + $0x4] sm:$0x3] }
   0x6   :  { %882 = vmatmul.mubr.msk.bf16.vlgmr.msra.gmra.mrb[0].mxu0 %vm39_vm2, %v30_v5 }
   0x7   :  { %888 = vmatpush3.bf16.msra.mxu1 %v1073_v3  ;;  %894 = vmatpush3.bf16.msra.mxu0 %v1055_v1 }
   0x8   :  { %v84_v6 = vld [vmem:[#allocation2] sm:$0x3]  ;;  %897 = vmatprep.mubr.msk.bf16.mxu0 %vm1022_vm1, %v1021_v0  ;;  %895 = vmatprep.subr.bf16.mxu0 %v1021_v0  ;;  %v151_v20 = vld [vmem:[#allocation3] sm:$0x3] }
   0x9   :  { %v85_v7 = vpack.c.bf16 %v84_v6, %v84_v6  ;;  %901 = vmatprep.subr.bf16.mxu1 %v1021_v0 }
   0xb   :  { %890 = vmatmul.mubr.msk.bf16.vlgmr.msra.gmra.mrb[0].mxu1 %vm98_vm3, %v85_v7  ;;  %896 = vmatpush3.bf16.msra.mxu0 %v1073_v3 }
   0xc   :  { %902 = vmatpush3.bf16.msra.mxu1 %v1055_v1  ;;  %905 = vmatprep.mubr.msk.bf16.mxu1 %vm1022_vm1, %v1021_v0 }
   0xd   :  { %903 = vmatprep.subr.bf16.mxu1 %v1021_v0  ;;  %909 = vmatprep.subr.bf16.mxu0 %v1021_v0 }
  0x10   :  { %904 = vmatpush3.bf16.msra.mxu1 %v1073_v3 }
  0x11   :  { %917 = vmatprep.subr.bf16.mxu1 %v1021_v0 }
  0xd9   :  { %v1095_v8 = vpop.f32.mrb[0].mxu0 }
  0xda   :  { %v883_v9 = vpop.f32.mrb[1].mxu0 }
  0xdb   :  { %v80_v11 = vpop.f32.mrb[2].mxu0 }
  0xdc   :  { %v884_v12 = vpop.f32.mrb[3].mxu0 }
  0xde   :  { %v136_v13 = vpop.f32.mrb[0].mxu1 }
  0xdf   :  { %v142_v14 = vadd.f32 %v136_v13, %v83_v10  ;;  %v891_v15 = vpop.f32.mrb[1].mxu1 }
  0xe0   :  { %v139_v16 = vpop.f32.mrb[2].mxu1 }
  0xe1   :  { %v143_v17 = vadd.f32 %v142_v14, %v1095_v8  ;;  %v892_v18 = vpop.f32.mrb[3].mxu1 }
  0xe3   :  { %957 = vtanh.f32 %v143_v17  ;;  %v824_v21 = vmul.f32 -1.442695, %v143_v17 }
  0xe5   :  { %959 = vpow2.f32 %v824_v21 }
  0xed   :  { %v958_v19 = vpop.eup %957 }
  0xee   :  { %158 = vrot.lane.b32.xlu0 %v958_v19, %s1023_s3 }
  0xef   :  { %v960_v22 = vpop.eup %959 }
  0xf0   :  { %v147_v23 = vadd.f32 1.0, %v960_v22 }
  0xf2   :  { %153 = vrot.lane.b32.xlu0 %v151_v20, %s1024_s23  ;;  %961 = vrcp.f32 %v147_v23 }
  0xfc   :  { %v962_v24 = vpop.eup %961 }
 0x160   :  { %v159_v25 = vpop.permute.xlu0 %158 }
 0x161   :  { %v161_v26 = vmul.f32 %v962_v24, %v159_v25 }
 0x163   :  { %163 = vrot.lane.b32.xlu1 %v161_v26, %s1024_s23 }
 0x164   :  { %v154_v27 = vpop.permute.xlu0 %153 }
 0x165   :  { %v156_v28 = vmul.f32 %v962_v24, %v154_v27 }
 0x1d5   :  { %v164_v29 = vpop.permute.xlu1 %163 }
 0x1d6   :  { %v166_v30 = vadd.f32 %v164_v29, %v156_v28 }
 0x1d8   :  { %963 = vtanh.f32 %v166_v30 }
 0x1e2   :  { %v964_v31 = vpop.eup %963 }
 0x1e3   :  { %169 = vrot.lane.b32.xlu1 %v964_v31, %s1023_s3  ;;  %v833_v31 = vld [vmem:[%s1263_s2 + $0x6] sm:$0x3] }
 0x1e7   :  { %174 = vrot.lane.b32.xlu1 %v166_v30, %s1025_s24 }
 0x255   :  { %v170_v32 = vpop.permute.xlu1 %169 }
 0x256   :  { %v172_v33 = vmul.f32 %v962_v24, %v170_v32 }
 0x258   :  { %180 = vrot.lane.b32.xlu0 %v172_v33, %s1024_s23 }
 0x259   :  { %v175_v34 = vpop.permute.xlu1 %174 }
 0x25a   :  { %178 = vst.msk [vmem:[#allocation3] sm:$0x3] %vm22_vm0, %v175_v34 }
 0x261   :  { %v241_v35 = vld [vmem:[#allocation3] sm:$0x3] }
 0x262   :  { %243 = vrot.lane.b32.xlu1 %v241_v35, %s1024_s23 }
 0x2ca   :  { %v181_v36 = vpop.permute.xlu0 %180 }
 0x2cb   :  { %183 = vst.msk [vmem:[#allocation2] sm:$0x3] %vm22_vm0, %v181_v36  ;;  %184 = vst.msk [vmem:[%s1264_s4] sm:$0x3] %vm22_vm0, %v181_v36 }
 0x2d2   :  { %v187_v37 = vld [vmem:[#allocation2] sm:$0x3] }
 0x2d3   :  { %v188_v38 = vpack.c.bf16 %v187_v37, %v187_v37 }
 0x2d4   :  { %v244_v53 = vpop.permute.xlu1 %243 }
 0x2d5   :  { %898 = vmatmul.mubr.msk.bf16.vlgmr.msra.gmra.mrb[4].mxu0 %vm98_vm3, %v188_v38 }
 0x2d6   :  { %910 = vmatpush3.bf16.msra.mxu0 %v1055_v1  ;;  %913 = vmatprep.mubr.msk.bf16.mxu0 %vm1022_vm1, %v1021_v0 }
 0x2d7   :  { %911 = vmatprep.subr.bf16.mxu0 %v1021_v0 }
 0x2da   :  { %912 = vmatpush3.bf16.msra.mxu0 %v1073_v3 }
 0x2db   :  { %925 = vmatprep.subr.bf16.mxu0 %v1021_v0 }
 0x3a8   :  { %v226_v40 = vpop.f32.mrb[4].mxu0 }
 0x3a9   :  { %v232_v41 = vadd.f32 %v825_v39, %v226_v40  ;;  %v899_v42 = vpop.f32.mrb[5].mxu0 }
 0x3aa   :  { %v229_v43 = vpop.f32.mrb[6].mxu0 }
 0x3ab   :  { %v233_v44 = vadd.f32 %v232_v41, %v1095_v8  ;;  %v900_v45 = vpop.f32.mrb[7].mxu0 }
 0x3ad   :  { %965 = vtanh.f32 %v233_v44  ;;  %v827_v47 = vmul.f32 -1.442695, %v233_v44 }
 0x3af   :  { %967 = vpow2.f32 %v827_v47 }
 0x3b7   :  { %v966_v46 = vpop.eup %965 }
 0x3b8   :  { %248 = vrot.lane.b32.xlu0 %v966_v46, %s1023_s3 }
 0x3b9   :  { %v968_v48 = vpop.eup %967 }
 0x3ba   :  { %v237_v49 = vadd.f32 1.0, %v968_v48 }
 0x3bc   :  { %969 = vrcp.f32 %v237_v49 }
 0x3c6   :  { %v970_v50 = vpop.eup %969 }
 0x3c7   :  { %v246_v54 = vmul.f32 %v970_v50, %v244_v53 }
 0x42a   :  { %v249_v51 = vpop.permute.xlu0 %248 }
 0x42b   :  { %v251_v52 = vmul.f32 %v970_v50, %v249_v51 }
 0x42d   :  { %253 = vrot.lane.b32.xlu0 %v251_v52, %s1024_s23 }
 0x49f   :  { %v254_v55 = vpop.permute.xlu0 %253 }
 0x4a0   :  { %v256_v56 = vadd.f32 %v254_v55, %v246_v54 }
 0x4a2   :  { %971 = vtanh.f32 %v256_v56 }
 0x4ac   :  { %v972_v57 = vpop.eup %971 }
 0x4ad   :  { %259 = vrot.lane.b32.xlu1 %v972_v57, %s1023_s3  ;;  %v837_v57 = vld [vmem:[%s1263_s2 + $0x8] sm:$0x3] }
 0x4b1   :  { %264 = vrot.lane.b32.xlu1 %v256_v56, %s1025_s24 }
 0x51f   :  { %v260_v58 = vpop.permute.xlu1 %259 }
 0x520   :  { %v262_v59 = vmul.f32 %v970_v50, %v260_v58 }
 0x522   :  { %269 = vrot.lane.b32.xlu0 %v262_v59, %s1024_s23 }
 0x523   :  { %v265_v60 = vpop.permute.xlu1 %264 }
 0x524   :  { %267 = vst.msk [vmem:[#allocation3] sm:$0x3] %vm22_vm0, %v265_v60 }
 0x52b   :  { %v331_v61 = vld [vmem:[#allocation3] sm:$0x3] }
 0x52c   :  { %333 = vrot.lane.b32.xlu1 %v331_v61, %s1024_s23 }
 0x594   :  { %v270_v62 = vpop.permute.xlu0 %269 }
 0x595   :  { %272 = vst.msk [vmem:[#allocation2] sm:$0x3] %vm22_vm0, %v270_v62  ;;  %828 = vst.msk [vmem:[%s1264_s4 + $0x2] sm:$0x3] %vm22_vm0, %v270_v62 }
 0x59c   :  { %v277_v63 = vld [vmem:[#allocation2] sm:$0x3] }
 0x59d   :  { %v278_v2 = vpack.c.bf16 %v277_v63, %v277_v63 }
 0x59e   :  { %v334_v19 = vpop.permute.xlu1 %333 }
 0x59f   :  { %906 = vmatmul.mubr.msk.bf16.vlgmr.msra.gmra.mrb[4].mxu1 %vm98_vm3, %v278_v2 }
 0x5a0   :  { %918 = vmatpush3.bf16.msra.mxu1 %v1055_v1  ;;  %921 = vmatprep.mubr.msk.bf16.mxu1 %vm1022_vm1, %v1021_v0 }
 0x5a1   :  { %919 = vmatprep.subr.bf16.mxu1 %v1021_v0 }
 0x5a4   :  { %920 = vmatpush3.bf16.msra.mxu1 %v1073_v3 }
 0x5a5   :  { %933 = vmatprep.subr.bf16.mxu1 %v1021_v0 }
 0x672   :  { %v316_v5 = vpop.f32.mrb[4].mxu1 }
 0x673   :  { %v322_v6 = vadd.f32 %v829_v4, %v316_v5  ;;  %v907_v7 = vpop.f32.mrb[5].mxu1 }
 0x674   :  { %v319_v9 = vpop.f32.mrb[6].mxu1 }
 0x675   :  { %v323_v10 = vadd.f32 %v322_v6, %v1095_v8  ;;  %v908_v11 = vpop.f32.mrb[7].mxu1 }
 0x677   :  { %973 = vtanh.f32 %v323_v10  ;;  %v831_v13 = vmul.f32 -1.442695, %v323_v10 }
 0x679   :  { %975 = vpow2.f32 %v831_v13 }
 0x681   :  { %v974_v12 = vpop.eup %973 }
 0x682   :  { %338 = vrot.lane.b32.xlu0 %v974_v12, %s1023_s3 }
 0x683   :  { %v976_v14 = vpop.eup %975 }
 0x684   :  { %v327_v15 = vadd.f32 1.0, %v976_v14 }
 0x686   :  { %977 = vrcp.f32 %v327_v15 }
 0x690   :  { %v978_v16 = vpop.eup %977 }
 0x691   :  { %v336_v20 = vmul.f32 %v978_v16, %v334_v19 }
 0x6f4   :  { %v339_v17 = vpop.permute.xlu0 %338 }
 0x6f5   :  { %v341_v18 = vmul.f32 %v978_v16, %v339_v17 }
 0x6f7   :  { %343 = vrot.lane.b32.xlu0 %v341_v18, %s1024_s23 }
 0x769   :  { %v344_v21 = vpop.permute.xlu0 %343 }
 0x76a   :  { %v346_v22 = vadd.f32 %v344_v21, %v336_v20 }
 0x76c   :  { %979 = vtanh.f32 %v346_v22 }
 0x776   :  { %v980_v23 = vpop.eup %979 }
 0x777   :  { %349 = vrot.lane.b32.xlu1 %v980_v23, %s1023_s3  ;;  %v841_v23 = vld [vmem:[%s1263_s2 + $0xa] sm:$0x3] }
 0x77b   :  { %354 = vrot.lane.b32.xlu1 %v346_v22, %s1025_s24 }
 0x7e9   :  { %v350_v24 = vpop.permute.xlu1 %349 }
 0x7ea   :  { %v352_v25 = vmul.f32 %v978_v16, %v350_v24 }
 0x7ec   :  { %359 = vrot.lane.b32.xlu0 %v352_v25, %s1024_s23 }
 0x7ed   :  { %v355_v26 = vpop.permute.xlu1 %354 }
 0x7ee   :  { %357 = vst.msk [vmem:[#allocation3] sm:$0x3] %vm22_vm0, %v355_v26 }
 0x7f5   :  { %v421_v27 = vld [vmem:[#allocation3] sm:$0x3] }
 0x7f6   :  { %423 = vrot.lane.b32.xlu1 %v421_v27, %s1024_s23 }
 0x85e   :  { %v360_v28 = vpop.permute.xlu0 %359 }
 0x85f   :  { %362 = vst.msk [vmem:[#allocation2] sm:$0x3] %vm22_vm0, %v360_v28  ;;  %832 = vst.msk [vmem:[%s1264_s4 + $0x4] sm:$0x3] %vm22_vm0, %v360_v28 }
 0x866   :  { %v367_v29 = vld [vmem:[#allocation2] sm:$0x3] }
 0x867   :  { %v368_v30 = vpack.c.bf16 %v367_v29, %v367_v29 }
 0x868   :  { %v424_v45 = vpop.permute.xlu1 %423 }
 0x869   :  { %914 = vmatmul.mubr.msk.bf16.vlgmr.msra.gmra.mrb[8].mxu0 %vm98_vm3, %v368_v30 }
 0x86a   :  { %926 = vmatpush3.bf16.msra.mxu0 %v1055_v1  ;;  %929 = vmatprep.mubr.msk.bf16.mxu0 %vm1022_vm1, %v1021_v0 }
 0x86b   :  { %927 = vmatprep.subr.bf16.mxu0 %v1021_v0 }
 0x86e   :  { %928 = vmatpush3.bf16.msra.mxu0 %v1073_v3 }
 0x86f   :  { %941 = vmatprep.subr.bf16.mxu0 %v1021_v0 }
 0x93c   :  { %v406_v32 = vpop.f32.mrb[8].mxu0 }
 0x93d   :  { %v412_v33 = vadd.f32 %v833_v31, %v406_v32  ;;  %v915_v34 = vpop.f32.mrb[9].mxu0 }
 0x93e   :  { %v409_v35 = vpop.f32.mrb[10].mxu0 }
 0x93f   :  { %v413_v36 = vadd.f32 %v412_v33, %v1095_v8  ;;  %v916_v37 = vpop.f32.mrb[11].mxu0 }
 0x941   :  { %981 = vtanh.f32 %v413_v36  ;;  %v835_v39 = vmul.f32 -1.442695, %v413_v36 }
 0x943   :  { %983 = vpow2.f32 %v835_v39 }
 0x94b   :  { %v982_v38 = vpop.eup %981 }
 0x94c   :  { %428 = vrot.lane.b32.xlu0 %v982_v38, %s1023_s3 }
 0x94d   :  { %v984_v40 = vpop.eup %983 }
 0x94e   :  { %v417_v41 = vadd.f32 1.0, %v984_v40 }
 0x950   :  { %985 = vrcp.f32 %v417_v41 }
 0x95a   :  { %v986_v42 = vpop.eup %985 }
 0x95b   :  { %v426_v46 = vmul.f32 %v986_v42, %v424_v45 }
 0x9be   :  { %v429_v43 = vpop.permute.xlu0 %428 }
 0x9bf   :  { %v431_v44 = vmul.f32 %v986_v42, %v429_v43 }
 0x9c1   :  { %433 = vrot.lane.b32.xlu0 %v431_v44, %s1024_s23 }
 0xa33   :  { %v434_v47 = vpop.permute.xlu0 %433 }
 0xa34   :  { %v436_v48 = vadd.f32 %v434_v47, %v426_v46  ;;  %v845_v46 = vld [vmem:[%s1263_s2 + $0xc] sm:$0x3] }
 0xa36   :  { %987 = vtanh.f32 %v436_v48 }
 0xa40   :  { %v988_v49 = vpop.eup %987 }
 0xa41   :  { %439 = vrot.lane.b32.xlu1 %v988_v49, %s1023_s3 }
 0xa45   :  { %444 = vrot.lane.b32.xlu1 %v436_v48, %s1025_s24 }
 0xab3   :  { %v440_v50 = vpop.permute.xlu1 %439 }
 0xab4   :  { %v442_v51 = vmul.f32 %v986_v42, %v440_v50 }
 0xab6   :  { %449 = vrot.lane.b32.xlu0 %v442_v51, %s1024_s23 }
 0xab7   :  { %v445_v52 = vpop.permute.xlu1 %444 }
 0xab8   :  { %447 = vst.msk [vmem:[#allocation3] sm:$0x3] %vm22_vm0, %v445_v52 }
 0xabf   :  { %v511_v53 = vld [vmem:[#allocation3] sm:$0x3] }
 0xac0   :  { %513 = vrot.lane.b32.xlu1 %v511_v53, %s1024_s23 }
 0xb28   :  { %v450_v54 = vpop.permute.xlu0 %449 }
 0xb29   :  { %452 = vst.msk [vmem:[#allocation2] sm:$0x3] %vm22_vm0, %v450_v54  ;;  %836 = vst.msk [vmem:[%s1264_s4 + $0x6] sm:$0x3] %vm22_vm0, %v450_v54 }
 0xb30   :  { %v457_v55 = vld [vmem:[#allocation2] sm:$0x3] }
 0xb31   :  { %v458_v56 = vpack.c.bf16 %v457_v55, %v457_v55 }
 0xb32   :  { %v514_v11 = vpop.permute.xlu1 %513 }
 0xb33   :  { %922 = vmatmul.mubr.msk.bf16.vlgmr.msra.gmra.mrb[8].mxu1 %vm98_vm3, %v458_v56 }
 0xb34   :  { %934 = vmatpush3.bf16.msra.mxu1 %v1055_v1  ;;  %937 = vmatprep.mubr.msk.bf16.mxu1 %vm1022_vm1, %v1021_v0 }
 0xb35   :  { %935 = vmatprep.subr.bf16.mxu1 %v1021_v0 }
 0xb38   :  { %936 = vmatpush3.bf16.msra.mxu1 %v1073_v3 }
 0xc06   :  { %v496_v58 = vpop.f32.mrb[8].mxu1 }
 0xc07   :  { %v502_v59 = vadd.f32 %v837_v57, %v496_v58  ;;  %v923_v60 = vpop.f32.mrb[9].mxu1 }
 0xc08   :  { %v499_v61 = vpop.f32.mrb[10].mxu1 }
 0xc09   :  { %v503_v62 = vadd.f32 %v502_v59, %v1095_v8  ;;  %v924_v63 = vpop.f32.mrb[11].mxu1 }
 0xc0b   :  { %989 = vtanh.f32 %v503_v62  ;;  %v839_v4 = vmul.f32 -1.442695, %v503_v62 }
 0xc0d   :  { %991 = vpow2.f32 %v839_v4 }
 0xc15   :  { %v990_v2 = vpop.eup %989 }
 0xc16   :  { %518 = vrot.lane.b32.xlu0 %v990_v2, %s1023_s3 }
 0xc17   :  { %v992_v5 = vpop.eup %991 }
 0xc18   :  { %v507_v6 = vadd.f32 1.0, %v992_v5 }
 0xc1a   :  { %993 = vrcp.f32 %v507_v6 }
 0xc24   :  { %v994_v7 = vpop.eup %993 }
 0xc25   :  { %v516_v12 = vmul.f32 %v994_v7, %v514_v11 }
 0xc88   :  { %v519_v9 = vpop.permute.xlu0 %518 }
 0xc89   :  { %v521_v10 = vmul.f32 %v994_v7, %v519_v9 }
 0xc8b   :  { %523 = vrot.lane.b32.xlu0 %v521_v10, %s1024_s23 }
 0xcfd   :  { %v524_v13 = vpop.permute.xlu0 %523 }
 0xcfe   :  { %v526_v14 = vadd.f32 %v524_v13, %v516_v12  ;;  %v849_v12 = vld [vmem:[%s1263_s2 + $0xe] sm:$0x3] }
 0xd00   :  { %995 = vtanh.f32 %v526_v14 }
 0xd0a   :  { %v996_v15 = vpop.eup %995 }
 0xd0b   :  { %529 = vrot.lane.b32.xlu1 %v996_v15, %s1023_s3 }
 0xd0f   :  { %534 = vrot.lane.b32.xlu1 %v526_v14, %s1025_s24 }
 0xd7d   :  { %v530_v16 = vpop.permute.xlu1 %529 }
 0xd7e   :  { %v532_v17 = vmul.f32 %v994_v7, %v530_v16 }
 0xd80   :  { %539 = vrot.lane.b32.xlu0 %v532_v17, %s1024_s23 }
 0xd81   :  { %v535_v18 = vpop.permute.xlu1 %534 }
 0xd82   :  { %537 = vst.msk [vmem:[#allocation3] sm:$0x3] %vm22_vm0, %v535_v18 }
 0xd89   :  { %v601_v19 = vld [vmem:[#allocation3] sm:$0x3] }
 0xd8a   :  { %603 = vrot.lane.b32.xlu1 %v601_v19, %s1024_s23 }
 0xdf2   :  { %v540_v20 = vpop.permute.xlu0 %539 }
 0xdf3   :  { %542 = vst.msk [vmem:[#allocation2] sm:$0x3] %vm22_vm0, %v540_v20  ;;  %840 = vst.msk [vmem:[%s1264_s4 + $0x8] sm:$0x3] %vm22_vm0, %v540_v20 }
 0xdfa   :  { %v547_v21 = vld [vmem:[#allocation2] sm:$0x3] }
 0xdfb   :  { %v548_v22 = vpack.c.bf16 %v547_v21, %v547_v21 }
 0xdfc   :  { %v604_v34 = vpop.permute.xlu1 %603 }
 0xdfd   :  { %930 = vmatmul.mubr.msk.bf16.vlgmr.msra.gmra.mrb[12].mxu0 %vm98_vm3, %v548_v22 }
 0xdfe   :  { %942 = vmatpush3.bf16.msra.mxu0 %v1055_v1  ;;  %945 = vmatprep.mubr.msk.bf16.mxu0 %vm1022_vm1, %v1021_v0 }
 0xdff   :  { %943 = vmatprep.subr.bf16.mxu0 %v1021_v0 }
 0xe02   :  { %944 = vmatpush3.bf16.msra.mxu0 %v1073_v3 }
 0xed0   :  { %v586_v24 = vpop.f32.mrb[12].mxu0 }
 0xed1   :  { %v592_v25 = vadd.f32 %v841_v23, %v586_v24  ;;  %v931_v26 = vpop.f32.mrb[13].mxu0 }
 0xed2   :  { %v589_v27 = vpop.f32.mrb[14].mxu0 }
 0xed3   :  { %v593_v28 = vadd.f32 %v592_v25, %v1095_v8  ;;  %v932_v29 = vpop.f32.mrb[15].mxu0 }
 0xed5   :  { %997 = vtanh.f32 %v593_v28  ;;  %v843_v30 = vmul.f32 -1.442695, %v593_v28 }
 0xed7   :  { %999 = vpow2.f32 %v843_v30 }
 0xedf   :  { %v998_v1 = vpop.eup %997 }
 0xee0   :  { %608 = vrot.lane.b32.xlu0 %v998_v1, %s1023_s3 }
 0xee1   :  { %v1000_v0 = vpop.eup %999 }
 0xee2   :  { %v597_v31 = vadd.f32 1.0, %v1000_v0 }
 0xee4   :  { %1001 = vrcp.f32 %v597_v31 }
 0xeee   :  { %v1002_v3 = vpop.eup %1001 }
 0xeef   :  { %v606_v35 = vmul.f32 %v1002_v3, %v604_v34 }
 0xf52   :  { %v609_v32 = vpop.permute.xlu0 %608 }
 0xf53   :  { %v611_v33 = vmul.f32 %v1002_v3, %v609_v32 }
 0xf55   :  { %613 = vrot.lane.b32.xlu0 %v611_v33, %s1024_s23 }
 0xfc7   :  { %v614_v36 = vpop.permute.xlu0 %613 }
 0xfc8   :  { %v616_v37 = vadd.f32 %v614_v36, %v606_v35 }
 0xfca   :  { %1003 = vtanh.f32 %v616_v37 }
 0xfd4   :  { %v1004_v38 = vpop.eup %1003 }
 0xfd5   :  { %619 = vrot.lane.b32.xlu1 %v1004_v38, %s1023_s3 }
 0xfd9   :  { %624 = vrot.lane.b32.xlu1 %v616_v37, %s1025_s24 }
0x1047   :  { %v620_v39 = vpop.permute.xlu1 %619 }
0x1048   :  { %v622_v40 = vmul.f32 %v1002_v3, %v620_v39 }
0x104a   :  { %629 = vrot.lane.b32.xlu0 %v622_v40, %s1024_s23 }
0x104b   :  { %v625_v41 = vpop.permute.xlu1 %624 }
0x104c   :  { %627 = vst.msk [vmem:[#allocation3] sm:$0x3] %vm22_vm0, %v625_v41 }
0x1053   :  { %v691_v42 = vld [vmem:[#allocation3] sm:$0x3] }
0x1054   :  { %693 = vrot.lane.b32.xlu1 %v691_v42, %s1024_s23 }
0x10bc   :  { %v630_v43 = vpop.permute.xlu0 %629 }
0x10bd   :  { %632 = vst.msk [vmem:[#allocation2] sm:$0x3] %vm22_vm0, %v630_v43  ;;  %844 = vst.msk [vmem:[%s1264_s4 + $0xa] sm:$0x3] %vm22_vm0, %v630_v43 }
0x10c4   :  { %v637_v44 = vld [vmem:[#allocation2] sm:$0x3] }
0x10c5   :  { %v638_v45 = vpack.c.bf16 %v637_v44, %v637_v44 }
0x10c6   :  { %v694_v60 = vpop.permute.xlu1 %693 }
0x10c7   :  { %938 = vmatmul.mubr.msk.bf16.vlgmr.msra.gmra.mrb[12].mxu1 %vm98_vm3, %v638_v45 }
0x119a   :  { %v676_v47 = vpop.f32.mrb[12].mxu1 }
0x119b   :  { %v682_v48 = vadd.f32 %v845_v46, %v676_v47  ;;  %v939_v49 = vpop.f32.mrb[13].mxu1 }
0x119c   :  { %v679_v50 = vpop.f32.mrb[14].mxu1 }
0x119d   :  { %v683_v51 = vadd.f32 %v682_v48, %v1095_v8  ;;  %v940_v52 = vpop.f32.mrb[15].mxu1 }
0x119f   :  { %1005 = vtanh.f32 %v683_v51  ;;  %v847_v54 = vmul.f32 -1.442695, %v683_v51 }
0x11a1   :  { %1007 = vpow2.f32 %v847_v54 }
0x11a9   :  { %v1006_v53 = vpop.eup %1005 }
0x11aa   :  { %698 = vrot.lane.b32.xlu0 %v1006_v53, %s1023_s3 }
0x11ab   :  { %v1008_v55 = vpop.eup %1007 }
0x11ac   :  { %v687_v56 = vadd.f32 1.0, %v1008_v55 }
0x11ae   :  { %1009 = vrcp.f32 %v687_v56 }
0x11b8   :  { %v1010_v57 = vpop.eup %1009 }
0x11b9   :  { %v696_v61 = vmul.f32 %v1010_v57, %v694_v60 }
0x121c   :  { %v699_v58 = vpop.permute.xlu0 %698 }
0x121d   :  { %v701_v59 = vmul.f32 %v1010_v57, %v699_v58 }
0x121f   :  { %703 = vrot.lane.b32.xlu0 %v701_v59, %s1024_s23 }
0x1291   :  { %v704_v62 = vpop.permute.xlu0 %703 }
0x1292   :  { %v706_v63 = vadd.f32 %v704_v62, %v696_v61 }
0x1294   :  { %1011 = vtanh.f32 %v706_v63 }
0x129e   :  { %v1012_v2 = vpop.eup %1011 }
0x129f   :  { %709 = vrot.lane.b32.xlu1 %v1012_v2, %s1023_s3 }
0x12a3   :  { %714 = vrot.lane.b32.xlu1 %v706_v63, %s1025_s24 }
0x1311   :  { %v710_v4 = vpop.permute.xlu1 %709 }
0x1312   :  { %v712_v5 = vmul.f32 %v1010_v57, %v710_v4 }
0x1314   :  { %719 = vrot.lane.b32.xlu0 %v712_v5, %s1024_s23 }
0x1315   :  { %v715_v6 = vpop.permute.xlu1 %714 }
0x1316   :  { %717 = vst.msk [vmem:[#allocation3] sm:$0x3] %vm22_vm0, %v715_v6 }
0x131d   :  { %v781_v7 = vld [vmem:[#allocation3] sm:$0x3] }
0x131e   :  { %783 = vrot.lane.b32.xlu1 %v781_v7, %s1024_s23 }
0x1386   :  { %v720_v9 = vpop.permute.xlu0 %719 }
0x1387   :  { %722 = vst.msk [vmem:[#allocation2] sm:$0x3] %vm22_vm0, %v720_v9  ;;  %848 = vst.msk [vmem:[%s1264_s4 + $0xc] sm:$0x3] %vm22_vm0, %v720_v9 }
0x138e   :  { %v727_v10 = vld [vmem:[#allocation2] sm:$0x3] }
0x138f   :  { %v728_v11 = vpack.c.bf16 %v727_v10, %v727_v10 }
0x1390   :  { %v784_v26 = vpop.permute.xlu1 %783 }
0x1391   :  { %946 = vmatmul.mubr.msk.bf16.vlgmr.msra.gmra.mrb[16].mxu0 %vm98_vm3, %v728_v11 }
0x1464   :  { %v766_v13 = vpop.f32.mrb[16].mxu0 }
0x1465   :  { %v772_v14 = vadd.f32 %v849_v12, %v766_v13  ;;  %v947_v15 = vpop.f32.mrb[17].mxu0 }
0x1466   :  { %v769_v16 = vpop.f32.mrb[18].mxu0 }
0x1467   :  { %v773_v17 = vadd.f32 %v772_v14, %v1095_v8  ;;  %v948_v18 = vpop.f32.mrb[19].mxu0 }
0x1469   :  { %1013 = vtanh.f32 %v773_v17  ;;  %v851_v20 = vmul.f32 -1.442695, %v773_v17 }
0x146b   :  { %1015 = vpow2.f32 %v851_v20 }
0x1473   :  { %v1014_v19 = vpop.eup %1013 }
0x1474   :  { %788 = vrot.lane.b32.xlu0 %v1014_v19, %s1023_s3 }
0x1475   :  { %v1016_v21 = vpop.eup %1015 }
0x1476   :  { %v777_v22 = vadd.f32 1.0, %v1016_v21 }
0x1478   :  { %1017 = vrcp.f32 %v777_v22 }
0x1482   :  { %v1018_v23 = vpop.eup %1017 }
0x1483   :  { %v786_v27 = vmul.f32 %v1018_v23, %v784_v26 }
0x14e6   :  { %v789_v24 = vpop.permute.xlu0 %788 }
0x14e7   :  { %v791_v25 = vmul.f32 %v1018_v23, %v789_v24 }
0x14e9   :  { %793 = vrot.lane.b32.xlu0 %v791_v25, %s1024_s23 }
0x155b   :  { %v794_v28 = vpop.permute.xlu0 %793 }
0x155c   :  { %v796_v29 = vadd.f32 %v794_v28, %v786_v27 }
0x155e   :  { %1019 = vtanh.f32 %v796_v29  ;;  %804 = vrot.lane.b32.xlu0 %v796_v29, %s1025_s24 }
0x1568   :  { %v1020_v8 = vpop.eup %1019 }
0x1569   :  { %799 = vrot.lane.b32.xlu1 %v1020_v8, %s1023_s3 }
0x15d0   :  { %v805_v1 = vpop.permute.xlu0 %804 }
0x15d1   :  { %807 = vst.msk [vmem:[#allocation3] sm:$0x3] %vm22_vm0, %v805_v1 }
0x15db   :  { %v800_v30 = vpop.permute.xlu1 %799 }
0x15dc   :  { %v802_v0 = vmul.f32 %v1018_v23, %v800_v30 }
0x15de   :  { %809 = vrot.lane.b32.xlu1 %v802_v0, %s1024_s23 }
0x1650   :  { %v810_v31 = vpop.permute.xlu1 %809 }
0x1651   :  { %812 = vst.msk [vmem:[#allocation2] sm:$0x3] %vm22_vm0, %v810_v31  ;;  %852 = vst.msk [vmem:[%s1264_s4 + $0xe] sm:$0x3] %vm22_vm0, %v810_v31 }

// kernel: _lambda_.11
= control target key start
LH: loop header
LB: loop body
LE: loop exit
PB: predicated region body
PF: predicated region fallthrough
CT: control target
= control target key end

     0   :  { %v151_v1 = vmov 0.0   ;;  %vm152_vm0 = vmmov 0   ;;  %s203_s0 = inlined_call_operand.vmem [shape: f32[16,32], index: 0, kind: input, shape index: {}]   ;;  %s204_s1 = inlined_call_operand.vmem [shape: bf16[32,128], index: 1, kind: input, shape index: {}]   ;;  %s205_s2 = inlined_call_operand.vmem [shape: f32[1,128], index: 2, kind: input, shape index: {}]   ;;  %s206_s3 = inlined_call_operand.hbm [shape: f32[16,128], index: 3, kind: output, shape index: {}]  }
   0x1   :  { %v125_v0 = vld [vmem:[%s204_s1] sm:$0xff]   ;;  %112 = vmatprep.subr.bf16.mxu0 %v151_v1  ;;  %v126_v2 = vld [vmem:[%s204_s1 + $0x8] sm:$0xff]   ;;  %116 = vmatprep.mubr.msk.bf16.mxu0 %vm152_vm0, %v151_v1 }
   0x2   :  { %113 = vmatpush3.bf16.msra.mxu0 %v125_v0  ;;  %v16_v3 = vld [vmem:[%s203_s0] sm:$0xff]  ;;  %v17_v4 = vld [vmem:[%s203_s0 + $0x8] sm:$0xff] }
   0x3   :  { %114 = vmatprep.subr.bf16.mxu0 %v151_v1 }
   0x4   :  { %8 = vsyncpa [#allocation3], 0  ;;  %v18_v5 = vpack.c.bf16 %v17_v4, %v16_v3  ;;  %vm42_vm1 = vcmask 261120   ;;  %v105_v6 = vld [vmem:[%s205_s2] ss:$0 sm:$0xff]  ;;  %s153_s1 = smov [#allocation2]  }
   0x5   :  { %s94_s22 = sshll.u32 %s153_s1, 4  ;;  %s95_s22 = int_to_ptr.vmem [resolvable:$true] %s94_s22 }
   0x6   :  { %115 = vmatpush3.bf16.msra.mxu0 %v126_v2  ;;  %s127_s0 = scalar_lea.vmem %s95_s22, 256  ;;  %p132_p1 = scmp.lt.s32.totalorder %s95_s22, %s95_s22 }
   0x7   :  { %p128_p0 = scmp.ne.s32.totalorder %s95_s22, %s127_s0  ;;  %p133_p2 = scmp.lt.s32.totalorder %s127_s0, %s127_s0 }
   0x9   :  { %117 = vmatmul.mubr.msk.bf16.vlgmr.msra.gmra.mrb[0].mxu0 %vm42_vm1, %v18_v5  ;;  %p134_p3 = por %p133_p2, %p132_p1 }
   0xb   :  { %p135_p4 = pnand %p134_p3, %p128_p0 }
  0xdc   :  { %v80_v7 = vpop.f32.mrb[0].mxu0 }
  0xdd   :  { %v81_v8 = vadd.f32 %v105_v6, %v80_v7  ;;  %v118_v9 = vpop.f32.mrb[1].mxu0 }
  0xde   :  { %v83_v10 = vpop.f32.mrb[2].mxu0 }
  0xdf   :  { %87 = vst [vmem:[#allocation2] sm:$0xff] %v81_v8  ;;  %v84_v11 = vadd.f32 %v105_v6, %v83_v10  ;;  %v119_v12 = vpop.f32.mrb[3].mxu0 }
  0xe1   :  { %88 = vst [vmem:[#allocation2 + $0x8] sm:$0xff] %v84_v11 }
  0xe2   :  { %138 = shalt.err (!%p135_p4)
}
  0xe3   :  { %s139_s24 = scalar_lea.hbm %s206_s3, 256 }
  0xe4   :  { %p140_p5 = scmp.ne.s32.totalorder %s206_s3, %s139_s24  ;;  %p143_p6 = scmp.lt.u32.totalorder %s139_s24, %s206_s3 }
  0xe6   :  { %p145_p7 = pnand %p143_p6, %p140_p5 }
  0xe8   :  { %148 = shalt.err (!%p145_p7)
}
  0xe9   :  { %s154_s29 = smov 128   ;;  %s155_s30 = smov 8  }
  0xea   :  { %100 = dma.vmem_to_hbm [thread:$0]  %s95_s22, 256, %s206_s3, [#allocation3], %s154_s29, %s154_s29, %s155_s30  }
  0xeb   :  { %149 = dma.done.wait [#allocation3], 256  }
  0xec   :  { %150 = vsyncadd [#allocation3], 4294967040 }
  0xed   :  { %104 = vsyncpa [#allocation3], 1 }

// kernel: _lambda_.10
= control target key start
LH: loop header
LB: loop body
LE: loop exit
PB: predicated region body
PF: predicated region fallthrough
CT: control target
= control target key end

     0   :  { %vm16_vm0 = vcmask 254976   ;;  %v942_v0 = vmov 0.0   ;;  %vm943_vm1 = vmmov 0   ;;  %vm38_vm2 = vcmask 261120   ;;  %s944_s14 = smov 64   ;;  %s945_s15 = smov 32   ;;  %s1152_s1 = inlined_call_operand.vmem [shape: bf16[32,128], index: 1, kind: input, shape index: {}]   ;;  %s1153_s0 = inlined_call_operand.vmem [shape: f32[8,2,128], index: 0, kind: input, shape index: {}]   ;;  %s1154_s2 = inlined_call_operand.vmem [shape: f32[8,2,32], index: 2, kind: output, shape index: {}]  }
   0x1   :  { %807 = vmatprep.subr.bf16.mxu0 %v942_v0  ;;  %v966_v1 = vld [vmem:[%s1152_s1] sm:$0xff]   ;;  %811 = vmatprep.mubr.msk.bf16.mxu0 %vm943_vm1, %v942_v0  ;;  %17 = vst.msk [vmem:[#allocation2] sm:$0x3] %vm16_vm0, %v942_v0  ;;  %18 = vst.msk [vmem:[#allocation3] sm:$0x3] %vm16_vm0, %v942_v0  ;;  %v981_v2 = vld [vmem:[%s1152_s1 + $0x8] sm:$0xff]  }
   0x2   :  { %815 = vmatprep.subr.bf16.mxu1 %v942_v0  ;;  %819 = vmatprep.mubr.msk.bf16.mxu1 %vm943_vm1, %v942_v0  ;;  %v23_v5 = vld [vmem:[%s1153_s0] sm:$0x3]  ;;  %s946_s16 = smov 96   ;;  %v755_v31 = vld [vmem:[%s1153_s0 + $0x2] sm:$0x3] }
   0x3   :  { %808 = vmatpush3.bf16.msra.mxu0 %v966_v1  ;;  %816 = vmatpush3.bf16.msra.mxu1 %v966_v1  ;;  %v759_v56 = vld [vmem:[%s1153_s0 + $0x4] sm:$0x3] }
   0x4   :  { %809 = vmatprep.subr.bf16.mxu0 %v942_v0  ;;  %817 = vmatprep.subr.bf16.mxu1 %v942_v0 }
   0x7   :  { %810 = vmatpush3.bf16.msra.mxu0 %v981_v2  ;;  %818 = vmatpush3.bf16.msra.mxu1 %v981_v2 }
   0x8   :  { %v24_v3 = vld [vmem:[#allocation2] sm:$0x3]  ;;  %823 = vmatprep.subr.bf16.mxu0 %v942_v0  ;;  %831 = vmatprep.subr.bf16.mxu1 %v942_v0  ;;  %v90_v12 = vld [vmem:[#allocation3] sm:$0x3] }
   0x9   :  { %v25_v4 = vpack.c.bf16 %v24_v3, %v24_v3 }
   0xb   :  { %812 = vmatmul.mubr.msk.bf16.vlgmr.msra.gmra.mrb[0].mxu0 %vm38_vm2, %v25_v4 }
   0xc   :  { %824 = vmatpush3.bf16.msra.mxu0 %v966_v1  ;;  %827 = vmatprep.mubr.msk.bf16.mxu0 %vm943_vm1, %v942_v0 }
   0xd   :  { %825 = vmatprep.subr.bf16.mxu0 %v942_v0 }
  0x10   :  { %826 = vmatpush3.bf16.msra.mxu0 %v981_v2 }
  0x11   :  { %839 = vmatprep.subr.bf16.mxu0 %v942_v0 }
  0xde   :  { %v76_v6 = vpop.f32.mrb[0].mxu0 }
  0xdf   :  { %v82_v7 = vadd.f32 %v76_v6, %v23_v5  ;;  %v813_v8 = vpop.f32.mrb[1].mxu0 }
  0xe0   :  { %v79_v9 = vpop.f32.mrb[2].mxu0 }
  0xe1   :  { %878 = vtanh.f32 %v82_v7  ;;  %v814_v10 = vpop.f32.mrb[3].mxu0  ;;  %v754_v13 = vmul.f32 -1.442695, %v82_v7 }
  0xe3   :  { %880 = vpow2.f32 %v754_v13 }
  0xeb   :  { %v879_v11 = vpop.eup %878 }
  0xec   :  { %97 = vrot.lane.b32.xlu0 %v879_v11, %s944_s14 }
  0xed   :  { %v881_v14 = vpop.eup %880 }
  0xee   :  { %v86_v15 = vadd.f32 1.0, %v881_v14 }
  0xf0   :  { %92 = vrot.lane.b32.xlu0 %v90_v12, %s945_s15  ;;  %882 = vrcp.f32 %v86_v15 }
  0xfa   :  { %v883_v16 = vpop.eup %882 }
 0x15e   :  { %v98_v17 = vpop.permute.xlu0 %97 }
 0x15f   :  { %v100_v18 = vmul.f32 %v883_v16, %v98_v17 }
 0x161   :  { %102 = vrot.lane.b32.xlu1 %v100_v18, %s945_s15 }
 0x162   :  { %v93_v19 = vpop.permute.xlu0 %92 }
 0x163   :  { %v95_v20 = vmul.f32 %v883_v16, %v93_v19 }
 0x1d3   :  { %v103_v21 = vpop.permute.xlu1 %102 }
 0x1d4   :  { %v105_v22 = vadd.f32 %v103_v21, %v95_v20  ;;  %v763_v20 = vld [vmem:[%s1153_s0 + $0x6] sm:$0x3] }
 0x1d6   :  { %884 = vtanh.f32 %v105_v22 }
 0x1e0   :  { %v885_v23 = vpop.eup %884 }
 0x1e1   :  { %108 = vrot.lane.b32.xlu1 %v885_v23, %s944_s14 }
 0x1e5   :  { %113 = vrot.lane.b32.xlu1 %v105_v22, %s946_s16 }
 0x253   :  { %v109_v24 = vpop.permute.xlu1 %108 }
 0x254   :  { %v111_v25 = vmul.f32 %v883_v16, %v109_v24 }
 0x256   :  { %119 = vrot.lane.b32.xlu0 %v111_v25, %s945_s15 }
 0x257   :  { %v114_v26 = vpop.permute.xlu1 %113 }
 0x258   :  { %117 = vst.msk [vmem:[#allocation3] sm:$0x3] %vm16_vm0, %v114_v26 }
 0x25f   :  { %v179_v27 = vld [vmem:[#allocation3] sm:$0x3] }
 0x260   :  { %181 = vrot.lane.b32.xlu1 %v179_v27, %s945_s15 }
 0x2c8   :  { %v120_v28 = vpop.permute.xlu0 %119 }
 0x2c9   :  { %122 = vst.msk [vmem:[#allocation2] sm:$0x3] %vm16_vm0, %v120_v28  ;;  %123 = vst.msk [vmem:[%s1154_s2] sm:$0x3] %vm16_vm0, %v120_v28 }
 0x2d0   :  { %v126_v29 = vld [vmem:[#allocation2] sm:$0x3] }
 0x2d1   :  { %v127_v30 = vpack.c.bf16 %v126_v29, %v126_v29 }
 0x2d2   :  { %v182_v44 = vpop.permute.xlu1 %181 }
 0x2d3   :  { %820 = vmatmul.mubr.msk.bf16.vlgmr.msra.gmra.mrb[0].mxu1 %vm38_vm2, %v127_v30 }
 0x2d4   :  { %832 = vmatpush3.bf16.msra.mxu1 %v966_v1  ;;  %835 = vmatprep.mubr.msk.bf16.mxu1 %vm943_vm1, %v942_v0 }
 0x2d5   :  { %833 = vmatprep.subr.bf16.mxu1 %v942_v0 }
 0x2d8   :  { %834 = vmatpush3.bf16.msra.mxu1 %v981_v2 }
 0x2d9   :  { %847 = vmatprep.subr.bf16.mxu1 %v942_v0 }
 0x3a6   :  { %v165_v32 = vpop.f32.mrb[0].mxu1 }
 0x3a7   :  { %v171_v33 = vadd.f32 %v755_v31, %v165_v32  ;;  %v821_v34 = vpop.f32.mrb[1].mxu1 }
 0x3a8   :  { %v168_v35 = vpop.f32.mrb[2].mxu1 }
 0x3a9   :  { %886 = vtanh.f32 %v171_v33  ;;  %v822_v36 = vpop.f32.mrb[3].mxu1  ;;  %v757_v38 = vmul.f32 -1.442695, %v171_v33 }
 0x3ab   :  { %888 = vpow2.f32 %v757_v38 }
 0x3b3   :  { %v887_v37 = vpop.eup %886 }
 0x3b4   :  { %186 = vrot.lane.b32.xlu0 %v887_v37, %s944_s14 }
 0x3b5   :  { %v889_v39 = vpop.eup %888 }
 0x3b6   :  { %v175_v40 = vadd.f32 1.0, %v889_v39 }
 0x3b8   :  { %890 = vrcp.f32 %v175_v40 }
 0x3c2   :  { %v891_v41 = vpop.eup %890 }
 0x3c3   :  { %v184_v45 = vmul.f32 %v891_v41, %v182_v44 }
 0x426   :  { %v187_v42 = vpop.permute.xlu0 %186 }
 0x427   :  { %v189_v43 = vmul.f32 %v891_v41, %v187_v42 }
 0x429   :  { %191 = vrot.lane.b32.xlu0 %v189_v43, %s945_s15 }
 0x49b   :  { %v192_v46 = vpop.permute.xlu0 %191 }
 0x49c   :  { %v194_v47 = vadd.f32 %v192_v46, %v184_v45  ;;  %v767_v45 = vld [vmem:[%s1153_s0 + $0x8] sm:$0x3] }
 0x49e   :  { %892 = vtanh.f32 %v194_v47 }
 0x4a8   :  { %v893_v48 = vpop.eup %892 }
 0x4a9   :  { %197 = vrot.lane.b32.xlu1 %v893_v48, %s944_s14 }
 0x4ad   :  { %202 = vrot.lane.b32.xlu1 %v194_v47, %s946_s16 }
 0x51b   :  { %v198_v49 = vpop.permute.xlu1 %197 }
 0x51c   :  { %v200_v50 = vmul.f32 %v891_v41, %v198_v49 }
 0x51e   :  { %207 = vrot.lane.b32.xlu0 %v200_v50, %s945_s15 }
 0x51f   :  { %v203_v51 = vpop.permute.xlu1 %202 }
 0x520   :  { %205 = vst.msk [vmem:[#allocation3] sm:$0x3] %vm16_vm0, %v203_v51 }
 0x527   :  { %v268_v52 = vld [vmem:[#allocation3] sm:$0x3] }
 0x528   :  { %270 = vrot.lane.b32.xlu1 %v268_v52, %s945_s15 }
 0x590   :  { %v208_v53 = vpop.permute.xlu0 %207 }
 0x591   :  { %210 = vst.msk [vmem:[#allocation2] sm:$0x3] %vm16_vm0, %v208_v53  ;;  %758 = vst.msk [vmem:[%s1154_s2 + $0x2] sm:$0x3] %vm16_vm0, %v208_v53 }
 0x598   :  { %v215_v54 = vld [vmem:[#allocation2] sm:$0x3] }
 0x599   :  { %v216_v55 = vpack.c.bf16 %v215_v54, %v215_v54 }
 0x59a   :  { %v271_v8 = vpop.permute.xlu1 %270 }
 0x59b   :  { %828 = vmatmul.mubr.msk.bf16.vlgmr.msra.gmra.mrb[4].mxu0 %vm38_vm2, %v216_v55 }
 0x59c   :  { %840 = vmatpush3.bf16.msra.mxu0 %v966_v1  ;;  %843 = vmatprep.mubr.msk.bf16.mxu0 %vm943_vm1, %v942_v0 }
 0x59d   :  { %841 = vmatprep.subr.bf16.mxu0 %v942_v0 }
 0x5a0   :  { %842 = vmatpush3.bf16.msra.mxu0 %v981_v2 }
 0x5a1   :  { %855 = vmatprep.subr.bf16.mxu0 %v942_v0 }
 0x66e   :  { %v254_v57 = vpop.f32.mrb[4].mxu0 }
 0x66f   :  { %v260_v58 = vadd.f32 %v759_v56, %v254_v57  ;;  %v829_v59 = vpop.f32.mrb[5].mxu0 }
 0x670   :  { %v257_v60 = vpop.f32.mrb[6].mxu0 }
 0x671   :  { %894 = vtanh.f32 %v260_v58  ;;  %v830_v61 = vpop.f32.mrb[7].mxu0  ;;  %v761_v63 = vmul.f32 -1.442695, %v260_v58 }
 0x673   :  { %896 = vpow2.f32 %v761_v63 }
 0x67b   :  { %v895_v62 = vpop.eup %894 }
 0x67c   :  { %275 = vrot.lane.b32.xlu0 %v895_v62, %s944_s14 }
 0x67d   :  { %v897_v3 = vpop.eup %896 }
 0x67e   :  { %v264_v4 = vadd.f32 1.0, %v897_v3 }
 0x680   :  { %898 = vrcp.f32 %v264_v4 }
 0x68a   :  { %v899_v5 = vpop.eup %898 }
 0x68b   :  { %v273_v9 = vmul.f32 %v899_v5, %v271_v8 }
 0x6ee   :  { %v276_v6 = vpop.permute.xlu0 %275 }
 0x6ef   :  { %v278_v7 = vmul.f32 %v899_v5, %v276_v6 }
 0x6f1   :  { %280 = vrot.lane.b32.xlu0 %v278_v7, %s945_s15 }
 0x763   :  { %v281_v10 = vpop.permute.xlu0 %280 }
 0x764   :  { %v283_v11 = vadd.f32 %v281_v10, %v273_v9  ;;  %v771_v9 = vld [vmem:[%s1153_s0 + $0xa] sm:$0x3] }
 0x766   :  { %900 = vtanh.f32 %v283_v11 }
 0x770   :  { %v901_v12 = vpop.eup %900 }
 0x771   :  { %286 = vrot.lane.b32.xlu1 %v901_v12, %s944_s14 }
 0x775   :  { %291 = vrot.lane.b32.xlu1 %v283_v11, %s946_s16 }
 0x7e3   :  { %v287_v13 = vpop.permute.xlu1 %286 }
 0x7e4   :  { %v289_v14 = vmul.f32 %v899_v5, %v287_v13 }
 0x7e6   :  { %296 = vrot.lane.b32.xlu0 %v289_v14, %s945_s15 }
 0x7e7   :  { %v292_v15 = vpop.permute.xlu1 %291 }
 0x7e8   :  { %294 = vst.msk [vmem:[#allocation3] sm:$0x3] %vm16_vm0, %v292_v15 }
 0x7ef   :  { %v357_v16 = vld [vmem:[#allocation3] sm:$0x3] }
 0x7f0   :  { %359 = vrot.lane.b32.xlu1 %v357_v16, %s945_s15 }
 0x858   :  { %v297_v17 = vpop.permute.xlu0 %296 }
 0x859   :  { %299 = vst.msk [vmem:[#allocation2] sm:$0x3] %vm16_vm0, %v297_v17  ;;  %762 = vst.msk [vmem:[%s1154_s2 + $0x4] sm:$0x3] %vm16_vm0, %v297_v17 }
 0x860   :  { %v304_v18 = vld [vmem:[#allocation2] sm:$0x3] }
 0x861   :  { %v305_v19 = vpack.c.bf16 %v304_v18, %v304_v18 }
 0x862   :  { %v360_v33 = vpop.permute.xlu1 %359 }
 0x863   :  { %836 = vmatmul.mubr.msk.bf16.vlgmr.msra.gmra.mrb[4].mxu1 %vm38_vm2, %v305_v19 }
 0x864   :  { %848 = vmatpush3.bf16.msra.mxu1 %v966_v1  ;;  %851 = vmatprep.mubr.msk.bf16.mxu1 %vm943_vm1, %v942_v0 }
 0x865   :  { %849 = vmatprep.subr.bf16.mxu1 %v942_v0 }
 0x868   :  { %850 = vmatpush3.bf16.msra.mxu1 %v981_v2 }
 0x869   :  { %863 = vmatprep.subr.bf16.mxu1 %v942_v0 }
 0x936   :  { %v343_v21 = vpop.f32.mrb[4].mxu1 }
 0x937   :  { %v349_v22 = vadd.f32 %v763_v20, %v343_v21  ;;  %v837_v23 = vpop.f32.mrb[5].mxu1 }
 0x938   :  { %v346_v24 = vpop.f32.mrb[6].mxu1 }
 0x939   :  { %902 = vtanh.f32 %v349_v22  ;;  %v838_v25 = vpop.f32.mrb[7].mxu1  ;;  %v765_v27 = vmul.f32 -1.442695, %v349_v22 }
 0x93b   :  { %904 = vpow2.f32 %v765_v27 }
 0x943   :  { %v903_v26 = vpop.eup %902 }
 0x944   :  { %364 = vrot.lane.b32.xlu0 %v903_v26, %s944_s14 }
 0x945   :  { %v905_v28 = vpop.eup %904 }
 0x946   :  { %v353_v29 = vadd.f32 1.0, %v905_v28 }
 0x948   :  { %906 = vrcp.f32 %v353_v29 }
 0x952   :  { %v907_v30 = vpop.eup %906 }
 0x953   :  { %v362_v34 = vmul.f32 %v907_v30, %v360_v33 }
 0x9b6   :  { %v365_v31 = vpop.permute.xlu0 %364 }
 0x9b7   :  { %v367_v32 = vmul.f32 %v907_v30, %v365_v31  ;;  %v775_v31 = vld [vmem:[%s1153_s0 + $0xc] sm:$0x3] }
 0x9b9   :  { %369 = vrot.lane.b32.xlu0 %v367_v32, %s945_s15 }
 0xa2b   :  { %v370_v35 = vpop.permute.xlu0 %369 }
 0xa2c   :  { %v372_v36 = vadd.f32 %v370_v35, %v362_v34 }
 0xa2e   :  { %908 = vtanh.f32 %v372_v36 }
 0xa38   :  { %v909_v37 = vpop.eup %908 }
 0xa39   :  { %375 = vrot.lane.b32.xlu1 %v909_v37, %s944_s14 }
 0xa3d   :  { %380 = vrot.lane.b32.xlu1 %v372_v36, %s946_s16 }
 0xaab   :  { %v376_v38 = vpop.permute.xlu1 %375 }
 0xaac   :  { %v378_v39 = vmul.f32 %v907_v30, %v376_v38 }
 0xaae   :  { %385 = vrot.lane.b32.xlu0 %v378_v39, %s945_s15 }
 0xaaf   :  { %v381_v40 = vpop.permute.xlu1 %380 }
 0xab0   :  { %383 = vst.msk [vmem:[#allocation3] sm:$0x3] %vm16_vm0, %v381_v40 }
 0xab7   :  { %v446_v41 = vld [vmem:[#allocation3] sm:$0x3] }
 0xab8   :  { %448 = vrot.lane.b32.xlu1 %v446_v41, %s945_s15 }
 0xb20   :  { %v386_v42 = vpop.permute.xlu0 %385 }
 0xb21   :  { %388 = vst.msk [vmem:[#allocation2] sm:$0x3] %vm16_vm0, %v386_v42  ;;  %766 = vst.msk [vmem:[%s1154_s2 + $0x6] sm:$0x3] %vm16_vm0, %v386_v42 }
 0xb28   :  { %v393_v43 = vld [vmem:[#allocation2] sm:$0x3] }
 0xb29   :  { %v394_v44 = vpack.c.bf16 %v393_v43, %v393_v43 }
 0xb2a   :  { %v449_v58 = vpop.permute.xlu1 %448 }
 0xb2b   :  { %844 = vmatmul.mubr.msk.bf16.vlgmr.msra.gmra.mrb[8].mxu0 %vm38_vm2, %v394_v44 }
 0xb2c   :  { %856 = vmatpush3.bf16.msra.mxu0 %v966_v1  ;;  %859 = vmatprep.mubr.msk.bf16.mxu0 %vm943_vm1, %v942_v0 }
 0xb2d   :  { %857 = vmatprep.subr.bf16.mxu0 %v942_v0 }
 0xb30   :  { %858 = vmatpush3.bf16.msra.mxu0 %v981_v2 }
 0xbfe   :  { %v432_v46 = vpop.f32.mrb[8].mxu0 }
 0xbff   :  { %v438_v47 = vadd.f32 %v767_v45, %v432_v46  ;;  %v845_v48 = vpop.f32.mrb[9].mxu0 }
 0xc00   :  { %v435_v49 = vpop.f32.mrb[10].mxu0 }
 0xc01   :  { %910 = vtanh.f32 %v438_v47  ;;  %v846_v50 = vpop.f32.mrb[11].mxu0  ;;  %v769_v52 = vmul.f32 -1.442695, %v438_v47 }
 0xc03   :  { %912 = vpow2.f32 %v769_v52 }
 0xc0b   :  { %v911_v51 = vpop.eup %910 }
 0xc0c   :  { %453 = vrot.lane.b32.xlu0 %v911_v51, %s944_s14 }
 0xc0d   :  { %v913_v53 = vpop.eup %912 }
 0xc0e   :  { %v442_v54 = vadd.f32 1.0, %v913_v53 }
 0xc10   :  { %914 = vrcp.f32 %v442_v54 }
 0xc1a   :  { %v915_v55 = vpop.eup %914 }
 0xc1b   :  { %v451_v59 = vmul.f32 %v915_v55, %v449_v58 }
 0xc7e   :  { %v454_v56 = vpop.permute.xlu0 %453 }
 0xc7f   :  { %v456_v57 = vmul.f32 %v915_v55, %v454_v56  ;;  %v779_v56 = vld [vmem:[%s1153_s0 + $0xe] sm:$0x3] }
 0xc81   :  { %458 = vrot.lane.b32.xlu0 %v456_v57, %s945_s15 }
 0xcf3   :  { %v459_v60 = vpop.permute.xlu0 %458 }
 0xcf4   :  { %v461_v61 = vadd.f32 %v459_v60, %v451_v59 }
 0xcf6   :  { %916 = vtanh.f32 %v461_v61 }
 0xd00   :  { %v917_v62 = vpop.eup %916 }
 0xd01   :  { %464 = vrot.lane.b32.xlu1 %v917_v62, %s944_s14 }
 0xd05   :  { %469 = vrot.lane.b32.xlu1 %v461_v61, %s946_s16 }
 0xd73   :  { %v465_v63 = vpop.permute.xlu1 %464 }
 0xd74   :  { %v467_v3 = vmul.f32 %v915_v55, %v465_v63 }
 0xd76   :  { %474 = vrot.lane.b32.xlu0 %v467_v3, %s945_s15 }
 0xd77   :  { %v470_v4 = vpop.permute.xlu1 %469 }
 0xd78   :  { %472 = vst.msk [vmem:[#allocation3] sm:$0x3] %vm16_vm0, %v470_v4 }
 0xd7f   :  { %v535_v5 = vld [vmem:[#allocation3] sm:$0x3] }
 0xd80   :  { %537 = vrot.lane.b32.xlu1 %v535_v5, %s945_s15 }
 0xde8   :  { %v475_v6 = vpop.permute.xlu0 %474 }
 0xde9   :  { %477 = vst.msk [vmem:[#allocation2] sm:$0x3] %vm16_vm0, %v475_v6  ;;  %770 = vst.msk [vmem:[%s1154_s2 + $0x8] sm:$0x3] %vm16_vm0, %v475_v6 }
 0xdf0   :  { %v482_v7 = vld [vmem:[#allocation2] sm:$0x3] }
 0xdf1   :  { %v483_v8 = vpack.c.bf16 %v482_v7, %v482_v7 }
 0xdf2   :  { %v538_v19 = vpop.permute.xlu1 %537 }
 0xdf3   :  { %852 = vmatmul.mubr.msk.bf16.vlgmr.msra.gmra.mrb[8].mxu1 %vm38_vm2, %v483_v8 }
 0xdf4   :  { %864 = vmatpush3.bf16.msra.mxu1 %v966_v1  ;;  %867 = vmatprep.mubr.msk.bf16.mxu1 %vm943_vm1, %v942_v0 }
 0xdf5   :  { %865 = vmatprep.subr.bf16.mxu1 %v942_v0 }
 0xdf8   :  { %866 = vmatpush3.bf16.msra.mxu1 %v981_v2 }
 0xec6   :  { %v521_v10 = vpop.f32.mrb[8].mxu1 }
 0xec7   :  { %v527_v11 = vadd.f32 %v771_v9, %v521_v10  ;;  %v853_v12 = vpop.f32.mrb[9].mxu1 }
 0xec8   :  { %v524_v13 = vpop.f32.mrb[10].mxu1 }
 0xec9   :  { %918 = vtanh.f32 %v527_v11  ;;  %v854_v14 = vpop.f32.mrb[11].mxu1  ;;  %v773_v1 = vmul.f32 -1.442695, %v527_v11 }
 0xecb   :  { %920 = vpow2.f32 %v773_v1 }
 0xed3   :  { %v919_v15 = vpop.eup %918 }
 0xed4   :  { %542 = vrot.lane.b32.xlu0 %v919_v15, %s944_s14 }
 0xed5   :  { %v921_v16 = vpop.eup %920 }
 0xed6   :  { %v531_v17 = vadd.f32 1.0, %v921_v16 }
 0xed8   :  { %922 = vrcp.f32 %v531_v17 }
 0xee2   :  { %v923_v0 = vpop.eup %922 }
 0xee3   :  { %v540_v20 = vmul.f32 %v923_v0, %v538_v19 }
 0xf46   :  { %v543_v2 = vpop.permute.xlu0 %542 }
 0xf47   :  { %v545_v18 = vmul.f32 %v923_v0, %v543_v2 }
 0xf49   :  { %547 = vrot.lane.b32.xlu0 %v545_v18, %s945_s15 }
 0xfbb   :  { %v548_v21 = vpop.permute.xlu0 %547 }
 0xfbc   :  { %v550_v22 = vadd.f32 %v548_v21, %v540_v20 }
 0xfbe   :  { %924 = vtanh.f32 %v550_v22 }
 0xfc8   :  { %v925_v23 = vpop.eup %924 }
 0xfc9   :  { %553 = vrot.lane.b32.xlu1 %v925_v23, %s944_s14 }
 0xfcd   :  { %558 = vrot.lane.b32.xlu1 %v550_v22, %s946_s16 }
0x103b   :  { %v554_v24 = vpop.permute.xlu1 %553 }
0x103c   :  { %v556_v25 = vmul.f32 %v923_v0, %v554_v24 }
0x103e   :  { %563 = vrot.lane.b32.xlu0 %v556_v25, %s945_s15 }
0x103f   :  { %v559_v26 = vpop.permute.xlu1 %558 }
0x1040   :  { %561 = vst.msk [vmem:[#allocation3] sm:$0x3] %vm16_vm0, %v559_v26 }
0x1047   :  { %v624_v27 = vld [vmem:[#allocation3] sm:$0x3] }
0x1048   :  { %626 = vrot.lane.b32.xlu1 %v624_v27, %s945_s15 }
0x10b0   :  { %v564_v28 = vpop.permute.xlu0 %563 }
0x10b1   :  { %566 = vst.msk [vmem:[#allocation2] sm:$0x3] %vm16_vm0, %v564_v28  ;;  %774 = vst.msk [vmem:[%s1154_s2 + $0xa] sm:$0x3] %vm16_vm0, %v564_v28 }
0x10b8   :  { %v571_v29 = vld [vmem:[#allocation2] sm:$0x3] }
0x10b9   :  { %v572_v30 = vpack.c.bf16 %v571_v29, %v571_v29 }
0x10ba   :  { %v627_v44 = vpop.permute.xlu1 %626 }
0x10bb   :  { %860 = vmatmul.mubr.msk.bf16.vlgmr.msra.gmra.mrb[12].mxu0 %vm38_vm2, %v572_v30 }
0x118e   :  { %v610_v32 = vpop.f32.mrb[12].mxu0 }
0x118f   :  { %v616_v33 = vadd.f32 %v775_v31, %v610_v32  ;;  %v861_v34 = vpop.f32.mrb[13].mxu0 }
0x1190   :  { %v613_v35 = vpop.f32.mrb[14].mxu0 }
0x1191   :  { %926 = vtanh.f32 %v616_v33  ;;  %v862_v36 = vpop.f32.mrb[15].mxu0  ;;  %v777_v38 = vmul.f32 -1.442695, %v616_v33 }
0x1193   :  { %928 = vpow2.f32 %v777_v38 }
0x119b   :  { %v927_v37 = vpop.eup %926 }
0x119c   :  { %631 = vrot.lane.b32.xlu0 %v927_v37, %s944_s14 }
0x119d   :  { %v929_v39 = vpop.eup %928 }
0x119e   :  { %v620_v40 = vadd.f32 1.0, %v929_v39 }
0x11a0   :  { %930 = vrcp.f32 %v620_v40 }
0x11aa   :  { %v931_v41 = vpop.eup %930 }
0x11ab   :  { %v629_v45 = vmul.f32 %v931_v41, %v627_v44 }
0x120e   :  { %v632_v42 = vpop.permute.xlu0 %631 }
0x120f   :  { %v634_v43 = vmul.f32 %v931_v41, %v632_v42 }
0x1211   :  { %636 = vrot.lane.b32.xlu0 %v634_v43, %s945_s15 }
0x1283   :  { %v637_v46 = vpop.permute.xlu0 %636 }
0x1284   :  { %v639_v47 = vadd.f32 %v637_v46, %v629_v45 }
0x1286   :  { %932 = vtanh.f32 %v639_v47 }
0x1290   :  { %v933_v48 = vpop.eup %932 }
0x1291   :  { %642 = vrot.lane.b32.xlu1 %v933_v48, %s944_s14 }
0x1295   :  { %647 = vrot.lane.b32.xlu1 %v639_v47, %s946_s16 }
0x1303   :  { %v643_v49 = vpop.permute.xlu1 %642 }
0x1304   :  { %v645_v50 = vmul.f32 %v931_v41, %v643_v49 }
0x1306   :  { %652 = vrot.lane.b32.xlu0 %v645_v50, %s945_s15 }
0x1307   :  { %v648_v51 = vpop.permute.xlu1 %647 }
0x1308   :  { %650 = vst.msk [vmem:[#allocation3] sm:$0x3] %vm16_vm0, %v648_v51 }
0x130f   :  { %v713_v52 = vld [vmem:[#allocation3] sm:$0x3] }
0x1310   :  { %715 = vrot.lane.b32.xlu1 %v713_v52, %s945_s15 }
0x1378   :  { %v653_v53 = vpop.permute.xlu0 %652 }
0x1379   :  { %655 = vst.msk [vmem:[#allocation2] sm:$0x3] %vm16_vm0, %v653_v53  ;;  %778 = vst.msk [vmem:[%s1154_s2 + $0xc] sm:$0x3] %vm16_vm0, %v653_v53 }
0x1380   :  { %v660_v54 = vld [vmem:[#allocation2] sm:$0x3] }
0x1381   :  { %v661_v55 = vpack.c.bf16 %v660_v54, %v660_v54 }
0x1382   :  { %v716_v8 = vpop.permute.xlu1 %715 }
0x1383   :  { %868 = vmatmul.mubr.msk.bf16.vlgmr.msra.gmra.mrb[12].mxu1 %vm38_vm2, %v661_v55 }
0x1456   :  { %v699_v57 = vpop.f32.mrb[12].mxu1 }
0x1457   :  { %v705_v58 = vadd.f32 %v779_v56, %v699_v57  ;;  %v869_v59 = vpop.f32.mrb[13].mxu1 }
0x1458   :  { %v702_v60 = vpop.f32.mrb[14].mxu1 }
0x1459   :  { %934 = vtanh.f32 %v705_v58  ;;  %v870_v61 = vpop.f32.mrb[15].mxu1  ;;  %v781_v63 = vmul.f32 -1.442695, %v705_v58 }
0x145b   :  { %936 = vpow2.f32 %v781_v63 }
0x1463   :  { %v935_v62 = vpop.eup %934 }
0x1464   :  { %720 = vrot.lane.b32.xlu0 %v935_v62, %s944_s14 }
0x1465   :  { %v937_v3 = vpop.eup %936 }
0x1466   :  { %v709_v4 = vadd.f32 1.0, %v937_v3 }
0x1468   :  { %938 = vrcp.f32 %v709_v4 }
0x1472   :  { %v939_v5 = vpop.eup %938 }
0x1473   :  { %v718_v9 = vmul.f32 %v939_v5, %v716_v8 }
0x14d6   :  { %v721_v6 = vpop.permute.xlu0 %720 }
0x14d7   :  { %v723_v7 = vmul.f32 %v939_v5, %v721_v6 }
0x14d9   :  { %725 = vrot.lane.b32.xlu0 %v723_v7, %s945_s15 }
0x154b   :  { %v726_v10 = vpop.permute.xlu0 %725 }
0x154c   :  { %v728_v11 = vadd.f32 %v726_v10, %v718_v9 }
0x154e   :  { %940 = vtanh.f32 %v728_v11  ;;  %736 = vrot.lane.b32.xlu0 %v728_v11, %s946_s16 }
0x1558   :  { %v941_v12 = vpop.eup %940 }
0x1559   :  { %731 = vrot.lane.b32.xlu1 %v941_v12, %s944_s14 }
0x15c0   :  { %v737_v13 = vpop.permute.xlu0 %736 }
0x15c1   :  { %739 = vst.msk [vmem:[#allocation3] sm:$0x3] %vm16_vm0, %v737_v13 }
0x15cb   :  { %v732_v14 = vpop.permute.xlu1 %731 }
0x15cc   :  { %v734_v15 = vmul.f32 %v939_v5, %v732_v14 }
0x15ce   :  { %741 = vrot.lane.b32.xlu1 %v734_v15, %s945_s15 }
0x1640   :  { %v742_v1 = vpop.permute.xlu1 %741 }
0x1641   :  { %744 = vst.msk [vmem:[#allocation2] sm:$0x3] %vm16_vm0, %v742_v1  ;;  %782 = vst.msk [vmem:[%s1154_s2 + $0xe] sm:$0x3] %vm16_vm0, %v742_v1 }

</bundles_post_ra>
